<compile_context>
chip_gen: v7x
topology: tpu7x:2x2x1
jax: 0.10.0
libtpu: 0.0.40
codegen_flags: <defaults>
</compile_context>

<pallas_src>
import numpy as np

import jax
import jax.numpy as jnp
from jax.experimental import pallas as pl
from jax.experimental.pallas import tpu as pltpu


# ----------------------- host-side weight packing ---------------------------

def _pad2(a, rows, cols):
    out = np.zeros((rows, cols), np.float32)
    out[:a.shape[0], :a.shape[1]] = a
    return out


def _pack_conv_banded(w, n_pool_cols, cin, cout):
    """Pack a torch conv weight (Cout, Cin, 5, 5) into 5 banded matrices.

    Returns (5, 128, 256).  For kernel-row di the matrix maps an input row-slab
    (lane index x*Cin+ci, zero padded to 128) to BOTH pool-column phases of the
    conv output:  column b*128 + p*Cout + co  ==  conv(row, 2p+b, co).
    """
    w = np.asarray(w, np.float32)
    out = np.zeros((5, 128, 256), np.float32)
    for di in range(5):
        for b in range(2):
            for p in range(n_pool_cols):
                for dj in range(5):
                    r0 = (2 * p + b + dj) * cin
                    c0 = b * 128 + p * cout
                    out[di, r0:r0 + cin, c0:c0 + cout] = w[:, :, di, dj].T
    return out


def pack_params(p):
    """One-time repack of PyTorch-layout params into matmul-ready VMEM slabs."""
    fc1_w = np.asarray(p["fc1_w"], np.float32)                     # (120, 400)
    # pooled2 layout is (rows: h2 blocks of B samples, cols: p2*16+co2); torch
    # flattens NCHW as co2*25 + h2*5 + p2.
    t = np.transpose(fc1_w.reshape(120, 16, 5, 5), (2, 3, 1, 0))   # (h2,p2,co2,jf)
    fc1_blocks = t.reshape(5, 80, 120)
    fc1r = np.zeros((5 * 128, 128), np.float32)
    for h in range(5):
        fc1r[h * 128:h * 128 + 80, :120] = fc1_blocks[h]

    packed = {
        "w1": _pack_conv_banded(p["conv1_w"], 14, 3, 6),            # (5,128,256)
        "b1": _pad2(np.tile(np.asarray(p["conv1_b"], np.float32), 14)[None, :], 1, 128),
        "w2": _pack_conv_banded(p["conv2_w"], 5, 6, 16),            # (5,128,256)
        "b2": _pad2(np.tile(np.asarray(p["conv2_b"], np.float32), 5)[None, :], 1, 128),
        "fc1w": fc1r,                                               # (640,128)
        "fc1b": _pad2(np.asarray(p["fc1_b"], np.float32)[None, :], 1, 128),
        "fc2w": _pad2(np.asarray(p["fc2_w"], np.float32).T, 128, 128),
        "fc2b": _pad2(np.asarray(p["fc2_b"], np.float32)[None, :], 1, 128),
        "fc3w": _pad2(np.asarray(p["fc3_w"], np.float32).T, 128, 128),
        "fc3b": _pad2(np.asarray(p["fc3_b"], np.float32)[None, :], 1, 128),
    }
    return {k: jnp.asarray(v) for k, v in packed.items()}


# ------------------------------ fused kernel --------------------------------

def _lenet_kernel(x_ref, w1_ref, b1_ref, w2_ref, b2_ref,
                  fc1w_ref, fc1b_ref, fc2w_ref, fc2b_ref, fc3w_ref, fc3b_ref,
                  o_ref):
    f32 = jnp.float32
    bb = x_ref.shape[1]            # samples in this block (multiple of 8)
    r = 8 * bb                     # rows per slab; row index = j*bb + sample

    def band_conv(s_all, w_ref, n_blocks):
        # 5 accumulating MXU pushes; the a-phases (and row parities for conv1)
        # are stacked along M via the contiguous n_blocks-slab window.
        z = None
        for di in range(5):
            t = jnp.dot(s_all[di * r:(di + n_blocks) * r], w_ref[di],
                        preferred_element_type=f32)
            z = t if z is None else z + t
        return z

    def pool_epilogue(za, zb, bias):
        # 2x2 max-pool (row phases = za/zb, col phases = 128-lane halves),
        # then +bias, ReLU.  Padding lanes stay exactly 0.
        m = jnp.maximum(jnp.maximum(za[:, :128], za[:, 128:]),
                        jnp.maximum(zb[:, :128], zb[:, 128:]))
        return jnp.maximum(m + bias, 0.0)

    # ---------------- conv1 + ReLU + maxpool (rows split by parity) ----------
    x = x_ref[...].reshape(32 * bb, 128)        # rows: phase*8bb + j*bb + b
    # 8 stacked slabs: phases 0..3 as-is, then the same shifted by one
    # per-sample row (= bb global rows); the bb filler rows only feed garbage.
    s1 = jnp.concatenate([x, x[bb:], x[:bb]], axis=0)                 # (8r,128)
    z1 = band_conv(s1, w1_ref, 4)                                     # (4r,256)
    b1 = b1_ref[...]
    p_even = pool_epilogue(z1[0:r], z1[r:2 * r], b1)      # pool rows 0,2,..,12
    p_odd = pool_epilogue(z1[2 * r:3 * r], z1[3 * r:4 * r], b1)   # rows 1,3..13

    # ---------------- conv2 + ReLU + maxpool ---------------------------------
    p1 = jnp.concatenate([p_even, p_odd], axis=0)                     # (2r,128)
    s2 = jnp.concatenate([p1, p1[bb:], p1[:bb], p1[2 * bb:], p1[:2 * bb]],
                         axis=0)                                      # (6r,128)
    z2 = band_conv(s2, w2_ref, 2)                                     # (2r,256)
    p2 = pool_epilogue(z2[0:r], z2[r:2 * r], b2_ref[...])             # (r, 128)

    # ---------------- fc1 -> relu -> fc2 -> relu -> fc3 ----------------------
    # rows with h2 = h are the contiguous block p2[h*bb:(h+1)*bb]; gather the 5
    # blocks along lanes -> one (bb, 640) @ (640, 128) matmul.
    fcin = jnp.concatenate([p2[h * bb:(h + 1) * bb] for h in range(5)], axis=1)
    a1 = jnp.maximum(jnp.dot(fcin, fc1w_ref[...], preferred_element_type=f32)
                     + fc1b_ref[...], 0.0)
    a2 = jnp.maximum(jnp.dot(a1, fc2w_ref[...], preferred_element_type=f32)
                     + fc2b_ref[...], 0.0)
    out = jnp.dot(a2, fc3w_ref[...], preferred_element_type=f32) + fc3b_ref[...]
    o_ref[...] = out.astype(o_ref.dtype)         # (bb, 128); logits in lanes 0..1


# ------------------------------ forward pass --------------------------------

def _block_batch(n):
    # Biggest block that still keeps >=2 grid steps when possible (v7x megacore)
    # and stays far inside default scoped VMEM on all generations.
    for bb in (32, 16, 8):
        if n >= 2 * bb:
            return bb
    return 8


def _net_forward(packed, x):
    n = x.shape[0]
    bb = _block_batch(n)
    n_pad = ((n + bb - 1) // bb) * bb
    xp = x.astype(jnp.float32)
    if n_pad != n:
        xp = jnp.pad(xp, ((0, n_pad - n), (0, 0), (0, 0), (0, 0)))

    # NCHW -> (row-phase*8 + row, batch, 32*3 [lane-padded to 128]): sample-minor
    # layout so every in-kernel slab/slice is contiguous and sublane aligned.
    t = xp.reshape(n_pad, 3, 8, 4, 32)             # (n, ci, j, ph, x)
    t = jnp.transpose(t, (3, 2, 0, 4, 1))          # (ph, j, n, x, ci)
    t = t.reshape(32, n_pad, 96)
    xr = jnp.pad(t, ((0, 0), (0, 0), (0, 32)))     # lanes 96 -> 128 (zeros)

    names = ["w1", "b1", "w2", "b2", "fc1w", "fc1b", "fc2w", "fc2b", "fc3w", "fc3b"]
    weights = [packed[k] for k in names]

    def const_spec(a):
        nd = a.ndim
        return pl.BlockSpec(a.shape, lambda i, _nd=nd: (0,) * _nd)

    grid = (n_pad // bb,)
    flops = 2 * n_pad * (5 * 32 * 128 * 256 + 5 * 16 * 128 * 256
                         + 640 * 128 + 128 * 128 + 128 * 128)
    bytes_accessed = (int(xr.size) + n_pad * 128) * 4 \
        + sum(int(w.size) for w in weights) * 4

    out = pl.pallas_call(
        _lenet_kernel,
        grid=grid,
        in_specs=[pl.BlockSpec((32, bb, 128), lambda i: (0, i, 0))]
                 + [const_spec(w) for w in weights],
        out_specs=pl.BlockSpec((bb, 128), lambda i: (i, 0)),
        out_shape=jax.ShapeDtypeStruct((n_pad, 128), jnp.float32),
        compiler_params=pltpu.CompilerParams(
            dimension_semantics=("parallel",)),
        cost_estimate=pl.CostEstimate(flops=flops, transcendentals=0,
                                      bytes_accessed=bytes_accessed),
    )(xr, *weights)
    return out[:n, :2]


net_forward = jax.jit(_net_forward)


# ------------------------- pure-JAX reference -------------------------------

def _reference_forward(params, x):
    def conv(y, w, b):
        y = jax.lax.conv_general_dilated(
            y, w, window_strides=(1, 1), padding="VALID",
            dimension_numbers=("NCHW", "OIHW", "NCHW"))
        return jax.nn.relu(y + b[None, :, None, None])

    def pool2(y):
        n, c, h, w = y.shape
        return y.reshape(n, c, h // 2, 2, w // 2, 2).max(axis=(3, 5))

    y = pool2(conv(x, params["conv1_w"], params["conv1_b"]))
    y = pool2(conv(y, params["conv2_w"], params["conv2_b"]))
    y = y.reshape(y.shape[0], -1)
    y = jax.nn.relu(y @ params["fc1_w"].T + params["fc1_b"])
    y = jax.nn.relu(y @ params["fc2_w"].T + params["fc2_b"])
    return y @ params["fc3_w"].T + params["fc3_b"]


# ------------------------------ param init ----------------------------------

def init_params(key):
    """Deterministic init mimicking PyTorch's default U(-1/sqrt(fan_in), +)."""
    keys = jax.random.split(key, 10)

    def u(k, shape, fan_in):
        bound = 1.0 / (fan_in ** 0.5)
        return jax.random.uniform(k, shape, jnp.float32, -bound, bound)

    return {
        "conv1_w": u(keys[0], (6, 3, 5, 5), 3 * 5 * 5),
        "conv1_b": u(keys[1], (6,), 3 * 5 * 5),
        "conv2_w": u(keys[2], (16, 6, 5, 5), 6 * 5 * 5),
        "conv2_b": u(keys[3], (16,), 6 * 5 * 5),
        "fc1_w": u(keys[4], (120, 16 * 5 * 5), 16 * 5 * 5),
        "fc1_b": u(keys[5], (120,), 16 * 5 * 5),
        "fc2_w": u(keys[6], (84, 120), 120),
        "fc2_b": u(keys[7], (84,), 120),
        "fc3_w": u(keys[8], (2, 84), 84),
        "fc3_b": u(keys[9], (2,), 84),
    }


if __name__ == "__main__":
    key = jax.random.PRNGKey(0)
    pkey, xkey = jax.random.split(key)
    params = init_params(pkey)
    packed = pack_params(params)                    # one-time weight repack
    x = jax.random.normal(xkey, (2, 3, 32, 32), dtype=jnp.float32)

    out = jax.block_until_ready(net_forward(packed, x))
    assert out.shape == (2, 2) and out.dtype == jnp.float32

    ref = jax.block_until_ready(_reference_forward(params, x))
    # Loose tolerance: in-kernel dots use default TPU (bf16-pass) f32 precision.
    np.testing.assert_allclose(np.asarray(out), np.asarray(ref),
                               rtol=5e-2, atol=5e-2)
    print("KERNEL_OK")
</pallas_src>

<mosaic_0001>
module attributes {stable_mosaic.version = 11 : i64} {
  func.func @_lenet_kernel(%arg0: i32, %arg1: memref<32x8x128xf32, #tpu.memory_space<vmem>>, %arg2: memref<5x128x256xf32, #tpu.memory_space<vmem>>, %arg3: memref<1x128xf32, #tpu.memory_space<vmem>>, %arg4: memref<5x128x256xf32, #tpu.memory_space<vmem>>, %arg5: memref<1x128xf32, #tpu.memory_space<vmem>>, %arg6: memref<640x128xf32, #tpu.memory_space<vmem>>, %arg7: memref<1x128xf32, #tpu.memory_space<vmem>>, %arg8: memref<128x128xf32, #tpu.memory_space<vmem>>, %arg9: memref<1x128xf32, #tpu.memory_space<vmem>>, %arg10: memref<128x128xf32, #tpu.memory_space<vmem>>, %arg11: memref<1x128xf32, #tpu.memory_space<vmem>>, %arg12: memref<8x128xf32, #tpu.memory_space<vmem>>) attributes {dimension_semantics = [#tpu.dimension_semantics<parallel>], iteration_bounds = array<i64: 1>, scalar_prefetch = 0 : i64, scratch_operands = 0 : i64, tpu.core_type = #tpu.core_type<tc>, window_params = [{transform_indices = @transform_0, window_bounds = array<i64: 32, 8, 128>}, {pipeline_mode = #tpu.pipeline_mode<synchronous>, transform_indices = @transform_1, window_bounds = array<i64: 5, 128, 256>}, {pipeline_mode = #tpu.pipeline_mode<synchronous>, transform_indices = @transform_2, window_bounds = array<i64: 1, 128>}, {pipeline_mode = #tpu.pipeline_mode<synchronous>, transform_indices = @transform_3, window_bounds = array<i64: 5, 128, 256>}, {pipeline_mode = #tpu.pipeline_mode<synchronous>, transform_indices = @transform_4, window_bounds = array<i64: 1, 128>}, {pipeline_mode = #tpu.pipeline_mode<synchronous>, transform_indices = @transform_5, window_bounds = array<i64: 640, 128>}, {pipeline_mode = #tpu.pipeline_mode<synchronous>, transform_indices = @transform_6, window_bounds = array<i64: 1, 128>}, {pipeline_mode = #tpu.pipeline_mode<synchronous>, transform_indices = @transform_7, window_bounds = array<i64: 128, 128>}, {pipeline_mode = #tpu.pipeline_mode<synchronous>, transform_indices = @transform_8, window_bounds = array<i64: 1, 128>}, {pipeline_mode = #tpu.pipeline_mode<synchronous>, transform_indices = @transform_9, window_bounds = array<i64: 128, 128>}, {pipeline_mode = #tpu.pipeline_mode<synchronous>, transform_indices = @transform_10, window_bounds = array<i64: 1, 128>}, {transform_indices = @transform_11, window_bounds = array<i64: 8, 128>}]} {
    %c0 = arith.constant 0 : index
    %c0_0 = arith.constant 0 : index
    %c0_1 = arith.constant 0 : index
    %0 = vector.load %arg1[%c0, %c0_0, %c0_1] : memref<32x8x128xf32, #tpu.memory_space<vmem>>, vector<32x8x128xf32>
    %1 = vector.shape_cast %0 : vector<32x8x128xf32> to vector<256x128xf32>
    %2 = vector.extract_strided_slice %1 {offsets = [8, 0], sizes = [248, 128], strides = [1, 1]} : vector<256x128xf32> to vector<248x128xf32>
    %3 = vector.extract_strided_slice %1 {offsets = [0, 0], sizes = [8, 128], strides = [1, 1]} : vector<256x128xf32> to vector<8x128xf32>
    %4 = tpu.concatenate %1, %2, %3 in 0 : vector<256x128xf32>, vector<248x128xf32>, vector<8x128xf32> -> vector<512x128xf32>
    %5 = vector.extract_strided_slice %4 {offsets = [0, 0], sizes = [256, 128], strides = [1, 1]} : vector<512x128xf32> to vector<256x128xf32>
    %c0_2 = arith.constant 0 : index
    %c0_3 = arith.constant 0 : index
    %c0_4 = arith.constant 0 : index
    %6 = vector.load %arg2[%c0_2, %c0_3, %c0_4] : memref<5x128x256xf32, #tpu.memory_space<vmem>>, vector<1x128x256xf32>
    %7 = vector.shape_cast %6 : vector<1x128x256xf32> to vector<128x256xf32>
    %cst = arith.constant dense<0.000000e+00> : vector<256x256xf32>
    %8 = tpu.matmul %5, %7, %cst {dimension_numbers = #tpu.dot_dimension_numbers<[1], [0], [0], [1], [0, 0, 1, 1], [], []>} : vector<256x128xf32>, vector<128x256xf32>, vector<256x256xf32> -> vector<256x256xf32>
    %9 = vector.extract_strided_slice %4 {offsets = [64, 0], sizes = [256, 128], strides = [1, 1]} : vector<512x128xf32> to vector<256x128xf32>
    %c1 = arith.constant 1 : index
    %c0_5 = arith.constant 0 : index
    %c0_6 = arith.constant 0 : index
    %10 = vector.load %arg2[%c1, %c0_5, %c0_6] : memref<5x128x256xf32, #tpu.memory_space<vmem>>, vector<1x128x256xf32>
    %11 = vector.shape_cast %10 : vector<1x128x256xf32> to vector<128x256xf32>
    %cst_7 = arith.constant dense<0.000000e+00> : vector<256x256xf32>
    %12 = tpu.matmul %9, %11, %cst_7 {dimension_numbers = #tpu.dot_dimension_numbers<[1], [0], [0], [1], [0, 0, 1, 1], [], []>} : vector<256x128xf32>, vector<128x256xf32>, vector<256x256xf32> -> vector<256x256xf32>
    %13 = arith.addf %8, %12 : vector<256x256xf32>
    %14 = vector.extract_strided_slice %4 {offsets = [128, 0], sizes = [256, 128], strides = [1, 1]} : vector<512x128xf32> to vector<256x128xf32>
    %c2 = arith.constant 2 : index
    %c0_8 = arith.constant 0 : index
    %c0_9 = arith.constant 0 : index
    %15 = vector.load %arg2[%c2, %c0_8, %c0_9] : memref<5x128x256xf32, #tpu.memory_space<vmem>>, vector<1x128x256xf32>
    %16 = vector.shape_cast %15 : vector<1x128x256xf32> to vector<128x256xf32>
    %cst_10 = arith.constant dense<0.000000e+00> : vector<256x256xf32>
    %17 = tpu.matmul %14, %16, %cst_10 {dimension_numbers = #tpu.dot_dimension_numbers<[1], [0], [0], [1], [0, 0, 1, 1], [], []>} : vector<256x128xf32>, vector<128x256xf32>, vector<256x256xf32> -> vector<256x256xf32>
    %18 = arith.addf %13, %17 : vector<256x256xf32>
    %19 = vector.extract_strided_slice %4 {offsets = [192, 0], sizes = [256, 128], strides = [1, 1]} : vector<512x128xf32> to vector<256x128xf32>
    %c3 = arith.constant 3 : index
    %c0_11 = arith.constant 0 : index
    %c0_12 = arith.constant 0 : index
    %20 = vector.load %arg2[%c3, %c0_11, %c0_12] : memref<5x128x256xf32, #tpu.memory_space<vmem>>, vector<1x128x256xf32>
    %21 = vector.shape_cast %20 : vector<1x128x256xf32> to vector<128x256xf32>
    %cst_13 = arith.constant dense<0.000000e+00> : vector<256x256xf32>
    %22 = tpu.matmul %19, %21, %cst_13 {dimension_numbers = #tpu.dot_dimension_numbers<[1], [0], [0], [1], [0, 0, 1, 1], [], []>} : vector<256x128xf32>, vector<128x256xf32>, vector<256x256xf32> -> vector<256x256xf32>
    %23 = arith.addf %18, %22 : vector<256x256xf32>
    %24 = vector.extract_strided_slice %4 {offsets = [256, 0], sizes = [256, 128], strides = [1, 1]} : vector<512x128xf32> to vector<256x128xf32>
    %c4 = arith.constant 4 : index
    %c0_14 = arith.constant 0 : index
    %c0_15 = arith.constant 0 : index
    %25 = vector.load %arg2[%c4, %c0_14, %c0_15] : memref<5x128x256xf32, #tpu.memory_space<vmem>>, vector<1x128x256xf32>
    %26 = vector.shape_cast %25 : vector<1x128x256xf32> to vector<128x256xf32>
    %cst_16 = arith.constant dense<0.000000e+00> : vector<256x256xf32>
    %27 = tpu.matmul %24, %26, %cst_16 {dimension_numbers = #tpu.dot_dimension_numbers<[1], [0], [0], [1], [0, 0, 1, 1], [], []>} : vector<256x128xf32>, vector<128x256xf32>, vector<256x256xf32> -> vector<256x256xf32>
    %28 = arith.addf %23, %27 : vector<256x256xf32>
    %c0_17 = arith.constant 0 : index
    %c0_18 = arith.constant 0 : index
    %29 = vector.load %arg3[%c0_17, %c0_18] : memref<1x128xf32, #tpu.memory_space<vmem>>, vector<1x128xf32>
    %30 = vector.extract_strided_slice %28 {offsets = [0, 0], sizes = [64, 256], strides = [1, 1]} : vector<256x256xf32> to vector<64x256xf32>
    %31 = vector.extract_strided_slice %28 {offsets = [64, 0], sizes = [64, 256], strides = [1, 1]} : vector<256x256xf32> to vector<64x256xf32>
    %32 = vector.extract_strided_slice %30 {offsets = [0, 0], sizes = [64, 128], strides = [1, 1]} : vector<64x256xf32> to vector<64x128xf32>
    %33 = vector.extract_strided_slice %30 {offsets = [0, 128], sizes = [64, 128], strides = [1, 1]} : vector<64x256xf32> to vector<64x128xf32>
    %34 = arith.maximumf %32, %33 : vector<64x128xf32>
    %35 = vector.extract_strided_slice %31 {offsets = [0, 0], sizes = [64, 128], strides = [1, 1]} : vector<64x256xf32> to vector<64x128xf32>
    %36 = vector.extract_strided_slice %31 {offsets = [0, 128], sizes = [64, 128], strides = [1, 1]} : vector<64x256xf32> to vector<64x128xf32>
    %37 = arith.maximumf %35, %36 : vector<64x128xf32>
    %38 = arith.maximumf %34, %37 : vector<64x128xf32>
    %39 = vector.broadcast %29 : vector<1x128xf32> to vector<64x128xf32>
    %40 = arith.addf %38, %39 : vector<64x128xf32>
    %cst_19 = arith.constant 0.000000e+00 : f32
    %41 = vector.broadcast %cst_19 : f32 to vector<64x128xf32>
    %42 = arith.maximumf %40, %41 : vector<64x128xf32>
    %43 = vector.extract_strided_slice %28 {offsets = [128, 0], sizes = [64, 256], strides = [1, 1]} : vector<256x256xf32> to vector<64x256xf32>
    %44 = vector.extract_strided_slice %28 {offsets = [192, 0], sizes = [64, 256], strides = [1, 1]} : vector<256x256xf32> to vector<64x256xf32>
    %45 = vector.extract_strided_slice %43 {offsets = [0, 0], sizes = [64, 128], strides = [1, 1]} : vector<64x256xf32> to vector<64x128xf32>
    %46 = vector.extract_strided_slice %43 {offsets = [0, 128], sizes = [64, 128], strides = [1, 1]} : vector<64x256xf32> to vector<64x128xf32>
    %47 = arith.maximumf %45, %46 : vector<64x128xf32>
    %48 = vector.extract_strided_slice %44 {offsets = [0, 0], sizes = [64, 128], strides = [1, 1]} : vector<64x256xf32> to vector<64x128xf32>
    %49 = vector.extract_strided_slice %44 {offsets = [0, 128], sizes = [64, 128], strides = [1, 1]} : vector<64x256xf32> to vector<64x128xf32>
    %50 = arith.maximumf %48, %49 : vector<64x128xf32>
    %51 = arith.maximumf %47, %50 : vector<64x128xf32>
    %52 = vector.broadcast %29 : vector<1x128xf32> to vector<64x128xf32>
    %53 = arith.addf %51, %52 : vector<64x128xf32>
    %cst_20 = arith.constant 0.000000e+00 : f32
    %54 = vector.broadcast %cst_20 : f32 to vector<64x128xf32>
    %55 = arith.maximumf %53, %54 : vector<64x128xf32>
    %56 = tpu.concatenate %42, %55 in 0 : vector<64x128xf32>, vector<64x128xf32> -> vector<128x128xf32>
    %57 = vector.extract_strided_slice %56 {offsets = [8, 0], sizes = [120, 128], strides = [1, 1]} : vector<128x128xf32> to vector<120x128xf32>
    %58 = vector.extract_strided_slice %56 {offsets = [0, 0], sizes = [8, 128], strides = [1, 1]} : vector<128x128xf32> to vector<8x128xf32>
    %59 = vector.extract_strided_slice %56 {offsets = [16, 0], sizes = [112, 128], strides = [1, 1]} : vector<128x128xf32> to vector<112x128xf32>
    %60 = vector.extract_strided_slice %56 {offsets = [0, 0], sizes = [16, 128], strides = [1, 1]} : vector<128x128xf32> to vector<16x128xf32>
    %61 = tpu.concatenate %56, %57, %58, %59, %60 in 0 : vector<128x128xf32>, vector<120x128xf32>, vector<8x128xf32>, vector<112x128xf32>, vector<16x128xf32> -> vector<384x128xf32>
    %62 = vector.extract_strided_slice %61 {offsets = [0, 0], sizes = [128, 128], strides = [1, 1]} : vector<384x128xf32> to vector<128x128xf32>
    %c0_21 = arith.constant 0 : index
    %c0_22 = arith.constant 0 : index
    %c0_23 = arith.constant 0 : index
    %63 = vector.load %arg4[%c0_21, %c0_22, %c0_23] : memref<5x128x256xf32, #tpu.memory_space<vmem>>, vector<1x128x256xf32>
    %64 = vector.shape_cast %63 : vector<1x128x256xf32> to vector<128x256xf32>
    %cst_24 = arith.constant dense<0.000000e+00> : vector<128x256xf32>
    %65 = tpu.matmul %62, %64, %cst_24 {dimension_numbers = #tpu.dot_dimension_numbers<[1], [0], [0], [1], [0, 0, 1, 1], [], []>} : vector<128x128xf32>, vector<128x256xf32>, vector<128x256xf32> -> vector<128x256xf32>
    %66 = vector.extract_strided_slice %61 {offsets = [64, 0], sizes = [128, 128], strides = [1, 1]} : vector<384x128xf32> to vector<128x128xf32>
    %c1_25 = arith.constant 1 : index
    %c0_26 = arith.constant 0 : index
    %c0_27 = arith.constant 0 : index
    %67 = vector.load %arg4[%c1_25, %c0_26, %c0_27] : memref<5x128x256xf32, #tpu.memory_space<vmem>>, vector<1x128x256xf32>
    %68 = vector.shape_cast %67 : vector<1x128x256xf32> to vector<128x256xf32>
    %cst_28 = arith.constant dense<0.000000e+00> : vector<128x256xf32>
    %69 = tpu.matmul %66, %68, %cst_28 {dimension_numbers = #tpu.dot_dimension_numbers<[1], [0], [0], [1], [0, 0, 1, 1], [], []>} : vector<128x128xf32>, vector<128x256xf32>, vector<128x256xf32> -> vector<128x256xf32>
    %70 = arith.addf %65, %69 : vector<128x256xf32>
    %71 = vector.extract_strided_slice %61 {offsets = [128, 0], sizes = [128, 128], strides = [1, 1]} : vector<384x128xf32> to vector<128x128xf32>
    %c2_29 = arith.constant 2 : index
    %c0_30 = arith.constant 0 : index
    %c0_31 = arith.constant 0 : index
    %72 = vector.load %arg4[%c2_29, %c0_30, %c0_31] : memref<5x128x256xf32, #tpu.memory_space<vmem>>, vector<1x128x256xf32>
    %73 = vector.shape_cast %72 : vector<1x128x256xf32> to vector<128x256xf32>
    %cst_32 = arith.constant dense<0.000000e+00> : vector<128x256xf32>
    %74 = tpu.matmul %71, %73, %cst_32 {dimension_numbers = #tpu.dot_dimension_numbers<[1], [0], [0], [1], [0, 0, 1, 1], [], []>} : vector<128x128xf32>, vector<128x256xf32>, vector<128x256xf32> -> vector<128x256xf32>
    %75 = arith.addf %70, %74 : vector<128x256xf32>
    %76 = vector.extract_strided_slice %61 {offsets = [192, 0], sizes = [128, 128], strides = [1, 1]} : vector<384x128xf32> to vector<128x128xf32>
    %c3_33 = arith.constant 3 : index
    %c0_34 = arith.constant 0 : index
    %c0_35 = arith.constant 0 : index
    %77 = vector.load %arg4[%c3_33, %c0_34, %c0_35] : memref<5x128x256xf32, #tpu.memory_space<vmem>>, vector<1x128x256xf32>
    %78 = vector.shape_cast %77 : vector<1x128x256xf32> to vector<128x256xf32>
    %cst_36 = arith.constant dense<0.000000e+00> : vector<128x256xf32>
    %79 = tpu.matmul %76, %78, %cst_36 {dimension_numbers = #tpu.dot_dimension_numbers<[1], [0], [0], [1], [0, 0, 1, 1], [], []>} : vector<128x128xf32>, vector<128x256xf32>, vector<128x256xf32> -> vector<128x256xf32>
    %80 = arith.addf %75, %79 : vector<128x256xf32>
    %81 = vector.extract_strided_slice %61 {offsets = [256, 0], sizes = [128, 128], strides = [1, 1]} : vector<384x128xf32> to vector<128x128xf32>
    %c4_37 = arith.constant 4 : index
    %c0_38 = arith.constant 0 : index
    %c0_39 = arith.constant 0 : index
    %82 = vector.load %arg4[%c4_37, %c0_38, %c0_39] : memref<5x128x256xf32, #tpu.memory_space<vmem>>, vector<1x128x256xf32>
    %83 = vector.shape_cast %82 : vector<1x128x256xf32> to vector<128x256xf32>
    %cst_40 = arith.constant dense<0.000000e+00> : vector<128x256xf32>
    %84 = tpu.matmul %81, %83, %cst_40 {dimension_numbers = #tpu.dot_dimension_numbers<[1], [0], [0], [1], [0, 0, 1, 1], [], []>} : vector<128x128xf32>, vector<128x256xf32>, vector<128x256xf32> -> vector<128x256xf32>
    %85 = arith.addf %80, %84 : vector<128x256xf32>
    %86 = vector.extract_strided_slice %85 {offsets = [0, 0], sizes = [64, 256], strides = [1, 1]} : vector<128x256xf32> to vector<64x256xf32>
    %87 = vector.extract_strided_slice %85 {offsets = [64, 0], sizes = [64, 256], strides = [1, 1]} : vector<128x256xf32> to vector<64x256xf32>
    %c0_41 = arith.constant 0 : index
    %c0_42 = arith.constant 0 : index
    %88 = vector.load %arg5[%c0_41, %c0_42] : memref<1x128xf32, #tpu.memory_space<vmem>>, vector<1x128xf32>
    %89 = vector.extract_strided_slice %86 {offsets = [0, 0], sizes = [64, 128], strides = [1, 1]} : vector<64x256xf32> to vector<64x128xf32>
    %90 = vector.extract_strided_slice %86 {offsets = [0, 128], sizes = [64, 128], strides = [1, 1]} : vector<64x256xf32> to vector<64x128xf32>
    %91 = arith.maximumf %89, %90 : vector<64x128xf32>
    %92 = vector.extract_strided_slice %87 {offsets = [0, 0], sizes = [64, 128], strides = [1, 1]} : vector<64x256xf32> to vector<64x128xf32>
    %93 = vector.extract_strided_slice %87 {offsets = [0, 128], sizes = [64, 128], strides = [1, 1]} : vector<64x256xf32> to vector<64x128xf32>
    %94 = arith.maximumf %92, %93 : vector<64x128xf32>
    %95 = arith.maximumf %91, %94 : vector<64x128xf32>
    %96 = vector.broadcast %88 : vector<1x128xf32> to vector<64x128xf32>
    %97 = arith.addf %95, %96 : vector<64x128xf32>
    %cst_43 = arith.constant 0.000000e+00 : f32
    %98 = vector.broadcast %cst_43 : f32 to vector<64x128xf32>
    %99 = arith.maximumf %97, %98 : vector<64x128xf32>
    %100 = vector.extract_strided_slice %99 {offsets = [0, 0], sizes = [8, 128], strides = [1, 1]} : vector<64x128xf32> to vector<8x128xf32>
    %101 = vector.extract_strided_slice %99 {offsets = [8, 0], sizes = [8, 128], strides = [1, 1]} : vector<64x128xf32> to vector<8x128xf32>
    %102 = vector.extract_strided_slice %99 {offsets = [16, 0], sizes = [8, 128], strides = [1, 1]} : vector<64x128xf32> to vector<8x128xf32>
    %103 = vector.extract_strided_slice %99 {offsets = [24, 0], sizes = [8, 128], strides = [1, 1]} : vector<64x128xf32> to vector<8x128xf32>
    %104 = vector.extract_strided_slice %99 {offsets = [32, 0], sizes = [8, 128], strides = [1, 1]} : vector<64x128xf32> to vector<8x128xf32>
    %105 = tpu.concatenate %100, %101, %102, %103, %104 in 1 : vector<8x128xf32>, vector<8x128xf32>, vector<8x128xf32>, vector<8x128xf32>, vector<8x128xf32> -> vector<8x640xf32>
    %c0_44 = arith.constant 0 : index
    %c0_45 = arith.constant 0 : index
    %106 = vector.load %arg6[%c0_44, %c0_45] : memref<640x128xf32, #tpu.memory_space<vmem>>, vector<640x128xf32>
    %cst_46 = arith.constant dense<0.000000e+00> : vector<8x128xf32>
    %107 = tpu.matmul %105, %106, %cst_46 {dimension_numbers = #tpu.dot_dimension_numbers<[1], [0], [0], [1], [0, 0, 1, 1], [], []>} : vector<8x640xf32>, vector<640x128xf32>, vector<8x128xf32> -> vector<8x128xf32>
    %c0_47 = arith.constant 0 : index
    %c0_48 = arith.constant 0 : index
    %108 = vector.load %arg7[%c0_47, %c0_48] : memref<1x128xf32, #tpu.memory_space<vmem>>, vector<1x128xf32>
    %109 = vector.broadcast %108 : vector<1x128xf32> to vector<8x128xf32>
    %110 = arith.addf %107, %109 : vector<8x128xf32>
    %cst_49 = arith.constant 0.000000e+00 : f32
    %111 = vector.broadcast %cst_49 : f32 to vector<8x128xf32>
    %112 = arith.maximumf %110, %111 : vector<8x128xf32>
    %c0_50 = arith.constant 0 : index
    %c0_51 = arith.constant 0 : index
    %113 = vector.load %arg8[%c0_50, %c0_51] : memref<128x128xf32, #tpu.memory_space<vmem>>, vector<128x128xf32>
    %cst_52 = arith.constant dense<0.000000e+00> : vector<8x128xf32>
    %114 = tpu.matmul %112, %113, %cst_52 {dimension_numbers = #tpu.dot_dimension_numbers<[1], [0], [0], [1], [0, 0, 1, 1], [], []>} : vector<8x128xf32>, vector<128x128xf32>, vector<8x128xf32> -> vector<8x128xf32>
    %c0_53 = arith.constant 0 : index
    %c0_54 = arith.constant 0 : index
    %115 = vector.load %arg9[%c0_53, %c0_54] : memref<1x128xf32, #tpu.memory_space<vmem>>, vector<1x128xf32>
    %116 = vector.broadcast %115 : vector<1x128xf32> to vector<8x128xf32>
    %117 = arith.addf %114, %116 : vector<8x128xf32>
    %cst_55 = arith.constant 0.000000e+00 : f32
    %118 = vector.broadcast %cst_55 : f32 to vector<8x128xf32>
    %119 = arith.maximumf %117, %118 : vector<8x128xf32>
    %c0_56 = arith.constant 0 : index
    %c0_57 = arith.constant 0 : index
    %120 = vector.load %arg10[%c0_56, %c0_57] : memref<128x128xf32, #tpu.memory_space<vmem>>, vector<128x128xf32>
    %cst_58 = arith.constant dense<0.000000e+00> : vector<8x128xf32>
    %121 = tpu.matmul %119, %120, %cst_58 {dimension_numbers = #tpu.dot_dimension_numbers<[1], [0], [0], [1], [0, 0, 1, 1], [], []>} : vector<8x128xf32>, vector<128x128xf32>, vector<8x128xf32> -> vector<8x128xf32>
    %c0_59 = arith.constant 0 : index
    %c0_60 = arith.constant 0 : index
    %122 = vector.load %arg11[%c0_59, %c0_60] : memref<1x128xf32, #tpu.memory_space<vmem>>, vector<1x128xf32>
    %123 = vector.broadcast %122 : vector<1x128xf32> to vector<8x128xf32>
    %124 = arith.addf %121, %123 : vector<8x128xf32>
    %c0_61 = arith.constant 0 : index
    %c0_62 = arith.constant 0 : index
    %125 = vector.load %arg12[%c0_61, %c0_62] : memref<8x128xf32, #tpu.memory_space<vmem>>, vector<8x128xf32>
    tpu.vector_store %arg12[%c0_61, %c0_62], %124 {strides = array<i32>} : memref<8x128xf32, #tpu.memory_space<vmem>>, vector<8x128xf32>,
    return
  }
  func.func @transform_0(%arg0: i32) -> (i32, i32, i32) {
    %c0_i32 = arith.constant 0 : i32
    %c0_i32_0 = arith.constant 0 : i32
    %c0_i32_1 = arith.constant 0 : i32
    return %c0_i32, %arg0, %c0_i32_0 : i32, i32, i32
  }
  func.func @transform_1(%arg0: i32) -> (i32, i32, i32) {
    %c0_i32 = arith.constant 0 : i32
    %c0_i32_0 = arith.constant 0 : i32
    %c0_i32_1 = arith.constant 0 : i32
    %c0_i32_2 = arith.constant 0 : i32
    return %c0_i32, %c0_i32_0, %c0_i32_1 : i32, i32, i32
  }
  func.func @transform_2(%arg0: i32) -> (i32, i32) {
    %c0_i32 = arith.constant 0 : i32
    %c0_i32_0 = arith.constant 0 : i32
    %c0_i32_1 = arith.constant 0 : i32
    return %c0_i32, %c0_i32_0 : i32, i32
  }
  func.func @transform_3(%arg0: i32) -> (i32, i32, i32) {
    %c0_i32 = arith.constant 0 : i32
    %c0_i32_0 = arith.constant 0 : i32
    %c0_i32_1 = arith.constant 0 : i32
    %c0_i32_2 = arith.constant 0 : i32
    return %c0_i32, %c0_i32_0, %c0_i32_1 : i32, i32, i32
  }
  func.func @transform_4(%arg0: i32) -> (i32, i32) {
    %c0_i32 = arith.constant 0 : i32
    %c0_i32_0 = arith.constant 0 : i32
    %c0_i32_1 = arith.constant 0 : i32
    return %c0_i32, %c0_i32_0 : i32, i32
  }
  func.func @transform_5(%arg0: i32) -> (i32, i32) {
    %c0_i32 = arith.constant 0 : i32
    %c0_i32_0 = arith.constant 0 : i32
    %c0_i32_1 = arith.constant 0 : i32
    return %c0_i32, %c0_i32_0 : i32, i32
  }
  func.func @transform_6(%arg0: i32) -> (i32, i32) {
    %c0_i32 = arith.constant 0 : i32
    %c0_i32_0 = arith.constant 0 : i32
    %c0_i32_1 = arith.constant 0 : i32
    return %c0_i32, %c0_i32_0 : i32, i32
  }
  func.func @transform_7(%arg0: i32) -> (i32, i32) {
    %c0_i32 = arith.constant 0 : i32
    %c0_i32_0 = arith.constant 0 : i32
    %c0_i32_1 = arith.constant 0 : i32
    return %c0_i32, %c0_i32_0 : i32, i32
  }
  func.func @transform_8(%arg0: i32) -> (i32, i32) {
    %c0_i32 = arith.constant 0 : i32
    %c0_i32_0 = arith.constant 0 : i32
    %c0_i32_1 = arith.constant 0 : i32
    return %c0_i32, %c0_i32_0 : i32, i32
  }
  func.func @transform_9(%arg0: i32) -> (i32, i32) {
    %c0_i32 = arith.constant 0 : i32
    %c0_i32_0 = arith.constant 0 : i32
    %c0_i32_1 = arith.constant 0 : i32
    return %c0_i32, %c0_i32_0 : i32, i32
  }
  func.func @transform_10(%arg0: i32) -> (i32, i32) {
    %c0_i32 = arith.constant 0 : i32
    %c0_i32_0 = arith.constant 0 : i32
    %c0_i32_1 = arith.constant 0 : i32
    return %c0_i32, %c0_i32_0 : i32, i32
  }
  func.func @transform_11(%arg0: i32) -> (i32, i32) {
    %c0_i32 = arith.constant 0 : i32
    %c0_i32_0 = arith.constant 0 : i32
    return %arg0, %c0_i32 : i32, i32
  }
}

</mosaic_0001>

<bundles_post_ra>
// kernel: _net_forward.1
= control target key start
LH: loop header
LB: loop body
LE: loop exit
PB: predicated region body
PF: predicated region fallthrough
CT: control target
= control target key end

     0   :  { %v6955_v3 = vmov 0.0   ;;  %vm4597_vm0 = vmmov 0   ;;  %s6943_s1 = inlined_call_operand.vmem [shape: f32[5,128,256], index: 1, kind: input, shape index: {}]   ;;  %s6944_s0 = inlined_call_operand.vmem [shape: f32[32,8,128], index: 0, kind: input, shape index: {}]   ;;  %s6945_s3 = inlined_call_operand.vmem [shape: f32[5,128,256], index: 3, kind: input, shape index: {}]   ;;  %s6946_s2 = inlined_call_operand.vmem [shape: f32[1,128], index: 2, kind: input, shape index: {}]   ;;  %s6947_s5 = inlined_call_operand.vmem [shape: f32[640,128], index: 5, kind: input, shape index: {}]   ;;  %s6948_s4 = inlined_call_operand.vmem [shape: f32[1,128], index: 4, kind: input, shape index: {}]   ;;  %s6949_s7 = inlined_call_operand.vmem [shape: f32[128,128], index: 7, kind: input, shape index: {}]   ;;  %s6950_s6 = inlined_call_operand.vmem [shape: f32[1,128], index: 6, kind: input, shape index: {}]   ;;  %s6951_s9 = inlined_call_operand.vmem [shape: f32[128,128], index: 9, kind: input, shape index: {}]   ;;  %s6952_s8 = inlined_call_operand.vmem [shape: f32[1,128], index: 8, kind: input, shape index: {}]   ;;  %s6953_s10 = inlined_call_operand.vmem [shape: f32[1,128], index: 10, kind: input, shape index: {}]   ;;  %s6954_s11 = inlined_call_operand.vmem [shape: f32[8,128], index: 11, kind: output, shape index: {}]  }
   0x1   :  { %v3290_v0 = vld [vmem:[%s6943_s1 + $0x108] sm:$0xff]  ;;  %v3292_v1 = vld [vmem:[%s6943_s1 + $0x118] sm:$0xff]  ;;  %v3289_v2 = vld [vmem:[%s6943_s1 + $0x100] sm:$0xff]  ;;  %199 = vmatprep.mubr.f32.mxu0 %v6955_v3  ;;  %247 = vmatprep.mubr.f32.mxu1 %v6955_v3 }
   0x2   :  { %v3776_v4 = vpack.c.bf16 %v3292_v1, %v3290_v0  ;;  %v3291_v5 = vld [vmem:[%s6943_s1 + $0x110] sm:$0xff]  ;;  %v3294_v6 = vld [vmem:[%s6943_s1 + $0x128] sm:$0xff]  ;;  %v3296_v7 = vld [vmem:[%s6943_s1 + $0x138] sm:$0xff] }
   0x3   :  { %v3778_v8 = vpack.c.bf16 %v3291_v5, %v3289_v2  ;;  %v3780_v9 = vpack.c.bf16 %v3296_v7, %v3294_v6  ;;  %v3293_v10 = vld [vmem:[%s6943_s1 + $0x120] sm:$0xff]  ;;  %v3295_v11 = vld [vmem:[%s6943_s1 + $0x130] sm:$0xff]  ;;  %v3298_v12 = vld [vmem:[%s6943_s1 + $0x148] sm:$0xff] }
   0x4   :  { %3777 = vmatprep.subr.bf16.mxu0 %v3776_v4  ;;  %v3300_v13 = vld [vmem:[%s6943_s1 + $0x158] sm:$0xff]  ;;  %4232 = vmatprep.subr.bf16.mxu1 %v3776_v4  ;;  %v3782_v14 = vpack.c.bf16 %v3295_v11, %v3293_v10  ;;  %v3297_v16 = vld [vmem:[%s6943_s1 + $0x140] sm:$0xff]  ;;  %v3299_v17 = vld [vmem:[%s6943_s1 + $0x150] sm:$0xff] }
   0x5   :  { %3779 = vmatpush1.bf16.msra.mxu0 %v3778_v8  ;;  %4240 = vmatpush1.bf16.msra.mxu1 %v3778_v8  ;;  %v3784_v15 = vpack.c.bf16 %v3300_v13, %v3298_v12  ;;  %v3302_v18 = vld [vmem:[%s6943_s1 + $0x168] sm:$0xff]  ;;  %v3304_v19 = vld [vmem:[%s6943_s1 + $0x178] sm:$0xff]  ;;  %v3786_v20 = vpack.c.bf16 %v3299_v17, %v3297_v16  ;;  %v3301_v22 = vld [vmem:[%s6943_s1 + $0x160] sm:$0xff] }
   0x6   :  { %3781 = vmatprep.subr.bf16.mxu0 %v3780_v9  ;;  %4233 = vmatprep.subr.bf16.mxu1 %v3780_v9  ;;  %v3788_v21 = vpack.c.bf16 %v3304_v19, %v3302_v18  ;;  %v3303_v23 = vld [vmem:[%s6943_s1 + $0x170] sm:$0xff]  ;;  %v3306_v24 = vld [vmem:[%s6943_s1 + $0x188] sm:$0xff]  ;;  %v3308_v25 = vld [vmem:[%s6943_s1 + $0x198] sm:$0xff] }
   0x7   :  { %v3790_v26 = vpack.c.bf16 %v3303_v23, %v3301_v22  ;;  %v3792_v27 = vpack.c.bf16 %v3308_v25, %v3306_v24  ;;  %v3305_v28 = vld [vmem:[%s6943_s1 + $0x180] sm:$0xff]  ;;  %v3307_v29 = vld [vmem:[%s6943_s1 + $0x190] sm:$0xff]  ;;  %v3310_v30 = vld [vmem:[%s6943_s1 + $0x1a8] sm:$0xff] }
   0x8   :  { %v3312_v31 = vld [vmem:[%s6943_s1 + $0x1b8] sm:$0xff]  ;;  %v3794_v32 = vpack.c.bf16 %v3307_v29, %v3305_v28  ;;  %v3309_v34 = vld [vmem:[%s6943_s1 + $0x1a0] sm:$0xff]  ;;  %v3311_v35 = vld [vmem:[%s6943_s1 + $0x1b0] sm:$0xff] }
   0x9   :  { %3783 = vmatpush1.bf16.msra.mxu0 %v3782_v14  ;;  %4241 = vmatpush1.bf16.msra.mxu1 %v3782_v14  ;;  %v3796_v33 = vpack.c.bf16 %v3312_v31, %v3310_v30  ;;  %v3314_v36 = vld [vmem:[%s6943_s1 + $0x1c8] sm:$0xff]  ;;  %v3316_v37 = vld [vmem:[%s6943_s1 + $0x1d8] sm:$0xff]  ;;  %v3798_v38 = vpack.c.bf16 %v3311_v35, %v3309_v34  ;;  %v3313_v40 = vld [vmem:[%s6943_s1 + $0x1c0] sm:$0xff] }
   0xa   :  { %3785 = vmatprep.subr.bf16.mxu0 %v3784_v15  ;;  %4234 = vmatprep.subr.bf16.mxu1 %v3784_v15  ;;  %v3800_v39 = vpack.c.bf16 %v3316_v37, %v3314_v36  ;;  %v3315_v41 = vld [vmem:[%s6943_s1 + $0x1d0] sm:$0xff]  ;;  %v3318_v42 = vld [vmem:[%s6943_s1 + $0x1e8] sm:$0xff]  ;;  %v3320_v43 = vld [vmem:[%s6943_s1 + $0x1f8] sm:$0xff] }
   0xb   :  { %v3802_v44 = vpack.c.bf16 %v3315_v41, %v3313_v40  ;;  %v3804_v45 = vpack.c.bf16 %v3320_v43, %v3318_v42  ;;  %v3317_v46 = vld [vmem:[%s6943_s1 + $0x1e0] sm:$0xff]  ;;  %v3319_v47 = vld [vmem:[%s6943_s1 + $0x1f0] sm:$0xff]  ;;  %v71_v48 = vld [vmem:[%s6943_s1 + $0x8] sm:$0xff] }
   0xc   :  { %v73_v49 = vld [vmem:[%s6943_s1 + $0x18] sm:$0xff]  ;;  %v3806_v50 = vpack.c.bf16 %v3319_v47, %v3317_v46  ;;  %v70_v52 = vld [vmem:[%s6943_s1] sm:$0xff]  ;;  %v72_v53 = vld [vmem:[%s6943_s1 + $0x10] sm:$0xff] }
   0xd   :  { %3787 = vmatpush1.bf16.msra.mxu0 %v3786_v20  ;;  %4242 = vmatpush1.bf16.msra.mxu1 %v3786_v20  ;;  %v3808_v51 = vpack.c.bf16 %v73_v49, %v71_v48  ;;  %v75_v54 = vld [vmem:[%s6943_s1 + $0x28] sm:$0xff]  ;;  %v77_v55 = vld [vmem:[%s6943_s1 + $0x38] sm:$0xff]  ;;  %v4777_v56 = vld [vmem:[%s6944_s0 + $0x40] sm:$0xff]  ;;  %v3810_v57 = vpack.c.bf16 %v72_v53, %v70_v52 }
   0xe   :  { %3789 = vmatprep.subr.bf16.mxu0 %v3788_v21  ;;  %4235 = vmatprep.subr.bf16.mxu1 %v3788_v21  ;;  %v3812_v58 = vpack.c.bf16 %v77_v55, %v75_v54  ;;  %v74_v59 = vld [vmem:[%s6943_s1 + $0x20] sm:$0xff]  ;;  %v76_v60 = vld [vmem:[%s6943_s1 + $0x30] sm:$0xff]  ;;  %v79_v61 = vld [vmem:[%s6943_s1 + $0x48] sm:$0xff] }
   0xf   :  { %v81_v62 = vld [vmem:[%s6943_s1 + $0x58] sm:$0xff]  ;;  %v4794_v63 = vld [vmem:[%s6944_s0 + $0x80] sm:$0xff]  ;;  %v4802_v0 = vld [vmem:[%s6944_s0 + $0x48] sm:$0xff]  ;;  %v3814_v1 = vpack.c.bf16 %v76_v60, %v74_v59 }
  0x10   :  { %v3816_v2 = vpack.c.bf16 %v81_v62, %v79_v61  ;;  %v78_v4 = vld [vmem:[%s6943_s1 + $0x40] sm:$0xff]  ;;  %v80_v5 = vld [vmem:[%s6943_s1 + $0x50] sm:$0xff]  ;;  %v83_v6 = vld [vmem:[%s6943_s1 + $0x68] sm:$0xff] }
  0x11   :  { %3791 = vmatpush1.bf16.msra.mxu0 %v3790_v26  ;;  %4243 = vmatpush1.bf16.msra.mxu1 %v3790_v26  ;;  %v85_v7 = vld [vmem:[%s6943_s1 + $0x78] sm:$0xff]  ;;  %v4820_v8 = vld [vmem:[%s6944_s0 + $0x88] sm:$0xff]  ;;  %v4828_v9 = vld [vmem:[%s6944_s0 + $0x50] sm:$0xff]  ;;  %v3818_v10 = vpack.c.bf16 %v80_v5, %v78_v4 }
  0x12   :  { %3793 = vmatprep.subr.bf16.mxu0 %v3792_v27  ;;  %4236 = vmatprep.subr.bf16.mxu1 %v3792_v27  ;;  %v3820_v11 = vpack.c.bf16 %v85_v7, %v83_v6  ;;  %v82_v12 = vld [vmem:[%s6943_s1 + $0x60] sm:$0xff]  ;;  %v84_v13 = vld [vmem:[%s6943_s1 + $0x70] sm:$0xff]  ;;  %v87_v14 = vld [vmem:[%s6943_s1 + $0x88] sm:$0xff] }
  0x13   :  { %v89_v15 = vld [vmem:[%s6943_s1 + $0x98] sm:$0xff]  ;;  %v4846_v16 = vld [vmem:[%s6944_s0 + $0x90] sm:$0xff]  ;;  %v3822_v18 = vpack.c.bf16 %v84_v13, %v82_v12  ;;  %v86_v20 = vld [vmem:[%s6943_s1 + $0x80] sm:$0xff] }
  0x14   :  { %v4854_v17 = vld [vmem:[%s6944_s0 + $0x58] sm:$0xff]  ;;  %v3824_v19 = vpack.c.bf16 %v89_v15, %v87_v14  ;;  %v88_v21 = vld [vmem:[%s6943_s1 + $0x90] sm:$0xff]  ;;  %v91_v22 = vld [vmem:[%s6943_s1 + $0xa8] sm:$0xff] }
  0x15   :  { %3795 = vmatpush1.bf16.msra.mxu0 %v3794_v32  ;;  %4244 = vmatpush1.bf16.msra.mxu1 %v3794_v32  ;;  %v93_v23 = vld [vmem:[%s6943_s1 + $0xb8] sm:$0xff]  ;;  %v4880_v25 = vld [vmem:[%s6944_s0 + $0x60] sm:$0xff]  ;;  %v3826_v26 = vpack.c.bf16 %v88_v21, %v86_v20  ;;  %v92_v29 = vld [vmem:[%s6943_s1 + $0xb0] sm:$0xff] }
  0x16   :  { %3797 = vmatprep.subr.bf16.mxu0 %v3796_v33  ;;  %4237 = vmatprep.subr.bf16.mxu1 %v3796_v33  ;;  %v4872_v24 = vld [vmem:[%s6944_s0 + $0x98] sm:$0xff]  ;;  %v3828_v27 = vpack.c.bf16 %v93_v23, %v91_v22  ;;  %v90_v28 = vld [vmem:[%s6943_s1 + $0xa0] sm:$0xff]  ;;  %v95_v30 = vld [vmem:[%s6943_s1 + $0xc8] sm:$0xff] }
  0x17   :  { %v97_v31 = vld [vmem:[%s6943_s1 + $0xd8] sm:$0xff]  ;;  %v4898_v32 = vld [vmem:[%s6944_s0 + $0xa0] sm:$0xff]  ;;  %v4906_v33 = vld [vmem:[%s6944_s0 + $0x68] sm:$0xff]  ;;  %v3830_v34 = vpack.c.bf16 %v92_v29, %v90_v28 }
  0x18   :  { %v3832_v35 = vpack.c.bf16 %v97_v31, %v95_v30  ;;  %v94_v36 = vld [vmem:[%s6943_s1 + $0xc0] sm:$0xff]  ;;  %v96_v37 = vld [vmem:[%s6943_s1 + $0xd0] sm:$0xff]  ;;  %v4924_v40 = vld [vmem:[%s6944_s0 + $0xa8] sm:$0xff] }
  0x19   :  { %3799 = vmatpush1.bf16.msra.mxu0 %v3798_v38  ;;  %4245 = vmatpush1.bf16.msra.mxu1 %v3798_v38  ;;  %v99_v38 = vld [vmem:[%s6943_s1 + $0xe8] sm:$0xff]  ;;  %v4932_v41 = vld [vmem:[%s6944_s0 + $0x70] sm:$0xff]  ;;  %v3834_v42 = vpack.c.bf16 %v96_v37, %v94_v36  ;;  %v3324_v47 = vld [vmem:[%s6943_s1 + $0x218] sm:$0xff] }
  0x1a   :  { %3801 = vmatprep.subr.bf16.mxu0 %v3800_v39  ;;  %4238 = vmatprep.subr.bf16.mxu1 %v3800_v39  ;;  %v101_v39 = vld [vmem:[%s6943_s1 + $0xf8] sm:$0xff]  ;;  %v3322_v46 = vld [vmem:[%s6943_s1 + $0x208] sm:$0xff]  ;;  %v4950_v48 = vld [vmem:[%s6944_s0 + $0xb0] sm:$0xff] }
  0x1b   :  { %v3836_v43 = vpack.c.bf16 %v101_v39, %v99_v38  ;;  %v4958_v49 = vld [vmem:[%s6944_s0 + $0x78] sm:$0xff]  ;;  %v3321_v52 = vld [vmem:[%s6943_s1 + $0x200] sm:$0xff]  ;;  %v3323_v53 = vld [vmem:[%s6943_s1 + $0x210] sm:$0xff] }
  0x1c   :  { %v3326_v54 = vld [vmem:[%s6943_s1 + $0x228] sm:$0xff]  ;;  %v3328_v55 = vld [vmem:[%s6943_s1 + $0x238] sm:$0xff]  ;;  %v3842_v59 = vpack.c.bf16 %v3323_v53, %v3321_v52  ;;  %v3325_v61 = vld [vmem:[%s6943_s1 + $0x220] sm:$0xff] }
  0x1d   :  { %3803 = vmatpush1.bf16.msra.mxu0 %v3802_v44  ;;  %4246 = vmatpush1.bf16.msra.mxu1 %v3802_v44  ;;  %v98_v44 = vld [vmem:[%s6943_s1 + $0xe0] sm:$0xff]  ;;  %v3844_v60 = vpack.c.bf16 %v3328_v55, %v3326_v54  ;;  %v3327_v62 = vld [vmem:[%s6943_s1 + $0x230] sm:$0xff]  ;;  %v5010_v5 = vld [vmem:[%s6944_s0 + $0x8] sm:$0xff] }
  0x1e   :  { %3805 = vmatprep.subr.bf16.mxu0 %v3804_v45  ;;  %4239 = vmatprep.subr.bf16.mxu1 %v3804_v45  ;;  %v100_v45 = vld [vmem:[%s6943_s1 + $0xf0] sm:$0xff]  ;;  %v5002_v4 = vld [vmem:[%s6944_s0 + $0xc0] sm:$0xff]  ;;  %v3846_v6 = vpack.c.bf16 %v3327_v62, %v3325_v61  ;;  %v3334_v12 = vld [vmem:[%s6943_s1 + $0x268] sm:$0xff] }
  0x1f   :  { %v3336_v13 = vld [vmem:[%s6943_s1 + $0x278] sm:$0xff]  ;;  %v5028_v14 = vld [vmem:[%s6944_s0 + $0xc8] sm:$0xff]  ;;  %v5036_v15 = vld [vmem:[%s6944_s0 + $0x10] sm:$0xff] }
  0x20   :  { %v3333_v20 = vld [vmem:[%s6943_s1 + $0x260] sm:$0xff]  ;;  %v3335_v21 = vld [vmem:[%s6943_s1 + $0x270] sm:$0xff]  ;;  %v3338_v22 = vld [vmem:[%s6943_s1 + $0x288] sm:$0xff] }
  0x21   :  { %3807 = vmatpush1.bf16.msra.mxu0 %v3806_v50  ;;  %4247 = vmatpush1.bf16.msra.mxu1 %v3806_v50  ;;  %v3838_v50 = vpack.c.bf16 %v100_v45, %v98_v44  ;;  %v3340_v23 = vld [vmem:[%s6943_s1 + $0x298] sm:$0xff]  ;;  %v3854_v28 = vpack.c.bf16 %v3335_v21, %v3333_v20  ;;  %v3337_v30 = vld [vmem:[%s6943_s1 + $0x280] sm:$0xff]  ;;  %v3339_v31 = vld [vmem:[%s6943_s1 + $0x290] sm:$0xff] }
  0x22   :  { %3809 = vmatprep.subr.bf16.mxu0 %v3808_v51  ;;  %v3840_v51 = vpack.c.bf16 %v3324_v47, %v3322_v46  ;;  %v3856_v29 = vpack.c.bf16 %v3340_v23, %v3338_v22  ;;  %v5080_v36 = vld [vmem:[%s6944_s0 + $0xd8] sm:$0xff]  ;;  %v5088_v37 = vld [vmem:[%s6944_s0 + $0x20] sm:$0xff]  ;;  %v3858_v38 = vpack.c.bf16 %v3339_v31, %v3337_v30  ;;  %v3346_v44 = vld [vmem:[%s6943_s1 + $0x2c8] sm:$0xff] }
  0x23   :  { %v3348_v45 = vld [vmem:[%s6943_s1 + $0x2d8] sm:$0xff]  ;;  %v5106_v46 = vld [vmem:[%s6944_s0 + $0xe0] sm:$0xff]  ;;  %v5114_v47 = vld [vmem:[%s6944_s0 + $0x28] sm:$0xff] }
  0x24   :  { %200 = vmatmul.mubr.f32.vlgmr.msra.gmra.mrb[0].mxu0 %v4777_v56  ;;  %248 = vmatmul.mubr.f32.vlgmr.msra.gmra.mrb[0].mxu1 %v4794_v63  ;;  %v3345_v52 = vld [vmem:[%s6943_s1 + $0x2c0] sm:$0xff]  ;;  %v3347_v53 = vld [vmem:[%s6943_s1 + $0x2d0] sm:$0xff]  ;;  %v3350_v54 = vld [vmem:[%s6943_s1 + $0x2e8] sm:$0xff] }
  0x25   :  { %3811 = vmatpush1.bf16.msra.mxu0 %v3810_v57  ;;  %205 = vmatprep.mubr.f32.mxu0 %v6955_v3  ;;  %v4976_v57 = vld [vmem:[%s6944_s0 + $0xb8] sm:$0xff]  ;;  %v3866_v61 = vpack.c.bf16 %v3347_v53, %v3345_v52  ;;  %v3355_v20 = vld [vmem:[%s6943_s1 + $0x310] sm:$0xff]  ;;  %v3358_v21 = vld [vmem:[%s6943_s1 + $0x328] sm:$0xff] }
  0x26   :  { %3813 = vmatprep.subr.bf16.mxu0 %v3812_v58  ;;  %253 = vmatprep.mubr.f32.mxu1 %v6955_v3  ;;  %v4984_v58 = vld [vmem:[%s6944_s0] sm:$0xff]  ;;  %v3352_v55 = vld [vmem:[%s6943_s1 + $0x2f8] sm:$0xff]  ;;  %v3359_v30 = vld [vmem:[%s6943_s1 + $0x330] sm:$0xff] }
  0x27   :  { %v3868_v62 = vpack.c.bf16 %v3352_v55, %v3350_v54  ;;  %v3360_v22 = vld [vmem:[%s6943_s1 + $0x338] sm:$0xff]  ;;  %v3362_v31 = vld [vmem:[%s6943_s1 + $0x348] sm:$0xff]  ;;  %v3367_v52 = vld [vmem:[%s6943_s1 + $0x370] sm:$0xff] }
  0x28   :  { %206 = vmatmul.mubr.f32.gmra.mrb[2].mxu0 %v4802_v0  ;;  %254 = vmatmul.mubr.f32.gmra.mrb[2].mxu1 %v4820_v8  ;;  %v3370_v53 = vld [vmem:[%s6943_s1 + $0x388] sm:$0xff]  ;;  %v3372_v54 = vld [vmem:[%s6943_s1 + $0x398] sm:$0xff] }
  0x29   :  { %3815 = vmatpush1.bf16.msra.mxu0 %v3814_v1  ;;  %211 = vmatprep.mubr.f32.mxu0 %v6955_v3  ;;  %v3330_v1 = vld [vmem:[%s6943_s1 + $0x248] sm:$0xff] }
  0x2a   :  { %3817 = vmatprep.subr.bf16.mxu0 %v3816_v2  ;;  %259 = vmatprep.mubr.f32.mxu1 %v6955_v3  ;;  %v3332_v2 = vld [vmem:[%s6943_s1 + $0x258] sm:$0xff] }
  0x2b   :  { %v3848_v7 = vpack.c.bf16 %v3332_v2, %v3330_v1  ;;  %v3349_v1 = vld [vmem:[%s6943_s1 + $0x2e0] sm:$0xff]  ;;  %v3351_v2 = vld [vmem:[%s6943_s1 + $0x2f0] sm:$0xff] }
  0x2c   :  { %212 = vmatmul.mubr.f32.gmra.mrb[4].mxu0 %v4828_v9  ;;  %260 = vmatmul.mubr.f32.gmra.mrb[4].mxu1 %v4846_v16 }
  0x2d   :  { %3819 = vmatpush1.bf16.msra.mxu0 %v3818_v10  ;;  %217 = vmatprep.mubr.f32.mxu0 %v6955_v3  ;;  %v3329_v10 = vld [vmem:[%s6943_s1 + $0x240] sm:$0xff] }
  0x2e   :  { %3821 = vmatprep.subr.bf16.mxu0 %v3820_v11  ;;  %265 = vmatprep.mubr.f32.mxu1 %v6955_v3  ;;  %v3331_v11 = vld [vmem:[%s6943_s1 + $0x250] sm:$0xff] }
  0x30   :  { %218 = vmatmul.mubr.f32.gmra.mrb[6].mxu0 %v4854_v17  ;;  %266 = vmatmul.mubr.f32.gmra.mrb[6].mxu1 %v4872_v24 }
  0x31   :  { %3823 = vmatpush1.bf16.msra.mxu0 %v3822_v18  ;;  %223 = vmatprep.mubr.f32.mxu0 %v6955_v3  ;;  %v3850_v18 = vpack.c.bf16 %v3331_v11, %v3329_v10  ;;  %v3356_v10 = vld [vmem:[%s6943_s1 + $0x318] sm:$0xff] }
  0x32   :  { %3825 = vmatprep.subr.bf16.mxu0 %v3824_v19  ;;  %271 = vmatprep.mubr.f32.mxu1 %v6955_v3  ;;  %v3852_v19 = vpack.c.bf16 %v3336_v13, %v3334_v12  ;;  %v5166_v11 = vld [vmem:[%s6944_s0 + $0x38] sm:$0xff]  ;;  %v3870_v12 = vpack.c.bf16 %v3351_v2, %v3349_v1  ;;  %v3371_v1 = vld [vmem:[%s6943_s1 + $0x390] sm:$0xff]  ;;  %v3374_v2 = vld [vmem:[%s6943_s1 + $0x3a8] sm:$0xff] }
  0x34   :  { %224 = vmatmul.mubr.f32.gmra.mrb[8].mxu0 %v4880_v25  ;;  %272 = vmatmul.mubr.f32.gmra.mrb[8].mxu1 %v4898_v32 }
  0x35   :  { %3827 = vmatpush1.bf16.msra.mxu0 %v3826_v26  ;;  %229 = vmatprep.mubr.f32.mxu0 %v6955_v3  ;;  %v5054_v26 = vld [vmem:[%s6944_s0 + $0xd0] sm:$0xff] }
  0x36   :  { %3829 = vmatprep.subr.bf16.mxu0 %v3828_v27  ;;  %277 = vmatprep.mubr.f32.mxu1 %v6955_v3  ;;  %v5062_v27 = vld [vmem:[%s6944_s0 + $0x18] sm:$0xff] }
  0x38   :  { %230 = vmatmul.mubr.f32.gmra.mrb[10].mxu0 %v4906_v33  ;;  %278 = vmatmul.mubr.f32.gmra.mrb[10].mxu1 %v4924_v40 }
  0x39   :  { %3831 = vmatpush1.bf16.msra.mxu0 %v3830_v34  ;;  %235 = vmatprep.mubr.f32.mxu0 %v6955_v3  ;;  %v3342_v34 = vld [vmem:[%s6943_s1 + $0x2a8] sm:$0xff] }
  0x3a   :  { %3833 = vmatprep.subr.bf16.mxu0 %v3832_v35  ;;  %283 = vmatprep.mubr.f32.mxu1 %v6955_v3  ;;  %v3344_v35 = vld [vmem:[%s6943_s1 + $0x2b8] sm:$0xff] }
  0x3b   :  { %v3860_v39 = vpack.c.bf16 %v3344_v35, %v3342_v34  ;;  %v3364_v34 = vld [vmem:[%s6943_s1 + $0x358] sm:$0xff] }
  0x3c   :  { %236 = vmatmul.mubr.f32.gmra.mrb[12].mxu0 %v4932_v41  ;;  %284 = vmatmul.mubr.f32.gmra.mrb[12].mxu1 %v4950_v48 }
  0x3d   :  { %3835 = vmatpush1.bf16.msra.mxu0 %v3834_v42  ;;  %241 = vmatprep.mubr.f32.mxu0 %v6955_v3  ;;  %v3341_v42 = vld [vmem:[%s6943_s1 + $0x2a0] sm:$0xff] }
  0x3e   :  { %3837 = vmatprep.subr.bf16.mxu0 %v3836_v43  ;;  %289 = vmatprep.mubr.f32.mxu1 %v6955_v3  ;;  %v3343_v43 = vld [vmem:[%s6943_s1 + $0x2b0] sm:$0xff] }
  0x40   :  { %242 = vmatmul.mubr.f32.gmra.mrb[14].mxu0 %v4958_v49  ;;  %290 = vmatmul.mubr.f32.gmra.mrb[14].mxu1 %v4976_v57 }
  0x41   :  { %3839 = vmatpush1.bf16.msra.mxu0 %v3838_v50  ;;  %456 = vmatprep.mubr.f32.mxu0 %v6955_v3  ;;  %v3862_v50 = vpack.c.bf16 %v3343_v43, %v3341_v42  ;;  %v3363_v42 = vld [vmem:[%s6943_s1 + $0x350] sm:$0xff]  ;;  %v3366_v43 = vld [vmem:[%s6943_s1 + $0x368] sm:$0xff] }
  0x42   :  { %3841 = vmatprep.subr.bf16.mxu0 %v3840_v51  ;;  %295 = vmatprep.mubr.f32.mxu1 %v6955_v3  ;;  %v3864_v51 = vpack.c.bf16 %v3348_v45, %v3346_v44  ;;  %v3368_v44 = vld [vmem:[%s6943_s1 + $0x378] sm:$0xff] }
  0x44   :  { %457 = vmatmul.mubr.f32.vlgmr.msra.gmra.mrb[0].mxu0 %v4984_v58  ;;  %296 = vmatmul.mubr.f32.gmra.mrb[16].mxu1 %v5002_v4 }
  0x45   :  { %3843 = vmatpush1.bf16.msra.mxu0 %v3842_v59  ;;  %462 = vmatprep.mubr.f32.mxu0 %v6955_v3  ;;  %v5132_v59 = vld [vmem:[%s6944_s0 + $0xe8] sm:$0xff] }
  0x46   :  { %3845 = vmatprep.subr.bf16.mxu0 %v3844_v60  ;;  %301 = vmatprep.mubr.f32.mxu1 %v6955_v3  ;;  %v5140_v60 = vld [vmem:[%s6944_s0 + $0x30] sm:$0xff] }
  0x48   :  { %463 = vmatmul.mubr.f32.gmra.mrb[2].mxu0 %v5010_v5  ;;  %302 = vmatmul.mubr.f32.gmra.mrb[18].mxu1 %v5028_v14 }
  0x49   :  { %468 = vmatprep.mubr.f32.mxu0 %v6955_v3  ;;  %3847 = vmatpush1.bf16.msra.mxu0 %v3846_v6  ;;  %v5152_v6 = vld [vmem:[%s6944_s0 + $0xf0] sm:$0xff] }
  0x4a   :  { %3849 = vmatprep.subr.bf16.mxu0 %v3848_v7  ;;  %307 = vmatprep.mubr.f32.mxu1 %v6955_v3  ;;  %v3354_v7 = vld [vmem:[%s6943_s1 + $0x308] sm:$0xff] }
  0x4b   :  { %v3872_v13 = vpack.c.bf16 %v3356_v10, %v3354_v7  ;;  %v3376_v7 = vld [vmem:[%s6943_s1 + $0x3b8] sm:$0xff] }
  0x4c   :  { %469 = vmatmul.mubr.f32.gmra.mrb[4].mxu0 %v5036_v15  ;;  %308 = vmatmul.mubr.f32.gmra.mrb[20].mxu1 %v5054_v26 }
  0x4d   :  { %474 = vmatprep.mubr.f32.mxu0 %v6955_v3  ;;  %3851 = vmatpush1.bf16.msra.mxu0 %v3850_v18  ;;  %v5172_v18 = vld [vmem:[%s6944_s0 + $0xf8] sm:$0xff] }
  0x4e   :  { %3853 = vmatprep.subr.bf16.mxu0 %v3852_v19  ;;  %313 = vmatprep.mubr.f32.mxu1 %v6955_v3  ;;  %v3353_v19 = vld [vmem:[%s6943_s1 + $0x300] sm:$0xff] }
  0x4f   :  { %v3874_v23 = vpack.c.bf16 %v3355_v20, %v3353_v19  ;;  %v3375_v19 = vld [vmem:[%s6943_s1 + $0x3b0] sm:$0xff]  ;;  %v3378_v20 = vld [vmem:[%s6943_s1 + $0x3c8] sm:$0xff] }
  0x50   :  { %475 = vmatmul.mubr.f32.gmra.mrb[6].mxu0 %v5062_v27  ;;  %314 = vmatmul.mubr.f32.gmra.mrb[22].mxu1 %v5080_v36 }
  0x51   :  { %480 = vmatprep.mubr.f32.mxu0 %v6955_v3  ;;  %3855 = vmatpush1.bf16.msra.mxu0 %v3854_v28  ;;  %v3876_v28 = vpack.c.bf16 %v3360_v22, %v3358_v21  ;;  %v3380_v21 = vld [vmem:[%s6943_s1 + $0x3d8] sm:$0xff] }
  0x52   :  { %3857 = vmatprep.subr.bf16.mxu0 %v3856_v29  ;;  %319 = vmatprep.mubr.f32.mxu1 %v6955_v3  ;;  %v3357_v29 = vld [vmem:[%s6943_s1 + $0x320] sm:$0xff] }
  0x53   :  { %v3878_v35 = vpack.c.bf16 %v3359_v30, %v3357_v29  ;;  %v3379_v29 = vld [vmem:[%s6943_s1 + $0x3d0] sm:$0xff]  ;;  %v3382_v30 = vld [vmem:[%s6943_s1 + $0x3e8] sm:$0xff] }
  0x54   :  { %481 = vmatmul.mubr.f32.gmra.mrb[8].mxu0 %v5088_v37  ;;  %320 = vmatmul.mubr.f32.gmra.mrb[24].mxu1 %v5106_v46 }
  0x55   :  { %486 = vmatprep.mubr.f32.mxu0 %v6955_v3  ;;  %3859 = vmatpush1.bf16.msra.mxu0 %v3858_v38  ;;  %v3880_v38 = vpack.c.bf16 %v3364_v34, %v3362_v31  ;;  %v3384_v31 = vld [vmem:[%s6943_s1 + $0x3f8] sm:$0xff] }
  0x56   :  { %3861 = vmatprep.subr.bf16.mxu0 %v3860_v39  ;;  %325 = vmatprep.mubr.f32.mxu1 %v6955_v3  ;;  %v3361_v39 = vld [vmem:[%s6943_s1 + $0x340] sm:$0xff] }
  0x57   :  { %v3882_v45 = vpack.c.bf16 %v3363_v42, %v3361_v39  ;;  %v3383_v39 = vld [vmem:[%s6943_s1 + $0x3f0] sm:$0xff]  ;;  %v3386_v42 = vld [vmem:[%s6943_s1 + $0x408] sm:$0xff] }
  0x58   :  { %487 = vmatmul.mubr.f32.gmra.mrb[10].mxu0 %v5114_v47  ;;  %326 = vmatmul.mubr.f32.gmra.mrb[26].mxu1 %v5132_v59 }
  0x59   :  { %492 = vmatprep.mubr.f32.mxu0 %v6955_v3  ;;  %3863 = vmatpush1.bf16.msra.mxu0 %v3862_v50  ;;  %v3884_v50 = vpack.c.bf16 %v3368_v44, %v3366_v43  ;;  %v3388_v43 = vld [vmem:[%s6943_s1 + $0x418] sm:$0xff] }
  0x5a   :  { %3865 = vmatprep.subr.bf16.mxu0 %v3864_v51  ;;  %331 = vmatprep.mubr.f32.mxu1 %v6955_v3  ;;  %v3365_v51 = vld [vmem:[%s6943_s1 + $0x360] sm:$0xff] }
  0x5b   :  { %v3886_v55 = vpack.c.bf16 %v3367_v52, %v3365_v51  ;;  %v3387_v51 = vld [vmem:[%s6943_s1 + $0x410] sm:$0xff]  ;;  %v3390_v52 = vld [vmem:[%s6943_s1 + $0x428] sm:$0xff] }
  0x5c   :  { %493 = vmatmul.mubr.f32.gmra.mrb[12].mxu0 %v5140_v60  ;;  %332 = vmatmul.mubr.f32.gmra.mrb[28].mxu1 %v5152_v6 }
  0x5d   :  { %498 = vmatprep.mubr.f32.mxu0 %v6955_v3  ;;  %3867 = vmatpush1.bf16.msra.mxu0 %v3866_v61  ;;  %v3888_v61 = vpack.c.bf16 %v3372_v54, %v3370_v53  ;;  %v3392_v53 = vld [vmem:[%s6943_s1 + $0x438] sm:$0xff] }
  0x5e   :  { %3869 = vmatprep.subr.bf16.mxu0 %v3868_v62  ;;  %337 = vmatprep.mubr.f32.mxu1 %v6955_v3  ;;  %v3369_v62 = vld [vmem:[%s6943_s1 + $0x380] sm:$0xff] }
  0x5f   :  { %v3890_v10 = vpack.c.bf16 %v3371_v1, %v3369_v62  ;;  %v3391_v62 = vld [vmem:[%s6943_s1 + $0x430] sm:$0xff]  ;;  %v3394_v1 = vld [vmem:[%s6943_s1 + $0x448] sm:$0xff] }
  0x60   :  { %499 = vmatmul.mubr.f32.gmra.mrb[14].mxu0 %v5166_v11  ;;  %338 = vmatmul.mubr.f32.gmra.mrb[30].mxu1 %v5172_v18 }
  0x61   :  { %504 = vmatprep.mubr.f32.mxu0 %v6955_v3  ;;  %3871 = vmatpush1.bf16.msra.mxu0 %v3870_v12  ;;  %v3892_v12 = vpack.c.bf16 %v3376_v7, %v3374_v2  ;;  %v3396_v2 = vld [vmem:[%s6943_s1 + $0x458] sm:$0xff] }
  0x62   :  { %3873 = vmatprep.subr.bf16.mxu0 %v3872_v13  ;;  %343 = vmatprep.mubr.f32.mxu1 %v6955_v3  ;;  %v3373_v13 = vld [vmem:[%s6943_s1 + $0x3a0] sm:$0xff] }
  0x63   :  { %v3894_v22 = vpack.c.bf16 %v3375_v19, %v3373_v13  ;;  %v3395_v13 = vld [vmem:[%s6943_s1 + $0x450] sm:$0xff]  ;;  %v3398_v19 = vld [vmem:[%s6943_s1 + $0x468] sm:$0xff] }
  0x64   :  { %505 = vmatmul.mubr.f32.gmra.mrb[16].mxu0 %v4777_v56  ;;  %344 = vmatmul.mubr.f32.gmra.mrb[32].mxu1 %v5010_v5 }
  0x65   :  { %510 = vmatprep.mubr.f32.mxu0 %v6955_v3  ;;  %349 = vmatprep.mubr.f32.mxu1 %v6955_v3 }
  0x68   :  { %511 = vmatmul.mubr.f32.gmra.mrb[18].mxu0 %v4802_v0  ;;  %350 = vmatmul.mubr.f32.gmra.mrb[34].mxu1 %v5036_v15 }
  0x69   :  { %516 = vmatprep.mubr.f32.mxu0 %v6955_v3  ;;  %355 = vmatprep.mubr.f32.mxu1 %v6955_v3 }
  0x6c   :  { %517 = vmatmul.mubr.f32.gmra.mrb[20].mxu0 %v4828_v9  ;;  %356 = vmatmul.mubr.f32.gmra.mrb[36].mxu1 %v5062_v27 }
  0x6d   :  { %522 = vmatprep.mubr.f32.mxu0 %v6955_v3  ;;  %361 = vmatprep.mubr.f32.mxu1 %v6955_v3 }
  0x70   :  { %523 = vmatmul.mubr.f32.gmra.mrb[22].mxu0 %v4854_v17  ;;  %362 = vmatmul.mubr.f32.gmra.mrb[38].mxu1 %v5088_v37 }
  0x71   :  { %528 = vmatprep.mubr.f32.mxu0 %v6955_v3  ;;  %367 = vmatprep.mubr.f32.mxu1 %v6955_v3 }
  0x74   :  { %529 = vmatmul.mubr.f32.gmra.mrb[24].mxu0 %v4880_v25  ;;  %368 = vmatmul.mubr.f32.gmra.mrb[40].mxu1 %v5114_v47 }
  0x75   :  { %534 = vmatprep.mubr.f32.mxu0 %v6955_v3  ;;  %373 = vmatprep.mubr.f32.mxu1 %v6955_v3 }
  0x78   :  { %535 = vmatmul.mubr.f32.gmra.mrb[26].mxu0 %v4906_v33  ;;  %374 = vmatmul.mubr.f32.gmra.mrb[42].mxu1 %v5140_v60 }
  0x79   :  { %540 = vmatprep.mubr.f32.mxu0 %v6955_v3  ;;  %379 = vmatprep.mubr.f32.mxu1 %v6955_v3 }
  0x7c   :  { %541 = vmatmul.mubr.f32.gmra.mrb[28].mxu0 %v4932_v41  ;;  %380 = vmatmul.mubr.f32.gmra.mrb[44].mxu1 %v5166_v11 }
  0x7d   :  { %546 = vmatprep.mubr.f32.mxu0 %v6955_v3  ;;  %385 = vmatprep.mubr.f32.mxu1 %v6955_v3 }
  0x80   :  { %547 = vmatmul.mubr.f32.gmra.mrb[30].mxu0 %v4958_v49  ;;  %386 = vmatmul.mubr.f32.gmra.mrb[46].mxu1 %v4777_v56 }
  0x81   :  { %552 = vmatprep.mubr.f32.mxu0 %v6955_v3  ;;  %1927 = vmatprep.mubr.f32.mxu1 %v6955_v3 }
  0x84   :  { %553 = vmatmul.mubr.f32.gmra.mrb[32].mxu0 %v4794_v63 }
  0x85   :  { %558 = vmatprep.mubr.f32.mxu0 %v6955_v3 }
  0x88   :  { %559 = vmatmul.mubr.f32.gmra.mrb[34].mxu0 %v4820_v8 }
  0x89   :  { %564 = vmatprep.mubr.f32.mxu0 %v6955_v3 }
  0x8c   :  { %565 = vmatmul.mubr.f32.gmra.mrb[36].mxu0 %v4846_v16 }
  0x8d   :  { %570 = vmatprep.mubr.f32.mxu0 %v6955_v3 }
  0x90   :  { %571 = vmatmul.mubr.f32.gmra.mrb[38].mxu0 %v4872_v24 }
  0x91   :  { %576 = vmatprep.mubr.f32.mxu0 %v6955_v3 }
  0x94   :  { %577 = vmatmul.mubr.f32.gmra.mrb[40].mxu0 %v4898_v32 }
  0x95   :  { %582 = vmatprep.mubr.f32.mxu0 %v6955_v3 }
  0x98   :  { %583 = vmatmul.mubr.f32.gmra.mrb[42].mxu0 %v4924_v40 }
  0x99   :  { %588 = vmatprep.mubr.f32.mxu0 %v6955_v3 }
  0x9c   :  { %589 = vmatmul.mubr.f32.gmra.mrb[44].mxu0 %v4950_v48 }
  0x9d   :  { %594 = vmatprep.mubr.f32.mxu0 %v6955_v3 }
  0xa0   :  { %595 = vmatmul.mubr.f32.gmra.mrb[46].mxu0 %v4976_v57 }
  0xa1   :  { %600 = vmatprep.mubr.f32.mxu0 %v6955_v3 }
  0xa4   :  { %601 = vmatmul.mubr.f32.gmra.mrb[48].mxu0 %v5002_v4 }
  0xa5   :  { %606 = vmatprep.mubr.f32.mxu0 %v6955_v3 }
  0xa8   :  { %607 = vmatmul.mubr.f32.gmra.mrb[50].mxu0 %v5028_v14 }
  0xa9   :  { %612 = vmatprep.mubr.f32.mxu0 %v6955_v3 }
  0xac   :  { %613 = vmatmul.mubr.f32.gmra.mrb[52].mxu0 %v5054_v26 }
  0xad   :  { %618 = vmatprep.mubr.f32.mxu0 %v6955_v3 }
  0xb0   :  { %619 = vmatmul.mubr.f32.gmra.mrb[54].mxu0 %v5080_v36 }
  0xb1   :  { %624 = vmatprep.mubr.f32.mxu0 %v6955_v3 }
  0xb4   :  { %625 = vmatmul.mubr.f32.gmra.mrb[56].mxu0 %v5106_v46 }
  0xb5   :  { %630 = vmatprep.mubr.f32.mxu0 %v6955_v3 }
  0xb8   :  { %631 = vmatmul.mubr.f32.gmra.mrb[58].mxu0 %v5132_v59 }
  0xb9   :  { %636 = vmatprep.mubr.f32.mxu0 %v6955_v3 }
  0xbc   :  { %637 = vmatmul.mubr.f32.gmra.mrb[60].mxu0 %v5152_v6 }
  0xbd   :  { %642 = vmatprep.mubr.f32.mxu0 %v6955_v3 }
  0xc0   :  { %643 = vmatmul.mubr.f32.gmra.mrb[62].mxu0 %v5172_v18 }
  0xc1   :  { %746 = vmatprep.mubr.f32.mxu0 %v6955_v3 }
  0xc4   :  { %747 = vmatmul.mubr.f32.vlgmr.msra.gmra.mrb[0].mxu0 %v4794_v63 }
  0xc5   :  { %3875 = vmatpush1.bf16.msra.mxu0 %v3874_v23  ;;  %752 = vmatprep.mubr.f32.mxu0 %v6955_v3  ;;  %v3896_v23 = vpack.c.bf16 %v3380_v21, %v3378_v20  ;;  %v3400_v20 = vld [vmem:[%s6943_s1 + $0x478] sm:$0xff] }
  0xc6   :  { %3877 = vmatprep.subr.bf16.mxu0 %v3876_v28  ;;  %v3377_v28 = vld [vmem:[%s6943_s1 + $0x3c0] sm:$0xff] }
  0xc7   :  { %v3898_v34 = vpack.c.bf16 %v3379_v29, %v3377_v28  ;;  %v3399_v28 = vld [vmem:[%s6943_s1 + $0x470] sm:$0xff]  ;;  %v3402_v29 = vld [vmem:[%s6943_s1 + $0x488] sm:$0xff] }
  0xc8   :  { %753 = vmatmul.mubr.f32.gmra.mrb[2].mxu0 %v4820_v8 }
  0xc9   :  { %758 = vmatprep.mubr.f32.mxu0 %v6955_v3  ;;  %3879 = vmatpush1.bf16.msra.mxu0 %v3878_v35  ;;  %v3900_v35 = vpack.c.bf16 %v3384_v31, %v3382_v30  ;;  %v3404_v30 = vld [vmem:[%s6943_s1 + $0x498] sm:$0xff] }
  0xca   :  { %3881 = vmatprep.subr.bf16.mxu0 %v3880_v38  ;;  %v3381_v38 = vld [vmem:[%s6943_s1 + $0x3e0] sm:$0xff] }
  0xcb   :  { %v3902_v44 = vpack.c.bf16 %v3383_v39, %v3381_v38  ;;  %v3403_v38 = vld [vmem:[%s6943_s1 + $0x490] sm:$0xff]  ;;  %v3406_v39 = vld [vmem:[%s6943_s1 + $0x4a8] sm:$0xff] }
  0xcc   :  { %759 = vmatmul.mubr.f32.gmra.mrb[4].mxu0 %v4846_v16 }
  0xcd   :  { %764 = vmatprep.mubr.f32.mxu0 %v6955_v3  ;;  %3883 = vmatpush1.bf16.msra.mxu0 %v3882_v45  ;;  %v3904_v45 = vpack.c.bf16 %v3388_v43, %v3386_v42  ;;  %v3408_v42 = vld [vmem:[%s6943_s1 + $0x4b8] sm:$0xff] }
  0xce   :  { %3885 = vmatprep.subr.bf16.mxu0 %v3884_v50  ;;  %v3385_v50 = vld [vmem:[%s6943_s1 + $0x400] sm:$0xff] }
  0xcf   :  { %v3906_v54 = vpack.c.bf16 %v3387_v51, %v3385_v50  ;;  %v3407_v50 = vld [vmem:[%s6943_s1 + $0x4b0] sm:$0xff]  ;;  %v3410_v51 = vld [vmem:[%s6943_s1 + $0x4c8] sm:$0xff] }
  0xd0   :  { %765 = vmatmul.mubr.f32.gmra.mrb[6].mxu0 %v4872_v24 }
  0xd1   :  { %770 = vmatprep.mubr.f32.mxu0 %v6955_v3  ;;  %3887 = vmatpush1.bf16.msra.mxu0 %v3886_v55  ;;  %v3908_v55 = vpack.c.bf16 %v3392_v53, %v3390_v52  ;;  %v3412_v52 = vld [vmem:[%s6943_s1 + $0x4d8] sm:$0xff] }
  0xd2   :  { %3889 = vmatprep.subr.bf16.mxu0 %v3888_v61  ;;  %v3389_v61 = vld [vmem:[%s6943_s1 + $0x420] sm:$0xff] }
  0xd3   :  { %v3910_v7 = vpack.c.bf16 %v3391_v62, %v3389_v61  ;;  %v3411_v61 = vld [vmem:[%s6943_s1 + $0x4d0] sm:$0xff]  ;;  %v3414_v62 = vld [vmem:[%s6943_s1 + $0x4e8] sm:$0xff] }
  0xd4   :  { %771 = vmatmul.mubr.f32.gmra.mrb[8].mxu0 %v4898_v32 }
  0xd5   :  { %776 = vmatprep.mubr.f32.mxu0 %v6955_v3  ;;  %3891 = vmatpush1.bf16.msra.mxu0 %v3890_v10  ;;  %v3912_v10 = vpack.c.bf16 %v3396_v2, %v3394_v1  ;;  %v3416_v1 = vld [vmem:[%s6943_s1 + $0x4f8] sm:$0xff] }
  0xd6   :  { %3893 = vmatprep.subr.bf16.mxu0 %v3892_v12  ;;  %v3393_v12 = vld [vmem:[%s6943_s1 + $0x440] sm:$0xff] }
  0xd7   :  { %v3914_v21 = vpack.c.bf16 %v3395_v13, %v3393_v12  ;;  %v3415_v12 = vld [vmem:[%s6943_s1 + $0x4f0] sm:$0xff] }
  0xd8   :  { %777 = vmatmul.mubr.f32.gmra.mrb[10].mxu0 %v4924_v40 }
  0xd9   :  { %782 = vmatprep.mubr.f32.mxu0 %v6955_v3  ;;  %3895 = vmatpush1.bf16.msra.mxu0 %v3894_v22  ;;  %v3916_v22 = vpack.c.bf16 %v3400_v20, %v3398_v19  ;;  %v3426_v19 = vld [vmem:[%s6945_s3 + $0x140] sm:$0xff] }
  0xda   :  { %3897 = vmatprep.subr.bf16.mxu0 %v3896_v23  ;;  %v3397_v23 = vld [vmem:[%s6943_s1 + $0x460] sm:$0xff] }
  0xdb   :  { %v3918_v31 = vpack.c.bf16 %v3399_v28, %v3397_v23 }
  0xdc   :  { %783 = vmatmul.mubr.f32.gmra.mrb[12].mxu0 %v4950_v48 }
  0xdd   :  { %788 = vmatprep.mubr.f32.mxu0 %v6955_v3  ;;  %3899 = vmatpush1.bf16.msra.mxu0 %v3898_v34  ;;  %v3920_v34 = vpack.c.bf16 %v3404_v30, %v3402_v29  ;;  %v3431_v29 = vld [vmem:[%s6945_s3 + $0x168] sm:$0xff]  ;;  %v3433_v30 = vld [vmem:[%s6945_s3 + $0x178] sm:$0xff] }
  0xde   :  { %3901 = vmatprep.subr.bf16.mxu0 %v3900_v35  ;;  %v3401_v35 = vld [vmem:[%s6943_s1 + $0x480] sm:$0xff] }
  0xdf   :  { %v3922_v43 = vpack.c.bf16 %v3403_v38, %v3401_v35  ;;  %v3430_v38 = vld [vmem:[%s6945_s3 + $0x160] sm:$0xff] }
  0xe0   :  { %789 = vmatmul.mubr.f32.gmra.mrb[14].mxu0 %v4976_v57 }
  0xe1   :  { %794 = vmatprep.mubr.f32.mxu0 %v6955_v3  ;;  %3903 = vmatpush1.bf16.msra.mxu0 %v3902_v44  ;;  %v3924_v44 = vpack.c.bf16 %v3408_v42, %v3406_v39  ;;  %v3432_v39 = vld [vmem:[%s6945_s3 + $0x170] sm:$0xff] }
  0xe2   :  { %3905 = vmatprep.subr.bf16.mxu0 %v3904_v45  ;;  %v3405_v45 = vld [vmem:[%s6943_s1 + $0x4a0] sm:$0xff]  ;;  %v3950_v42 = vpack.c.bf16 %v3432_v39, %v3430_v38 }
  0xe3   :  { %v3926_v53 = vpack.c.bf16 %v3407_v50, %v3405_v45 }
  0xe4   :  { %795 = vmatmul.mubr.f32.gmra.mrb[16].mxu0 %v5002_v4 }
  0xe5   :  { %800 = vmatprep.mubr.f32.mxu0 %v6955_v3 }
  0xe8   :  { %801 = vmatmul.mubr.f32.gmra.mrb[18].mxu0 %v5028_v14 }
  0xe9   :  { %806 = vmatprep.mubr.f32.mxu0 %v6955_v3 }
  0xec   :  { %807 = vmatmul.mubr.f32.gmra.mrb[20].mxu0 %v5054_v26 }
  0xed   :  { %812 = vmatprep.mubr.f32.mxu0 %v6955_v3 }
  0xf0   :  { %813 = vmatmul.mubr.f32.gmra.mrb[22].mxu0 %v5080_v36 }
  0xf1   :  { %818 = vmatprep.mubr.f32.mxu0 %v6955_v3 }
  0xf4   :  { %819 = vmatmul.mubr.f32.gmra.mrb[24].mxu0 %v5106_v46 }
  0xf5   :  { %824 = vmatprep.mubr.f32.mxu0 %v6955_v3 }
  0xf8   :  { %825 = vmatmul.mubr.f32.gmra.mrb[26].mxu0 %v5132_v59 }
  0xf9   :  { %830 = vmatprep.mubr.f32.mxu0 %v6955_v3 }
  0xfc   :  { %831 = vmatmul.mubr.f32.gmra.mrb[28].mxu0 %v5152_v6 }
  0xfd   :  { %836 = vmatprep.mubr.f32.mxu0 %v6955_v3 }
 0x100   :  { %837 = vmatmul.mubr.f32.gmra.mrb[30].mxu0 %v5172_v18 }
 0x101   :  { %842 = vmatprep.mubr.f32.mxu0 %v6955_v3 }
 0x104   :  { %843 = vmatmul.mubr.f32.gmra.mrb[32].mxu0 %v5010_v5 }
 0x105   :  { %848 = vmatprep.mubr.f32.mxu0 %v6955_v3 }
 0x108   :  { %849 = vmatmul.mubr.f32.gmra.mrb[34].mxu0 %v5036_v15 }
 0x109   :  { %854 = vmatprep.mubr.f32.mxu0 %v6955_v3 }
 0x10c   :  { %855 = vmatmul.mubr.f32.gmra.mrb[36].mxu0 %v5062_v27 }
 0x10d   :  { %860 = vmatprep.mubr.f32.mxu0 %v6955_v3 }
 0x110   :  { %861 = vmatmul.mubr.f32.gmra.mrb[38].mxu0 %v5088_v37 }
 0x111   :  { %866 = vmatprep.mubr.f32.mxu0 %v6955_v3 }
 0x114   :  { %867 = vmatmul.mubr.f32.gmra.mrb[40].mxu0 %v5114_v47 }
 0x115   :  { %872 = vmatprep.mubr.f32.mxu0 %v6955_v3 }
 0x118   :  { %873 = vmatmul.mubr.f32.gmra.mrb[42].mxu0 %v5140_v60 }
 0x119   :  { %878 = vmatprep.mubr.f32.mxu0 %v6955_v3 }
 0x11c   :  { %879 = vmatmul.mubr.f32.gmra.mrb[44].mxu0 %v5166_v11 }
 0x11d   :  { %884 = vmatprep.mubr.f32.mxu0 %v6955_v3 }
 0x120   :  { %885 = vmatmul.mubr.f32.gmra.mrb[46].mxu0 %v4777_v56 }
 0x121   :  { %890 = vmatprep.mubr.f32.mxu0 %v6955_v3 }
 0x124   :  { %891 = vmatmul.mubr.f32.gmra.mrb[48].mxu0 %v4802_v0 }
 0x125   :  { %896 = vmatprep.mubr.f32.mxu0 %v6955_v3 }
 0x128   :  { %897 = vmatmul.mubr.f32.gmra.mrb[50].mxu0 %v4828_v9 }
 0x129   :  { %902 = vmatprep.mubr.f32.mxu0 %v6955_v3 }
 0x12c   :  { %903 = vmatmul.mubr.f32.gmra.mrb[52].mxu0 %v4854_v17 }
 0x12d   :  { %908 = vmatprep.mubr.f32.mxu0 %v6955_v3 }
 0x130   :  { %909 = vmatmul.mubr.f32.gmra.mrb[54].mxu0 %v4880_v25 }
 0x131   :  { %914 = vmatprep.mubr.f32.mxu0 %v6955_v3 }
 0x134   :  { %915 = vmatmul.mubr.f32.gmra.mrb[56].mxu0 %v4906_v33 }
 0x135   :  { %920 = vmatprep.mubr.f32.mxu0 %v6955_v3 }
 0x138   :  { %921 = vmatmul.mubr.f32.gmra.mrb[58].mxu0 %v4932_v41 }
 0x139   :  { %926 = vmatprep.mubr.f32.mxu0 %v6955_v3 }
 0x13c   :  { %927 = vmatmul.mubr.f32.gmra.mrb[60].mxu0 %v4958_v49 }
 0x13d   :  { %932 = vmatprep.mubr.f32.mxu0 %v6955_v3 }
 0x140   :  { %933 = vmatmul.mubr.f32.gmra.mrb[62].mxu0 %v4794_v63 }
 0x141   :  { %1100 = vmatprep.mubr.f32.mxu0 %v6955_v3 }
 0x144   :  { %1101 = vmatmul.mubr.f32.vlgmr.msra.gmra.mrb[0].mxu0 %v5002_v4 }
 0x145   :  { %3907 = vmatpush1.bf16.msra.mxu0 %v3906_v54  ;;  %1106 = vmatprep.mubr.f32.mxu0 %v6955_v3  ;;  %v3928_v54 = vpack.c.bf16 %v3412_v52, %v3410_v51  ;;  %v3435_v51 = vld [vmem:[%s6945_s3 + $0x188] sm:$0xff]  ;;  %v3437_v52 = vld [vmem:[%s6945_s3 + $0x198] sm:$0xff] }
 0x146   :  { %3909 = vmatprep.subr.bf16.mxu0 %v3908_v55  ;;  %v3409_v55 = vld [vmem:[%s6943_s1 + $0x4c0] sm:$0xff] }
 0x147   :  { %v3930_v2 = vpack.c.bf16 %v3411_v61, %v3409_v55  ;;  %v3434_v61 = vld [vmem:[%s6945_s3 + $0x180] sm:$0xff] }
 0x148   :  { %1107 = vmatmul.mubr.f32.gmra.mrb[2].mxu0 %v5028_v14 }
 0x149   :  { %1112 = vmatprep.mubr.f32.mxu0 %v6955_v3  ;;  %3911 = vmatpush1.bf16.msra.mxu0 %v3910_v7  ;;  %v3932_v7 = vpack.c.bf16 %v3416_v1, %v3414_v62  ;;  %v3436_v62 = vld [vmem:[%s6945_s3 + $0x190] sm:$0xff] }
 0x14a   :  { %3913 = vmatprep.subr.bf16.mxu0 %v3912_v10  ;;  %v3413_v10 = vld [vmem:[%s6943_s1 + $0x4e0] sm:$0xff]  ;;  %v3954_v1 = vpack.c.bf16 %v3436_v62, %v3434_v61  ;;  %v1799_v61 = vld [vmem:[%s6945_s3 + $0x8] sm:$0xff]  ;;  %v1801_v62 = vld [vmem:[%s6945_s3 + $0x18] sm:$0xff] }
 0x14b   :  { %v3934_v13 = vpack.c.bf16 %v3415_v12, %v3413_v10  ;;  %v3439_v10 = vld [vmem:[%s6945_s3 + $0x1a8] sm:$0xff]  ;;  %v3441_v12 = vld [vmem:[%s6945_s3 + $0x1b8] sm:$0xff] }
 0x14c   :  { %1113 = vmatmul.mubr.f32.gmra.mrb[4].mxu0 %v5054_v26 }
 0x14d   :  { %1118 = vmatprep.mubr.f32.mxu0 %v6955_v3  ;;  %3915 = vmatpush1.bf16.msra.mxu0 %v3914_v21 }
 0x14e   :  { %3917 = vmatprep.subr.bf16.mxu0 %v3916_v22 }
 0x150   :  { %1119 = vmatmul.mubr.f32.gmra.mrb[6].mxu0 %v5080_v36 }
 0x151   :  { %1124 = vmatprep.mubr.f32.mxu0 %v6955_v3  ;;  %3919 = vmatpush1.bf16.msra.mxu0 %v3918_v31  ;;  %v3948_v31 = vpack.c.bf16 %v3433_v30, %v3431_v29  ;;  %v3446_v29 = vld [vmem:[%s6945_s3 + $0x1e0] sm:$0xff]  ;;  %v3448_v30 = vld [vmem:[%s6945_s3 + $0x1f0] sm:$0xff] }
 0x152   :  { %3921 = vmatprep.subr.bf16.mxu0 %v3920_v34 }
 0x154   :  { %1125 = vmatmul.mubr.f32.gmra.mrb[8].mxu0 %v5106_v46 }
 0x155   :  { %1130 = vmatprep.mubr.f32.mxu0 %v6955_v3  ;;  %3923 = vmatpush1.bf16.msra.mxu0 %v3922_v43 }
 0x156   :  { %3925 = vmatprep.subr.bf16.mxu0 %v3924_v44 }
 0x158   :  { %1131 = vmatmul.mubr.f32.gmra.mrb[10].mxu0 %v5132_v59 }
 0x159   :  { %1136 = vmatprep.mubr.f32.mxu0 %v6955_v3  ;;  %3927 = vmatpush1.bf16.msra.mxu0 %v3926_v53  ;;  %v3952_v53 = vpack.c.bf16 %v3437_v52, %v3435_v51 }
 0x15a   :  { %3929 = vmatprep.subr.bf16.mxu0 %v3928_v54 }
 0x15c   :  { %1137 = vmatmul.mubr.f32.gmra.mrb[12].mxu0 %v5152_v6 }
 0x15d   :  { %1142 = vmatprep.mubr.f32.mxu0 %v6955_v3  ;;  %3931 = vmatpush1.bf16.msra.mxu0 %v3930_v2 }
 0x15e   :  { %3933 = vmatprep.subr.bf16.mxu0 %v3932_v7 }
 0x160   :  { %1143 = vmatmul.mubr.f32.gmra.mrb[14].mxu0 %v5172_v18 }
 0x161   :  { %1148 = vmatprep.mubr.f32.mxu0 %v6955_v3  ;;  %3935 = vmatpush1.bf16.msra.mxu0 %v3934_v13  ;;  %v3956_v13 = vpack.c.bf16 %v3441_v12, %v3439_v10 }
 0x164   :  { %1149 = vmatmul.mubr.f32.gmra.mrb[16].mxu0 %v5010_v5 }
 0x165   :  { %1154 = vmatprep.mubr.f32.mxu0 %v6955_v3 }
 0x168   :  { %1155 = vmatmul.mubr.f32.gmra.mrb[18].mxu0 %v5036_v15 }
 0x169   :  { %1160 = vmatprep.mubr.f32.mxu0 %v6955_v3 }
 0x16c   :  { %1161 = vmatmul.mubr.f32.gmra.mrb[20].mxu0 %v5062_v27 }
 0x16d   :  { %1166 = vmatprep.mubr.f32.mxu0 %v6955_v3 }
 0x170   :  { %1167 = vmatmul.mubr.f32.gmra.mrb[22].mxu0 %v5088_v37 }
 0x171   :  { %1172 = vmatprep.mubr.f32.mxu0 %v6955_v3 }
 0x174   :  { %1173 = vmatmul.mubr.f32.gmra.mrb[24].mxu0 %v5114_v47 }
 0x175   :  { %1178 = vmatprep.mubr.f32.mxu0 %v6955_v3 }
 0x178   :  { %1179 = vmatmul.mubr.f32.gmra.mrb[26].mxu0 %v5140_v60 }
 0x179   :  { %1184 = vmatprep.mubr.f32.mxu0 %v6955_v3 }
 0x17c   :  { %1185 = vmatmul.mubr.f32.gmra.mrb[28].mxu0 %v5166_v11 }
 0x17d   :  { %1190 = vmatprep.mubr.f32.mxu0 %v6955_v3 }
 0x180   :  { %1191 = vmatmul.mubr.f32.gmra.mrb[30].mxu0 %v4777_v56  ;;  %v4587_v56 = vld [vmem:[%s6944_s0 + $0x40] sm:$0xff] }
 0x181   :  { %1196 = vmatprep.mubr.f32.mxu0 %v6955_v3 }
 0x184   :  { %1197 = vmatmul.mubr.f32.gmra.mrb[32].mxu0 %v4802_v0  ;;  %v4589_v0 = vld [vmem:[%s6944_s0 + $0x50] sm:$0xff] }
 0x185   :  { %1202 = vmatprep.mubr.f32.mxu0 %v6955_v3 }
 0x188   :  { %1203 = vmatmul.mubr.f32.gmra.mrb[34].mxu0 %v4828_v9  ;;  %v4591_v9 = vld [vmem:[%s6944_s0 + $0x80] sm:$0xff] }
 0x189   :  { %1208 = vmatprep.mubr.f32.mxu0 %v6955_v3 }
 0x18c   :  { %1209 = vmatmul.mubr.f32.gmra.mrb[36].mxu0 %v4854_v17  ;;  %v4593_v17 = vld [vmem:[%s6944_s0 + $0x90] sm:$0xff] }
 0x18d   :  { %1214 = vmatprep.mubr.f32.mxu0 %v6955_v3 }
 0x190   :  { %1215 = vmatmul.mubr.f32.gmra.mrb[38].mxu0 %v4880_v25 }
 0x191   :  { %1220 = vmatprep.mubr.f32.mxu0 %v6955_v3 }
 0x194   :  { %1221 = vmatmul.mubr.f32.gmra.mrb[40].mxu0 %v4906_v33 }
 0x195   :  { %1226 = vmatprep.mubr.f32.mxu0 %v6955_v3 }
 0x198   :  { %1227 = vmatmul.mubr.f32.gmra.mrb[42].mxu0 %v4932_v41 }
 0x199   :  { %1232 = vmatprep.mubr.f32.mxu0 %v6955_v3 }
 0x19c   :  { %1233 = vmatmul.mubr.f32.gmra.mrb[44].mxu0 %v4958_v49 }
 0x19d   :  { %1238 = vmatprep.mubr.f32.mxu0 %v6955_v3 }
 0x1a0   :  { %1239 = vmatmul.mubr.f32.gmra.mrb[46].mxu0 %v4794_v63  ;;  %v4588_v63 = vld [vmem:[%s6944_s0 + $0x48] sm:$0xff] }
 0x1a1   :  { %1244 = vmatprep.mubr.f32.mxu0 %v6955_v3 }
 0x1a4   :  { %1245 = vmatmul.mubr.f32.gmra.mrb[48].mxu0 %v4820_v8  ;;  %v4590_v8 = vld [vmem:[%s6944_s0 + $0x58] sm:$0xff] }
 0x1a5   :  { %1250 = vmatprep.mubr.f32.mxu0 %v6955_v3 }
 0x1a8   :  { %1251 = vmatmul.mubr.f32.gmra.mrb[50].mxu0 %v4846_v16  ;;  %v4592_v16 = vld [vmem:[%s6944_s0 + $0x88] sm:$0xff] }
 0x1a9   :  { %1256 = vmatprep.mubr.f32.mxu0 %v6955_v3 }
 0x1ac   :  { %1257 = vmatmul.mubr.f32.gmra.mrb[52].mxu0 %v4872_v24  ;;  %v4594_v24 = vld [vmem:[%s6944_s0 + $0x98] sm:$0xff] }
 0x1ad   :  { %1262 = vmatprep.mubr.f32.mxu0 %v6955_v3 }
 0x1b0   :  { %1263 = vmatmul.mubr.f32.gmra.mrb[54].mxu0 %v4898_v32 }
 0x1b1   :  { %1268 = vmatprep.mubr.f32.mxu0 %v6955_v3 }
 0x1b4   :  { %1269 = vmatmul.mubr.f32.gmra.mrb[56].mxu0 %v4924_v40 }
 0x1b5   :  { %1274 = vmatprep.mubr.f32.mxu0 %v6955_v3 }
 0x1b8   :  { %1275 = vmatmul.mubr.f32.gmra.mrb[58].mxu0 %v4950_v48 }
 0x1b9   :  { %1280 = vmatprep.mubr.f32.mxu0 %v6955_v3 }
 0x1bc   :  { %1281 = vmatmul.mubr.f32.gmra.mrb[60].mxu0 %v4976_v57 }
 0x1bd   :  { %1286 = vmatprep.mubr.f32.mxu0 %v6955_v3 }
 0x1c0   :  { %1287 = vmatmul.mubr.f32.gmra.mrb[62].mxu0 %v5002_v4 }
 0x1c1   :  { %1454 = vmatprep.mubr.f32.mxu0 %v6955_v3 }
 0x1c4   :  { %1455 = vmatmul.mubr.f32.vlgmr.msra.gmra.mrb[0].mxu0 %v5010_v5  ;;  %v3422_v5 = vld [vmem:[%s6945_s3 + $0x120] sm:$0xff] }
 0x1c5   :  { %1460 = vmatprep.mubr.f32.mxu0 %v6955_v3 }
 0x1c8   :  { %1461 = vmatmul.mubr.f32.gmra.mrb[2].mxu0 %v5036_v15 }
 0x1c9   :  { %1466 = vmatprep.mubr.f32.mxu0 %v6955_v3 }
 0x1cc   :  { %1467 = vmatmul.mubr.f32.gmra.mrb[4].mxu0 %v5062_v27 }
 0x1cd   :  { %1472 = vmatprep.mubr.f32.mxu0 %v6955_v3 }
 0x1d0   :  { %1473 = vmatmul.mubr.f32.gmra.mrb[6].mxu0 %v5088_v37 }
 0x1d1   :  { %1478 = vmatprep.mubr.f32.mxu0 %v6955_v3 }
 0x1d4   :  { %1479 = vmatmul.mubr.f32.gmra.mrb[8].mxu0 %v5114_v47 }
 0x1d5   :  { %1484 = vmatprep.mubr.f32.mxu0 %v6955_v3 }
 0x1d8   :  { %1485 = vmatmul.mubr.f32.gmra.mrb[10].mxu0 %v5140_v60  ;;  %v3429_v60 = vld [vmem:[%s6945_s3 + $0x158] sm:$0xff] }
 0x1d9   :  { %1490 = vmatprep.mubr.f32.mxu0 %v6955_v3 }
 0x1dc   :  { %1491 = vmatmul.mubr.f32.gmra.mrb[12].mxu0 %v5166_v11 }
 0x1dd   :  { %1496 = vmatprep.mubr.f32.mxu0 %v6955_v3 }
 0x1e0   :  { %1497 = vmatmul.mubr.f32.gmra.mrb[14].mxu0 %v4587_v56 }
 0x1e1   :  { %1502 = vmatprep.mubr.f32.mxu0 %v6955_v3 }
 0x1e4   :  { %1503 = vmatmul.mubr.f32.gmra.mrb[16].mxu0 %v4588_v63  ;;  %v3438_v63 = vld [vmem:[%s6945_s3 + $0x1a0] sm:$0xff] }
 0x1e5   :  { %1508 = vmatprep.mubr.f32.mxu0 %v6955_v3 }
 0x1e8   :  { %1509 = vmatmul.mubr.f32.gmra.mrb[18].mxu0 %v4589_v0  ;;  %v3440_v0 = vld [vmem:[%s6945_s3 + $0x1b0] sm:$0xff] }
 0x1e9   :  { %1514 = vmatprep.mubr.f32.mxu0 %v6955_v3 }
 0x1ec   :  { %1515 = vmatmul.mubr.f32.gmra.mrb[20].mxu0 %v4590_v8 }
 0x1ed   :  { %1520 = vmatprep.mubr.f32.mxu0 %v6955_v3 }
 0x1f0   :  { %1521 = vmatmul.mubr.f32.gmra.mrb[22].mxu0 %v4880_v25  ;;  %v3419_v25 = vld [vmem:[%s6945_s3 + $0x108] sm:$0xff] }
 0x1f1   :  { %1526 = vmatprep.mubr.f32.mxu0 %v6955_v3 }
 0x1f4   :  { %1527 = vmatmul.mubr.f32.gmra.mrb[24].mxu0 %v4906_v33 }
 0x1f5   :  { %1532 = vmatprep.mubr.f32.mxu0 %v6955_v3 }
 0x1f8   :  { %1533 = vmatmul.mubr.f32.gmra.mrb[26].mxu0 %v4932_v41  ;;  %v3420_v41 = vld [vmem:[%s6945_s3 + $0x110] sm:$0xff] }
 0x1f9   :  { %1538 = vmatprep.mubr.f32.mxu0 %v6955_v3 }
 0x1fc   :  { %1539 = vmatmul.mubr.f32.gmra.mrb[28].mxu0 %v4958_v49  ;;  %v3423_v49 = vld [vmem:[%s6945_s3 + $0x128] sm:$0xff] }
 0x1fd   :  { %1544 = vmatprep.mubr.f32.mxu0 %v6955_v3 }
 0x200   :  { %1545 = vmatmul.mubr.f32.gmra.mrb[30].mxu0 %v4591_v9  ;;  %v3958_v9 = vpack.c.bf16 %v3440_v0, %v3438_v63 }
 0x201   :  { %1550 = vmatprep.mubr.f32.mxu0 %v6955_v3 }
 0x204   :  { %1551 = vmatmul.mubr.f32.gmra.mrb[32].mxu0 %v4592_v16 }
 0x205   :  { %1556 = vmatprep.mubr.f32.mxu0 %v6955_v3 }
 0x208   :  { %1557 = vmatmul.mubr.f32.gmra.mrb[34].mxu0 %v4593_v17 }
 0x209   :  { %1562 = vmatprep.mubr.f32.mxu0 %v6955_v3 }
 0x20c   :  { %1563 = vmatmul.mubr.f32.gmra.mrb[36].mxu0 %v4594_v24 }
 0x20d   :  { %1568 = vmatprep.mubr.f32.mxu0 %v6955_v3 }
 0x210   :  { %1569 = vmatmul.mubr.f32.gmra.mrb[38].mxu0 %v4898_v32  ;;  %v3421_v32 = vld [vmem:[%s6945_s3 + $0x118] sm:$0xff] }
 0x211   :  { %1574 = vmatprep.mubr.f32.mxu0 %v6955_v3  ;;  %v3936_v33 = vpack.c.bf16 %v3421_v32, %v3419_v25  ;;  %v3443_v32 = vld [vmem:[%s6945_s3 + $0x1c8] sm:$0xff] }
 0x213   :  { %3937 = vmatprep.subr.bf16.mxu1 %v3936_v33  ;;  %v3445_v33 = vld [vmem:[%s6945_s3 + $0x1d8] sm:$0xff] }
 0x214   :  { %1575 = vmatmul.mubr.f32.gmra.mrb[40].mxu0 %v4924_v40  ;;  %v3418_v40 = vld [vmem:[%s6945_s3 + $0x100] sm:$0xff] }
 0x215   :  { %1580 = vmatprep.mubr.f32.mxu0 %v6955_v3 }
 0x218   :  { %1581 = vmatmul.mubr.f32.gmra.mrb[42].mxu0 %v4950_v48  ;;  %v3938_v48 = vpack.c.bf16 %v3420_v41, %v3418_v40  ;;  %v3960_v40 = vpack.c.bf16 %v3445_v33, %v3443_v32 }
 0x219   :  { %1586 = vmatprep.mubr.f32.mxu0 %v6955_v3 }
 0x21a   :  { %3939 = vmatpush1.bf16.msra.mxu1 %v3938_v48  ;;  %v3442_v48 = vld [vmem:[%s6945_s3 + $0x1c0] sm:$0xff] }
 0x21c   :  { %1587 = vmatmul.mubr.f32.gmra.mrb[44].mxu0 %v4976_v57  ;;  %v3425_v57 = vld [vmem:[%s6945_s3 + $0x138] sm:$0xff] }
 0x21d   :  { %1592 = vmatprep.mubr.f32.mxu0 %v6955_v3 }
 0x220   :  { %1593 = vmatmul.mubr.f32.gmra.mrb[46].mxu0 %v5002_v4  ;;  %v3940_v4 = vpack.c.bf16 %v3425_v57, %v3423_v49  ;;  %v3444_v49 = vld [vmem:[%s6945_s3 + $0x1d0] sm:$0xff] }
 0x221   :  { %1598 = vmatprep.mubr.f32.mxu0 %v6955_v3 }
 0x222   :  { %3941 = vmatprep.subr.bf16.mxu1 %v3940_v4  ;;  %v3962_v4 = vpack.c.bf16 %v3444_v49, %v3442_v48 }
 0x224   :  { %1599 = vmatmul.mubr.f32.gmra.mrb[48].mxu0 %v5028_v14  ;;  %v3424_v14 = vld [vmem:[%s6945_s3 + $0x130] sm:$0xff] }
 0x225   :  { %1604 = vmatprep.mubr.f32.mxu0 %v6955_v3  ;;  %v3942_v15 = vpack.c.bf16 %v3424_v14, %v3422_v5 }
 0x227   :  { %3943 = vmatpush1.bf16.msra.mxu1 %v3942_v15 }
 0x228   :  { %1605 = vmatmul.mubr.f32.gmra.mrb[50].mxu0 %v5054_v26  ;;  %v5654_v26 = vpop.f32.mrb[0].mxu1 }
 0x229   :  { %1610 = vmatprep.mubr.f32.mxu0 %v6955_v3  ;;  %v5656_v27 = vpop.f32.mrb[1].mxu1 }
 0x22c   :  { %1611 = vmatmul.mubr.f32.gmra.mrb[52].mxu0 %v5080_v36  ;;  %v5660_v36 = vpop.f32.mrb[2].mxu1 }
 0x22d   :  { %1616 = vmatprep.mubr.f32.mxu0 %v6955_v3  ;;  %v5662_v37 = vpop.f32.mrb[3].mxu1 }
 0x230   :  { %1617 = vmatmul.mubr.f32.gmra.mrb[54].mxu0 %v5106_v46  ;;  %v5666_v46 = vpop.f32.mrb[4].mxu1 }
 0x231   :  { %1622 = vmatprep.mubr.f32.mxu0 %v6955_v3  ;;  %v5668_v47 = vpop.f32.mrb[5].mxu1 }
 0x232   :  { %v5677_v11 = vpop.f32.mrb[6].mxu1 }
 0x234   :  { %1623 = vmatmul.mubr.f32.gmra.mrb[56].mxu0 %v5132_v59  ;;  %v3427_v59 = vld [vmem:[%s6945_s3 + $0x148] sm:$0xff] }
 0x235   :  { %1628 = vmatprep.mubr.f32.mxu0 %v6955_v3 }
 0x238   :  { %1629 = vmatmul.mubr.f32.gmra.mrb[58].mxu0 %v5152_v6  ;;  %v3944_v6 = vpack.c.bf16 %v3429_v60, %v3427_v59  ;;  %v3447_v60 = vld [vmem:[%s6945_s3 + $0x1e8] sm:$0xff] }
 0x239   :  { %1634 = vmatprep.mubr.f32.mxu0 %v6955_v3 }
 0x23a   :  { %3945 = vmatprep.subr.bf16.mxu1 %v3944_v6  ;;  %v3449_v6 = vld [vmem:[%s6945_s3 + $0x1f8] sm:$0xff] }
 0x23c   :  { %1635 = vmatmul.mubr.f32.gmra.mrb[60].mxu0 %v5172_v18  ;;  %v5679_v18 = vpop.f32.mrb[7].mxu1 }
 0x23d   :  { %1640 = vmatprep.mubr.f32.mxu0 %v6955_v3  ;;  %v5687_v21 = vpop.f32.mrb[8].mxu1 }
 0x23e   :  { %v5689_v22 = vpop.f32.mrb[9].mxu1 }
 0x23f   :  { %v5691_v23 = vpop.f32.mrb[10].mxu1 }
 0x240   :  { %1641 = vmatmul.mubr.f32.gmra.mrb[62].mxu0 %v4984_v58  ;;  %v3428_v58 = vld [vmem:[%s6945_s3 + $0x150] sm:$0xff]  ;;  %v5693_v28 = vpop.f32.mrb[11].mxu1 }
 0x241   :  { %v3946_v20 = vpack.c.bf16 %v3428_v58, %v3426_v19  ;;  %v5701_v34 = vpop.f32.mrb[12].mxu1  ;;  %v3964_v19 = vpack.c.bf16 %v3449_v6, %v3447_v60 }
 0x242   :  { %v5703_v35 = vpop.f32.mrb[13].mxu1 }
 0x243   :  { %3947 = vmatpush1.bf16.msra.mxu1 %v3946_v20  ;;  %v5711_v43 = vpop.f32.mrb[14].mxu1 }
 0x244   :  { %3949 = vmatprep.subr.bf16.mxu1 %v3948_v31  ;;  %v5713_v44 = vpop.f32.mrb[15].mxu1  ;;  %v3966_v31 = vpack.c.bf16 %v3448_v30, %v3446_v29 }
 0x245   :  { %v5715_v45 = vpop.f32.mrb[16].mxu1 }
 0x246   :  { %v5717_v50 = vpop.f32.mrb[17].mxu1 }
 0x247   :  { %3951 = vmatpush1.bf16.msra.mxu1 %v3950_v42  ;;  %v5725_v54 = vpop.f32.mrb[18].mxu1 }
 0x248   :  { %v5727_v55 = vpop.f32.mrb[19].mxu1  ;;  %3953 = vmatprep.subr.bf16.mxu1 %v3952_v53 }
 0x249   :  { %v5735_v2 = vpop.f32.mrb[20].mxu1 }
 0x24a   :  { %v5737_v7 = vpop.f32.mrb[21].mxu1 }
 0x24b   :  { %3955 = vmatpush1.bf16.msra.mxu1 %v3954_v1  ;;  %v5745_v56 = vpop.f32.mrb[22].mxu1  ;;  %v3968_v1 = vpack.c.bf16 %v1801_v62, %v1799_v61 }
 0x24c   :  { %3957 = vmatprep.subr.bf16.mxu1 %v3956_v13  ;;  %v5753_v8 = vpop.f32.mrb[23].mxu1 }
 0x24d   :  { %v5755_v16 = vpop.f32.mrb[24].mxu1 }
 0x24e   :  { %v5757_v17 = vpop.f32.mrb[25].mxu1 }
 0x24f   :  { %3959 = vmatpush1.bf16.msra.mxu1 %v3958_v9  ;;  %v5759_v24 = vpop.f32.mrb[26].mxu1 }
 0x250   :  { %v5761_v25 = vpop.f32.mrb[27].mxu1  ;;  %3961 = vmatprep.subr.bf16.mxu1 %v3960_v40 }
 0x251   :  { %v5769_v41 = vpop.f32.mrb[28].mxu1 }
 0x252   :  { %v5777_v57 = vpop.f32.mrb[29].mxu1 }
 0x253   :  { %3963 = vmatpush1.bf16.msra.mxu1 %v3962_v4  ;;  %v5779_v5 = vpop.f32.mrb[30].mxu1 }
 0x254   :  { %v5781_v14 = vpop.f32.mrb[31].mxu1  ;;  %3965 = vmatprep.subr.bf16.mxu1 %v3964_v19 }
 0x255   :  { %v5783_v15 = vpop.f32.mrb[32].mxu1 }
 0x256   :  { %v5785_v59 = vpop.f32.mrb[33].mxu1 }
 0x257   :  { %v5793_v58 = vpop.f32.mrb[34].mxu1  ;;  %3967 = vmatpush1.bf16.msra.mxu1 %v3966_v31 }
 0x258   :  { %v5795_v20 = vpop.f32.mrb[35].mxu1  ;;  %3969 = vmatprep.subr.bf16.mxu1 %v3968_v1 }
 0x259   :  { %v5803_v38 = vpop.f32.mrb[36].mxu1 }
 0x25a   :  { %v5805_v39 = vpop.f32.mrb[37].mxu1 }
 0x25b   :  { %v5807_v42 = vpop.f32.mrb[38].mxu1 }
 0x25c   :  { %v5809_v51 = vpop.f32.mrb[39].mxu1 }
 0x25d   :  { %v5811_v52 = vpop.f32.mrb[40].mxu1 }
 0x25e   :  { %v5813_v53 = vpop.f32.mrb[41].mxu1 }
 0x25f   :  { %6957 = vst [vmem:[#allocation2_spill] sm:$0xff] %v5813_v53  ;;  %v5821_v10 = vpop.f32.mrb[42].mxu1 }
 0x260   :  { %6958 = vst [vmem:[#allocation3_spill] sm:$0xff] %v5821_v10  ;;  %v5823_v12 = vpop.f32.mrb[43].mxu1 }
 0x261   :  { %6959 = vst [vmem:[#allocation4_spill] sm:$0xff] %v5823_v12  ;;  %v5825_v13 = vpop.f32.mrb[44].mxu1 }
 0x262   :  { %6960 = vst [vmem:[#allocation5_spill] sm:$0xff] %v5825_v13  ;;  %v5827_v63 = vpop.f32.mrb[45].mxu1 }
 0x263   :  { %6961 = vst [vmem:[#allocation6_spill] sm:$0xff] %v5827_v63  ;;  %v5829_v0 = vpop.f32.mrb[46].mxu1 }
 0x264   :  { %6962 = vst [vmem:[#allocation7_spill] sm:$0xff] %v5829_v0  ;;  %v5831_v9 = vpop.f32.mrb[47].mxu1 }
 0x265   :  { %6963 = vst [vmem:[#allocation8_spill] sm:$0xff] %v5831_v9 }
 0x297   :  { %v1456_v32 = vpop.f32.mrb[0].mxu0 }
 0x298   :  { %v1458_v33 = vpop.f32.mrb[1].mxu0 }
 0x299   :  { %v1712_v40 = vmax.f32 %v1456_v32, %v1458_v33 }
 0x29b   :  { %v1462_v48 = vpop.f32.mrb[2].mxu0 }
 0x29c   :  { %v1464_v49 = vpop.f32.mrb[3].mxu0 }
 0x29d   :  { %v1713_v4 = vmax.f32 %v1462_v48, %v1464_v49 }
 0x29f   :  { %v1468_v60 = vpop.f32.mrb[4].mxu0 }
 0x2a0   :  { %v1470_v6 = vpop.f32.mrb[5].mxu0 }
 0x2a1   :  { %v1714_v19 = vmax.f32 %v1468_v60, %v1470_v6 }
 0x2a3   :  { %v1474_v29 = vpop.f32.mrb[6].mxu0 }
 0x2a4   :  { %v1476_v30 = vpop.f32.mrb[7].mxu0 }
 0x2a5   :  { %v1715_v31 = vmax.f32 %v1474_v29, %v1476_v30  ;;  %v5838_v30 = vld [vmem:[%s6946_s2] ss:$0 sm:$0xff] }
 0x2a7   :  { %v1480_v61 = vpop.f32.mrb[8].mxu0 }
 0x2a8   :  { %v1482_v62 = vpop.f32.mrb[9].mxu0 }
 0x2a9   :  { %v1716_v1 = vmax.f32 %v1480_v61, %v1482_v62 }
 0x2ab   :  { %v1486_v3 = vpop.f32.mrb[10].mxu0 }
 0x2ac   :  { %v1488_v63 = vpop.f32.mrb[11].mxu0 }
 0x2ad   :  { %v1717_v0 = vmax.f32 %v1486_v3, %v1488_v63 }
 0x2af   :  { %v1492_v13 = vpop.f32.mrb[12].mxu0 }
 0x2b0   :  { %v1494_v9 = vpop.f32.mrb[13].mxu0 }
 0x2b1   :  { %v1718_v12 = vmax.f32 %v1492_v13, %v1494_v9 }
 0x2b3   :  { %v1498_v10 = vpop.f32.mrb[14].mxu0 }
 0x2b4   :  { %v1500_v32 = vpop.f32.mrb[15].mxu0 }
 0x2b5   :  { %v1719_v33 = vmax.f32 %v1498_v10, %v1500_v32 }
 0x2b7   :  { %v1504_v53 = vpop.f32.mrb[16].mxu0 }
 0x2b8   :  { %v4248_v48 = vadd.f32 %v1504_v53, %v5654_v26  ;;  %v1506_v49 = vpop.f32.mrb[17].mxu0 }
 0x2b9   :  { %v4249_v60 = vadd.f32 %v1506_v49, %v5656_v27 }
 0x2bb   :  { %v1720_v6 = vmax.f32 %v4248_v48, %v4249_v60  ;;  %v1510_v29 = vpop.f32.mrb[18].mxu0 }
 0x2bc   :  { %v4250_v3 = vadd.f32 %v1510_v29, %v5660_v36  ;;  %v1512_v63 = vpop.f32.mrb[19].mxu0 }
 0x2bd   :  { %v1728_v13 = vmax.f32 %v1712_v40, %v1720_v6  ;;  %v4251_v9 = vadd.f32 %v1512_v63, %v5662_v37 }
 0x2bf   :  { %v5843_v10 = vadd.f32 %v5838_v30, %v1728_v13  ;;  %v1721_v26 = vmax.f32 %v4250_v3, %v4251_v9  ;;  %v1516_v53 = vpop.f32.mrb[20].mxu0 }
 0x2c0   :  { %v4252_v27 = vadd.f32 %v1516_v53, %v5666_v46  ;;  %v1518_v61 = vpop.f32.mrb[21].mxu0 }
 0x2c1   :  { %v5846_v62 = vmax.f32 %v1713_v4, %v1721_v26  ;;  %v4253_v32 = vadd.f32 %v1518_v61, %v5668_v47 }
 0x2c3   :  { %v1722_v48 = vmax.f32 %v4252_v27, %v4253_v32  ;;  %v1522_v49 = vpop.f32.mrb[22].mxu0 }
 0x2c4   :  { %v4254_v36 = vadd.f32 %v1522_v49, %v5677_v11  ;;  %v1524_v60 = vpop.f32.mrb[23].mxu0 }
 0x2c5   :  { %v5850_v40 = vmax.f32 %v1714_v19, %v1722_v48  ;;  %v4255_v37 = vadd.f32 %v1524_v60, %v5679_v18 }
 0x2c7   :  { %v1723_v6 = vmax.f32 %v4254_v36, %v4255_v37  ;;  %v1528_v29 = vpop.f32.mrb[24].mxu0 }
 0x2c8   :  { %v4256_v3 = vadd.f32 %v1528_v29, %v5687_v21  ;;  %v1530_v63 = vpop.f32.mrb[25].mxu0 }
 0x2c9   :  { %v5854_v46 = vmax.f32 %v1715_v31, %v1723_v6  ;;  %v4257_v4 = vadd.f32 %v1530_v63, %v5689_v22 }
 0x2cb   :  { %v1724_v13 = vmax.f32 %v4256_v3, %v4257_v4  ;;  %v1534_v47 = vpop.f32.mrb[26].mxu0 }
 0x2cc   :  { %v4258_v9 = vadd.f32 %v1534_v47, %v5691_v23  ;;  %v1536_v26 = vpop.f32.mrb[27].mxu0 }
 0x2cd   :  { %v5858_v11 = vmax.f32 %v1716_v1, %v1724_v13  ;;  %v4259_v19 = vadd.f32 %v1536_v26, %v5693_v28 }
 0x2cf   :  { %v1725_v53 = vmax.f32 %v4258_v9, %v4259_v19  ;;  %v1540_v18 = vpop.f32.mrb[28].mxu0 }
 0x2d0   :  { %v4260_v27 = vadd.f32 %v1540_v18, %v5701_v34  ;;  %v1542_v61 = vpop.f32.mrb[29].mxu0 }
 0x2d1   :  { %v5862_v21 = vmax.f32 %v1717_v0, %v1725_v53  ;;  %v4261_v31 = vadd.f32 %v1542_v61, %v5703_v35 }
 0x2d3   :  { %v1726_v32 = vmax.f32 %v4260_v27, %v4261_v31  ;;  %v1546_v22 = vpop.f32.mrb[30].mxu0 }
 0x2d4   :  { %v4262_v48 = vadd.f32 %v1546_v22, %v5711_v43  ;;  %v1548_v49 = vpop.f32.mrb[31].mxu0 }
 0x2d5   :  { %v5866_v23 = vmax.f32 %v1718_v12, %v1726_v32  ;;  %v4263_v1 = vadd.f32 %v1548_v49, %v5713_v44 }
 0x2d7   :  { %v1727_v36 = vmax.f32 %v4262_v48, %v4263_v1  ;;  %v1552_v28 = vpop.f32.mrb[32].mxu0 }
 0x2d8   :  { %v4264_v60 = vadd.f32 %v1552_v28, %v5715_v45  ;;  %v1554_v37 = vpop.f32.mrb[33].mxu0 }
 0x2d9   :  { %v5870_v34 = vmax.f32 %v1719_v33, %v1727_v36  ;;  %v4265_v0 = vadd.f32 %v1554_v37, %v5717_v50 }
 0x2db   :  { %v1758_v6 = vmax.f32 %v4264_v60, %v4265_v0  ;;  %v1558_v35 = vpop.f32.mrb[34].mxu0 }
 0x2dc   :  { %v4266_v29 = vadd.f32 %v1558_v35, %v5725_v54  ;;  %v1560_v3 = vpop.f32.mrb[35].mxu0 }
 0x2dd   :  { %v4267_v43 = vadd.f32 %v1560_v3, %v5727_v55 }
 0x2df   :  { %v1759_v12 = vmax.f32 %v4266_v29, %v4267_v43  ;;  %v1564_v63 = vpop.f32.mrb[36].mxu0  ;;  %v1800_v29 = vld [vmem:[%s6945_s3 + $0x10] sm:$0xff] }
 0x2e0   :  { %v5876_v44 = vadd.f32 %v1564_v63, %v5735_v2  ;;  %v1566_v4 = vpop.f32.mrb[37].mxu0 }
 0x2e1   :  { %v5879_v45 = vadd.f32 %v1566_v4, %v5737_v7 }
 0x2e3   :  { %v1760_v33 = vmax.f32 %v5876_v44, %v5879_v45  ;;  %v1570_v50 = vpop.f32.mrb[38].mxu0  ;;  %v1813_v44 = vld [vmem:[%s6945_s3 + $0x78] sm:$0xff] }
 0x2e4   :  { %v5884_v13 = vadd.f32 %v1570_v50, %v5745_v56  ;;  %v1572_v54 = vpop.f32.mrb[39].mxu0 }
 0x2e5   :  { %v5887_v47 = vadd.f32 %v1572_v54, %v5753_v8 }
 0x2e7   :  { %v1761_v55 = vmax.f32 %v5884_v13, %v5887_v47  ;;  %v1576_v2 = vpop.f32.mrb[40].mxu0  ;;  %v1817_v13 = vld [vmem:[%s6945_s3 + $0x98] sm:$0xff] }
 0x2e8   :  { %v5892_v9 = vadd.f32 %v1576_v2, %v5755_v16  ;;  %v1578_v7 = vpop.f32.mrb[41].mxu0 }
 0x2e9   :  { %v5895_v26 = vadd.f32 %v1578_v7, %v5757_v17  ;;  %v1802_v7 = vld [vmem:[%s6945_s3 + $0x20] sm:$0xff] }
 0x2eb   :  { %v1762_v19 = vmax.f32 %v5892_v9, %v5895_v26  ;;  %v1582_v56 = vpop.f32.mrb[42].mxu0  ;;  %v1821_v9 = vld [vmem:[%s6945_s3 + $0xb8] sm:$0xff] }
 0x2ec   :  { %v5900_v53 = vadd.f32 %v1582_v56, %v5759_v24  ;;  %v1584_v8 = vpop.f32.mrb[43].mxu0  ;;  %v1804_v56 = vld [vmem:[%s6945_s3 + $0x30] sm:$0xff] }
 0x2ed   :  { %v5903_v18 = vadd.f32 %v1584_v8, %v5761_v25  ;;  %v1809_v8 = vld [vmem:[%s6945_s3 + $0x58] sm:$0xff] }
 0x2ef   :  { %v1763_v27 = vmax.f32 %v5900_v53, %v5903_v18  ;;  %v1588_v16 = vpop.f32.mrb[44].mxu0  ;;  %v1825_v53 = vld [vmem:[%s6945_s3 + $0xd8] sm:$0xff] }
 0x2f0   :  { %v5908_v61 = vadd.f32 %v1588_v16, %v5769_v41  ;;  %v1590_v17 = vpop.f32.mrb[45].mxu0 }
 0x2f1   :  { %v5911_v31 = vadd.f32 %v1590_v17, %v5777_v57 }
 0x2f3   :  { %v1764_v32 = vmax.f32 %v5908_v61, %v5911_v31  ;;  %v1594_v24 = vpop.f32.mrb[46].mxu0  ;;  %v1829_v61 = vld [vmem:[%s6945_s3 + $0xf8] sm:$0xff] }
 0x2f4   :  { %v5916_v22 = vadd.f32 %v1594_v24, %v5779_v5  ;;  %v1596_v25 = vpop.f32.mrb[47].mxu0 }
 0x2f5   :  { %v5919_v48 = vadd.f32 %v1596_v25, %v5781_v14  ;;  %v1798_v14 = vld [vmem:[%s6945_s3] sm:$0xff]  ;;  %v6964_v25 = vmov 0.0  }
 0x2f6   :  { %v3970_v63 = vpack.c.bf16 %v1800_v29, %v1798_v14 }
 0x2f7   :  { %v1765_v49 = vmax.f32 %v5916_v22, %v5919_v48  ;;  %v1600_v41 = vpop.f32.mrb[48].mxu0 }
 0x2f8   :  { %v4280_v1 = vadd.f32 %v1600_v41, %v5783_v15  ;;  %v1602_v36 = vpop.f32.mrb[49].mxu0  ;;  %v1803_v15 = vld [vmem:[%s6945_s3 + $0x28] sm:$0xff]  ;;  %v3974_v41 = vpack.c.bf16 %v1804_v56, %v1802_v7  ;;  %v6967_v56 = vld [vmem:[#allocation4_spill] sm:$0xff] }
 0x2f9   :  { %v4281_v57 = vadd.f32 %v1602_v36, %v5785_v59  ;;  %v1805_v59 = vld [vmem:[%s6945_s3 + $0x38] sm:$0xff] }
 0x2fa   :  { %v3972_v2 = vpack.c.bf16 %v1805_v59, %v1803_v15  ;;  %v6965_v15 = vld [vmem:[#allocation2_spill] sm:$0xff] }
 0x2fb   :  { %v1766_v28 = vmax.f32 %v4280_v1, %v4281_v57  ;;  %v1606_v60 = vpop.f32.mrb[50].mxu0 }
 0x2fc   :  { %v4282_v37 = vadd.f32 %v1606_v60, %v5793_v58  ;;  %v1608_v0 = vpop.f32.mrb[51].mxu0  ;;  %v1806_v60 = vld [vmem:[%s6945_s3 + $0x40] sm:$0xff] }
 0x2fd   :  { %v1774_v5 = vmax.f32 %v1758_v6, %v1766_v28  ;;  %v4283_v35 = vadd.f32 %v1608_v0, %v5795_v20 }
 0x2ff   :  { %v1782_v58 = vadd.f32 %v5838_v30, %v1774_v5  ;;  %v1767_v6 = vmax.f32 %v4282_v37, %v4283_v35  ;;  %v1612_v20 = vpop.f32.mrb[52].mxu0  ;;  %v1811_v37 = vld [vmem:[%s6945_s3 + $0x68] sm:$0xff] }
 0x300   :  { %v4284_v3 = vadd.f32 %v1612_v20, %v5803_v38  ;;  %v1614_v43 = vpop.f32.mrb[53].mxu0  ;;  %v1807_v38 = vld [vmem:[%s6945_s3 + $0x48] sm:$0xff] }
 0x301   :  { %v5941_v4 = vmax.f32 %v1782_v58, 0.0  ;;  %v1775_v50 = vmax.f32 %v1759_v12, %v1767_v6  ;;  %v4285_v54 = vadd.f32 %v1614_v43, %v5805_v39  ;;  %v3976_v28 = vpack.c.bf16 %v1809_v8, %v1807_v38  ;;  %v1810_v6 = vld [vmem:[%s6945_s3 + $0x60] sm:$0xff]  ;;  %v1815_v20 = vld [vmem:[%s6945_s3 + $0x88] sm:$0xff] }
 0x302   :  { %v3980_v58 = vpack.c.bf16 %v1813_v44, %v1811_v37  ;;  %v6966_v43 = vld [vmem:[#allocation3_spill] sm:$0xff]  ;;  %v3984_v8 = vpack.c.bf16 %v1817_v13, %v1815_v20  ;;  %v1822_v13 = vld [vmem:[%s6945_s3 + $0xc0] sm:$0xff] }
 0x303   :  { %v1783_v12 = vadd.f32 %v5838_v30, %v1775_v50  ;;  %v1768_v39 = vmax.f32 %v4284_v3, %v4285_v54  ;;  %v1618_v16 = vpop.f32.mrb[54].mxu0  ;;  %1928 = vmatmul.mubr.f32.vlgmr.msra.gmra.mrb[48].mxu1 %v5941_v4 }
 0x304   :  { %v4286_v17 = vadd.f32 %v1618_v16, %v5807_v42  ;;  %v1620_v24 = vpop.f32.mrb[55].mxu0  ;;  %3971 = vmatpush1.bf16.msra.mxu1 %v3970_v63  ;;  %1933 = vmatprep.mubr.f32.mxu1 %v6964_v25  ;;  %v1808_v42 = vld [vmem:[%s6945_s3 + $0x50] sm:$0xff]  ;;  %v1819_v16 = vld [vmem:[%s6945_s3 + $0xa8] sm:$0xff] }
 0x305   :  { %v5960_v1 = vmax.f32 %v1783_v12, 0.0  ;;  %v1776_v36 = vmax.f32 %v1760_v33, %v1768_v39  ;;  %v4287_v57 = vadd.f32 %v1620_v24, %v5809_v51  ;;  %3973 = vmatprep.subr.bf16.mxu1 %v3972_v2  ;;  %v3978_v35 = vpack.c.bf16 %v1808_v42, %v1806_v60  ;;  %v1814_v12 = vld [vmem:[%s6945_s3 + $0x80] sm:$0xff]  ;;  %v1816_v39 = vld [vmem:[%s6945_s3 + $0x90] sm:$0xff]  ;;  %v6968_v24 = vld [vmem:[#allocation5_spill] sm:$0xff] }
 0x306   :  { %v6969_v42 = vld [vmem:[#allocation6_spill] sm:$0xff]  ;;  %v3988_v44 = vpack.c.bf16 %v1821_v9, %v1819_v16  ;;  %v1744_v16 = vadd.f32 %v5838_v30, %v5850_v40  ;;  %v1745_v9 = vadd.f32 %v5838_v30, %v5854_v46 }
 0x307   :  { %v1784_v51 = vadd.f32 %v5838_v30, %v1776_v36  ;;  %v1769_v45 = vmax.f32 %v4286_v17, %v4287_v57  ;;  %v1624_v33 = vpop.f32.mrb[56].mxu0  ;;  %1934 = vmatmul.mubr.f32.gmra.mrb[50].mxu1 %v5960_v1  ;;  %v3986_v57 = vpack.c.bf16 %v1816_v39, %v1814_v12 }
 0x308   :  { %v4288_v0 = vadd.f32 %v1624_v33, %v5811_v52  ;;  %v1626_v5 = vpop.f32.mrb[57].mxu0  ;;  %1939 = vmatprep.mubr.f32.mxu1 %v6964_v25  ;;  %3975 = vmatpush1.bf16.msra.mxu1 %v3974_v41  ;;  %v1812_v52 = vld [vmem:[%s6945_s3 + $0x70] sm:$0xff]  ;;  %v1823_v33 = vld [vmem:[%s6945_s3 + $0xc8] sm:$0xff] }
 0x309   :  { %v5982_v14 = vmax.f32 %v1784_v51, 0.0  ;;  %v1777_v29 = vmax.f32 %v1761_v55, %v1769_v45  ;;  %v4289_v59 = vadd.f32 %v1626_v5, %v6965_v15  ;;  %3977 = vmatprep.subr.bf16.mxu1 %v3976_v28  ;;  %v3982_v54 = vpack.c.bf16 %v1812_v52, %v1810_v6  ;;  %v1818_v51 = vld [vmem:[%s6945_s3 + $0xa0] sm:$0xff]  ;;  %v1820_v45 = vld [vmem:[%s6945_s3 + $0xb0] sm:$0xff]  ;;  %v6970_v5 = vld [vmem:[#allocation7_spill] sm:$0xff] }
 0x30a   :  { %v3990_v15 = vpack.c.bf16 %v1820_v45, %v1818_v51  ;;  %v6971_v6 = vld [vmem:[#allocation8_spill] sm:$0xff]  ;;  %v3992_v20 = vpack.c.bf16 %v1825_v53, %v1823_v33  ;;  %v3459_v51 = vld [vmem:[%s6945_s3 + $0x248] sm:$0xff]  ;;  %v3461_v45 = vld [vmem:[%s6945_s3 + $0x258] sm:$0xff] }
 0x30b   :  { %v1785_v47 = vadd.f32 %v5838_v30, %v1777_v29  ;;  %v1770_v55 = vmax.f32 %v4288_v0, %v4289_v59  ;;  %v1630_v3 = vpop.f32.mrb[58].mxu0  ;;  %1940 = vmatmul.mubr.f32.gmra.mrb[52].mxu1 %v5982_v14  ;;  %v4008_v33 = vpack.c.bf16 %v3461_v45, %v3459_v51  ;;  %v3458_v53 = vld [vmem:[%s6945_s3 + $0x240] sm:$0xff]  ;;  %v3488_v51 = vld [vmem:[%s6945_s3 + $0x330] sm:$0xff]  ;;  %v3491_v45 = vld [vmem:[%s6945_s3 + $0x348] sm:$0xff] }
 0x30c   :  { %v4290_v63 = vadd.f32 %v1630_v3, %v6966_v43  ;;  %v1632_v50 = vpop.f32.mrb[59].mxu0  ;;  %1945 = vmatprep.mubr.f32.mxu1 %v6964_v25  ;;  %3979 = vmatpush1.bf16.msra.mxu1 %v3978_v35 }
 0x30d   :  { %v6004_v2 = vmax.f32 %v1785_v47, 0.0  ;;  %v1778_v7 = vmax.f32 %v1762_v19, %v1770_v55  ;;  %v4291_v38 = vadd.f32 %v1632_v50, %v6967_v56  ;;  %3981 = vmatprep.subr.bf16.mxu1 %v3980_v58  ;;  %v1824_v47 = vld [vmem:[%s6945_s3 + $0xd0] sm:$0xff]  ;;  %v1827_v55 = vld [vmem:[%s6945_s3 + $0xe8] sm:$0xff] }
 0x30e   :  { %v3994_v3 = vpack.c.bf16 %v1824_v47, %v1822_v13  ;;  %v3996_v50 = vpack.c.bf16 %v1829_v61, %v1827_v55  ;;  %v3451_v56 = vld [vmem:[%s6945_s3 + $0x208] sm:$0xff]  ;;  %v3466_v13 = vld [vmem:[%s6945_s3 + $0x280] sm:$0xff]  ;;  %v3468_v47 = vld [vmem:[%s6945_s3 + $0x290] sm:$0xff] }
 0x30f   :  { %v1786_v26 = vadd.f32 %v5838_v30, %v1778_v7  ;;  %v1771_v19 = vmax.f32 %v4290_v63, %v4291_v38  ;;  %v1636_v17 = vpop.f32.mrb[60].mxu0  ;;  %1946 = vmatmul.mubr.f32.gmra.mrb[54].mxu1 %v6004_v2  ;;  %v1828_v7 = vld [vmem:[%s6945_s3 + $0xf0] sm:$0xff]  ;;  %v3453_v38 = vld [vmem:[%s6945_s3 + $0x218] sm:$0xff]  ;;  %v3471_v55 = vld [vmem:[%s6945_s3 + $0x2a8] sm:$0xff] }
 0x310   :  { %v4292_v41 = vadd.f32 %v1636_v17, %v6968_v24  ;;  %v1638_v36 = vpop.f32.mrb[61].mxu0  ;;  %1951 = vmatprep.mubr.f32.mxu1 %v6964_v25  ;;  %3983 = vmatpush1.bf16.msra.mxu1 %v3982_v54  ;;  %v1826_v54 = vld [vmem:[%s6945_s3 + $0xe0] sm:$0xff]  ;;  %v4000_v12 = vpack.c.bf16 %v3453_v38, %v3451_v56  ;;  %v1747_v17 = vadd.f32 %v5838_v30, %v5862_v21  ;;  %v3473_v61 = vld [vmem:[%s6945_s3 + $0x2b8] sm:$0xff] }
 0x311   :  { %v6026_v28 = vmax.f32 %v1786_v26, 0.0  ;;  %v1779_v60 = vmax.f32 %v1763_v27, %v1771_v19  ;;  %v4293_v37 = vadd.f32 %v1638_v36, %v6969_v42  ;;  %3985 = vmatprep.subr.bf16.mxu1 %v3984_v8  ;;  %v3998_v48 = vpack.c.bf16 %v1828_v7, %v1826_v54  ;;  %v3452_v36 = vld [vmem:[%s6945_s3 + $0x210] sm:$0xff]  ;;  %v3477_v54 = vld [vmem:[%s6945_s3 + $0x2d8] sm:$0xff]  ;;  %v3474_v38 = vld [vmem:[%s6945_s3 + $0x2c0] sm:$0xff] }
 0x312   :  { %v6107_v26 = vmax.f32 %v1745_v9, 0.0  ;;  %v1746_v19 = vadd.f32 %v5838_v30, %v5858_v11  ;;  %v6119_v46 = vmax.f32 %v1747_v17, 0.0  ;;  %v1748_v24 = vadd.f32 %v5838_v30, %v5866_v23  ;;  %v3450_v23 = vld [vmem:[%s6945_s3 + $0x200] sm:$0xff]  ;;  %v3483_v17 = vld [vmem:[%s6945_s3 + $0x308] sm:$0xff] }
 0x313   :  { %v1787_v18 = vadd.f32 %v5838_v30, %v1779_v60  ;;  %v1772_v27 = vmax.f32 %v4292_v41, %v4293_v37  ;;  %v1642_v0 = vpop.f32.mrb[62].mxu0  ;;  %1952 = vmatmul.mubr.f32.gmra.mrb[56].mxu1 %v6026_v28  ;;  %v1749_v41 = vadd.f32 %v5838_v30, %v5870_v34  ;;  %v3457_v34 = vld [vmem:[%s6945_s3 + $0x238] sm:$0xff]  ;;  %v6150_v60 = vmax.f32 %v5843_v10, 0.0  ;;  %v3454_v37 = vld [vmem:[%s6945_s3 + $0x220] sm:$0xff] }
 0x314   :  { %v4294_v35 = vadd.f32 %v1642_v0, %v6970_v5  ;;  %v1644_v29 = vpop.f32.mrb[63].mxu0  ;;  %1957 = vmatprep.mubr.f32.mxu1 %v6964_v25  ;;  %3987 = vmatpush1.bf16.msra.mxu1 %v3986_v57  ;;  %v6113_v40 = vmax.f32 %v1746_v19, 0.0  ;;  %v6125_v11 = vmax.f32 %v1748_v24, 0.0  ;;  %v4002_v57 = vpack.c.bf16 %v3452_v36, %v3450_v23  ;;  %v3465_v0 = vld [vmem:[%s6945_s3 + $0x278] sm:$0xff]  ;;  %v3478_v9 = vld [vmem:[%s6945_s3 + $0x2e0] sm:$0xff]  ;;  %v3480_v19 = vld [vmem:[%s6945_s3 + $0x2f0] sm:$0xff] }
 0x315   :  { %v6048_v59 = vmax.f32 %v1787_v18, 0.0  ;;  %v1780_v58 = vmax.f32 %v1764_v32, %v1772_v27  ;;  %v4295_v52 = vadd.f32 %v1644_v29, %v6971_v6  ;;  %3989 = vmatprep.subr.bf16.mxu1 %v3988_v44  ;;  %v6131_v21 = vmax.f32 %v1749_v41, 0.0  ;;  %v3456_v44 = vld [vmem:[%s6945_s3 + $0x230] sm:$0xff]  ;;  %v3463_v27 = vld [vmem:[%s6945_s3 + $0x268] sm:$0xff]  ;;  %v3462_v29 = vld [vmem:[%s6945_s3 + $0x260] sm:$0xff] }
 0x316   :  { %v4006_v10 = vpack.c.bf16 %v3456_v44, %v3454_v37  ;;  %v3460_v18 = vld [vmem:[%s6945_s3 + $0x250] sm:$0xff]  ;;  %v3469_v6 = vld [vmem:[%s6945_s3 + $0x298] sm:$0xff]  ;;  %v4030_v41 = vpack.c.bf16 %v3480_v19, %v3478_v9  ;;  %v3482_v36 = vld [vmem:[%s6945_s3 + $0x300] sm:$0xff] }
 0x317   :  { %v1788_v31 = vadd.f32 %v5838_v30, %v1780_v58  ;;  %v1773_v32 = vmax.f32 %v4294_v35, %v4295_v52  ;;  %1958 = vmatmul.mubr.f32.gmra.mrb[58].mxu1 %v6048_v59  ;;  %v4010_v5 = vpack.c.bf16 %v3460_v18, %v3458_v53  ;;  %v4012_v35 = vpack.c.bf16 %v3465_v0, %v3463_v27  ;;  %v3467_v58 = vld [vmem:[%s6945_s3 + $0x288] sm:$0xff]  ;;  %v3485_v24 = vld [vmem:[%s6945_s3 + $0x318] sm:$0xff]  ;;  %v3486_v44 = vld [vmem:[%s6945_s3 + $0x320] sm:$0xff] }
 0x318   :  { %1961 = vmatprep.mubr.f32.mxu1 %v6964_v25  ;;  %3991 = vmatpush1.bf16.msra.mxu1 %v3990_v15  ;;  %v3464_v15 = vld [vmem:[%s6945_s3 + $0x270] sm:$0xff]  ;;  %v4032_v23 = vpack.c.bf16 %v3485_v24, %v3483_v17  ;;  %v3490_v18 = vld [vmem:[%s6945_s3 + $0x340] sm:$0xff]  ;;  %v3495_v0 = vld [vmem:[%s6945_s3 + $0x368] sm:$0xff] }
 0x319   :  { %v6069_v43 = vmax.f32 %v1788_v31, 0.0  ;;  %v1781_v63 = vmax.f32 %v1765_v49, %v1773_v32  ;;  %3993 = vmatprep.subr.bf16.mxu1 %v3992_v20  ;;  %v1743_v49 = vadd.f32 %v5838_v30, %v5846_v62  ;;  %v6101_v62 = vmax.f32 %v1744_v16, 0.0  ;;  %v3492_v27 = vld [vmem:[%s6945_s3 + $0x350] sm:$0xff]  ;;  %v3510_v19 = vld [vmem:[%s6945_s3 + $0x3e0] sm:$0xff]  ;;  %v3515_v24 = vld [vmem:[%s6945_s3 + $0x408] sm:$0xff] }
 0x31a   :  { %v4014_v52 = vpack.c.bf16 %v3464_v15, %v3462_v29  ;;  %v4016_v20 = vpack.c.bf16 %v3469_v6, %v3467_v58  ;;  %v4018_v31 = vpack.c.bf16 %v3468_v47, %v3466_v13  ;;  %v4020_v32 = vpack.c.bf16 %v3473_v61, %v3471_v55  ;;  %v3494_v15 = vld [vmem:[%s6945_s3 + $0x360] sm:$0xff]  ;;  %v3496_v58 = vld [vmem:[%s6945_s3 + $0x370] sm:$0xff]  ;;  %v3499_v6 = vld [vmem:[%s6945_s3 + $0x388] sm:$0xff] }
 0x31b   :  { %v1789_v22 = vadd.f32 %v5838_v30, %v1781_v63  ;;  %1962 = vmatmul.mubr.f32.gmra.mrb[60].mxu1 %v6069_v43  ;;  %v6095_v39 = vmax.f32 %v1743_v49, 0.0  ;;  %v3455_v30 = vld [vmem:[%s6945_s3 + $0x228] sm:$0xff]  ;;  %v3472_v63 = vld [vmem:[%s6945_s3 + $0x2b0] sm:$0xff]  ;;  %v3481_v49 = vld [vmem:[%s6945_s3 + $0x2f8] sm:$0xff] }
 0x31c   :  { %1965 = vmatprep.mubr.f32.mxu1 %v6964_v25  ;;  %3995 = vmatpush1.bf16.msra.mxu1 %v3994_v3  ;;  %v4004_v42 = vpack.c.bf16 %v3457_v34, %v3455_v30  ;;  %v3470_v3 = vld [vmem:[%s6945_s3 + $0x2a0] sm:$0xff]  ;;  %v3484_v30 = vld [vmem:[%s6945_s3 + $0x310] sm:$0xff]  ;;  %v3487_v34 = vld [vmem:[%s6945_s3 + $0x328] sm:$0xff] }
 0x31d   :  { %v6091_v8 = vmax.f32 %v1789_v22, 0.0  ;;  %3997 = vmatprep.subr.bf16.mxu1 %v3996_v50  ;;  %v3475_v50 = vld [vmem:[%s6945_s3 + $0x2c8] sm:$0xff]  ;;  %v4022_v7 = vpack.c.bf16 %v3472_v63, %v3470_v3  ;;  %v3476_v22 = vld [vmem:[%s6945_s3 + $0x2d0] sm:$0xff]  ;;  %v3498_v47 = vld [vmem:[%s6945_s3 + $0x380] sm:$0xff] }
 0x31e   :  { %v4024_v56 = vpack.c.bf16 %v3477_v54, %v3475_v50  ;;  %v3500_v55 = vld [vmem:[%s6945_s3 + $0x390] sm:$0xff]  ;;  %v3503_v61 = vld [vmem:[%s6945_s3 + $0x3a8] sm:$0xff]  ;;  %v3502_v63 = vld [vmem:[%s6945_s3 + $0x3a0] sm:$0xff] }
 0x31f   :  { %1966 = vmatmul.mubr.f32.gmra.mrb[62].mxu1 %v6091_v8  ;;  %v3504_v50 = vld [vmem:[%s6945_s3 + $0x3b0] sm:$0xff]  ;;  %v3507_v54 = vld [vmem:[%s6945_s3 + $0x3c8] sm:$0xff] }
 0x320   :  { %1969 = vmatprep.mubr.f32.mxu1 %v6964_v25  ;;  %3999 = vmatpush1.bf16.msra.mxu1 %v3998_v48  ;;  %v3479_v48 = vld [vmem:[%s6945_s3 + $0x2e8] sm:$0xff]  ;;  %v3512_v17 = vld [vmem:[%s6945_s3 + $0x3f0] sm:$0xff] }
 0x321   :  { %4001 = vmatprep.subr.bf16.mxu1 %v4000_v12  ;;  %v4026_v12 = vpack.c.bf16 %v3476_v22, %v3474_v38  ;;  %v4028_v16 = vpack.c.bf16 %v3481_v49, %v3479_v48  ;;  %v3506_v22 = vld [vmem:[%s6945_s3 + $0x3c0] sm:$0xff]  ;;  %v3508_v48 = vld [vmem:[%s6945_s3 + $0x3d0] sm:$0xff]  ;;  %v3511_v49 = vld [vmem:[%s6945_s3 + $0x3e8] sm:$0xff] }
 0x323   :  { %1970 = vmatmul.mubr.f32.gmra.mrb[64].mxu1 %v6095_v39 }
 0x324   :  { %1975 = vmatprep.mubr.f32.mxu1 %v6964_v25 }
 0x327   :  { %1976 = vmatmul.mubr.f32.gmra.mrb[66].mxu1 %v6101_v62 }
 0x328   :  { %1981 = vmatprep.mubr.f32.mxu1 %v6964_v25 }
 0x32b   :  { %1982 = vmatmul.mubr.f32.gmra.mrb[68].mxu1 %v6107_v26 }
 0x32c   :  { %1987 = vmatprep.mubr.f32.mxu1 %v6964_v25 }
 0x32f   :  { %1988 = vmatmul.mubr.f32.gmra.mrb[70].mxu1 %v6113_v40 }
 0x330   :  { %1993 = vmatprep.mubr.f32.mxu1 %v6964_v25 }
 0x333   :  { %1994 = vmatmul.mubr.f32.gmra.mrb[72].mxu1 %v6119_v46 }
 0x334   :  { %1999 = vmatprep.mubr.f32.mxu1 %v6964_v25 }
 0x337   :  { %2000 = vmatmul.mubr.f32.gmra.mrb[74].mxu1 %v6125_v11 }
 0x338   :  { %2003 = vmatprep.mubr.f32.mxu1 %v6964_v25 }
 0x33b   :  { %2004 = vmatmul.mubr.f32.gmra.mrb[76].mxu1 %v6131_v21 }
 0x33c   :  { %2007 = vmatprep.mubr.f32.mxu1 %v6964_v25 }
 0x33f   :  { %2008 = vmatmul.mubr.f32.gmra.mrb[78].mxu1 %v5941_v4 }
 0x340   :  { %2076 = vmatprep.mubr.f32.mxu1 %v6964_v25 }
 0x343   :  { %2077 = vmatmul.mubr.f32.vlgmr.msra.gmra.mrb[48].mxu1 %v6150_v60 }
 0x344   :  { %4003 = vmatpush1.bf16.msra.mxu1 %v4002_v57  ;;  %2082 = vmatprep.mubr.f32.mxu1 %v6964_v25  ;;  %v3489_v57 = vld [vmem:[%s6945_s3 + $0x338] sm:$0xff] }
 0x345   :  { %4005 = vmatprep.subr.bf16.mxu1 %v4004_v42  ;;  %v4034_v42 = vpack.c.bf16 %v3484_v30, %v3482_v36  ;;  %v4036_v37 = vpack.c.bf16 %v3489_v57, %v3487_v34  ;;  %v3514_v30 = vld [vmem:[%s6945_s3 + $0x400] sm:$0xff]  ;;  %v3516_v34 = vld [vmem:[%s6945_s3 + $0x410] sm:$0xff]  ;;  %v3519_v57 = vld [vmem:[%s6945_s3 + $0x428] sm:$0xff] }
 0x347   :  { %2083 = vmatmul.mubr.f32.gmra.mrb[50].mxu1 %v6095_v39 }
 0x348   :  { %2088 = vmatprep.mubr.f32.mxu1 %v6964_v25  ;;  %4007 = vmatpush1.bf16.msra.mxu1 %v4006_v10  ;;  %v3493_v10 = vld [vmem:[%s6945_s3 + $0x358] sm:$0xff] }
 0x349   :  { %4009 = vmatprep.subr.bf16.mxu1 %v4008_v33  ;;  %v4038_v33 = vpack.c.bf16 %v3488_v51, %v3486_v44  ;;  %v4040_v53 = vpack.c.bf16 %v3493_v10, %v3491_v45  ;;  %v3518_v51 = vld [vmem:[%s6945_s3 + $0x420] sm:$0xff]  ;;  %v3520_v45 = vld [vmem:[%s6945_s3 + $0x430] sm:$0xff]  ;;  %v3523_v10 = vld [vmem:[%s6945_s3 + $0x448] sm:$0xff] }
 0x34b   :  { %2089 = vmatmul.mubr.f32.gmra.mrb[52].mxu1 %v6101_v62 }
 0x34c   :  { %2094 = vmatprep.mubr.f32.mxu1 %v6964_v25  ;;  %4011 = vmatpush1.bf16.msra.mxu1 %v4010_v5  ;;  %v3497_v5 = vld [vmem:[%s6945_s3 + $0x378] sm:$0xff] }
 0x34d   :  { %4013 = vmatprep.subr.bf16.mxu1 %v4012_v35  ;;  %v4042_v35 = vpack.c.bf16 %v3492_v27, %v3490_v18  ;;  %v4044_v29 = vpack.c.bf16 %v3497_v5, %v3495_v0  ;;  %v3522_v27 = vld [vmem:[%s6945_s3 + $0x440] sm:$0xff]  ;;  %v3524_v0 = vld [vmem:[%s6945_s3 + $0x450] sm:$0xff]  ;;  %v3527_v5 = vld [vmem:[%s6945_s3 + $0x468] sm:$0xff] }
 0x34f   :  { %2095 = vmatmul.mubr.f32.gmra.mrb[54].mxu1 %v6107_v26 }
 0x350   :  { %2100 = vmatprep.mubr.f32.mxu1 %v6964_v25  ;;  %4015 = vmatpush1.bf16.msra.mxu1 %v4014_v52  ;;  %v3501_v52 = vld [vmem:[%s6945_s3 + $0x398] sm:$0xff] }
 0x351   :  { %4017 = vmatprep.subr.bf16.mxu1 %v4016_v20  ;;  %v4046_v20 = vpack.c.bf16 %v3496_v58, %v3494_v15  ;;  %v4048_v13 = vpack.c.bf16 %v3501_v52, %v3499_v6  ;;  %v3526_v58 = vld [vmem:[%s6945_s3 + $0x460] sm:$0xff]  ;;  %v3528_v6 = vld [vmem:[%s6945_s3 + $0x470] sm:$0xff]  ;;  %v3531_v52 = vld [vmem:[%s6945_s3 + $0x488] sm:$0xff] }
 0x353   :  { %2101 = vmatmul.mubr.f32.gmra.mrb[56].mxu1 %v6113_v40 }
 0x354   :  { %2106 = vmatprep.mubr.f32.mxu1 %v6964_v25  ;;  %4019 = vmatpush1.bf16.msra.mxu1 %v4018_v31  ;;  %v3505_v31 = vld [vmem:[%s6945_s3 + $0x3b8] sm:$0xff] }
 0x355   :  { %4021 = vmatprep.subr.bf16.mxu1 %v4020_v32  ;;  %v4050_v32 = vpack.c.bf16 %v3500_v55, %v3498_v47  ;;  %v4052_v3 = vpack.c.bf16 %v3505_v31, %v3503_v61  ;;  %v3530_v55 = vld [vmem:[%s6945_s3 + $0x480] sm:$0xff]  ;;  %v3532_v61 = vld [vmem:[%s6945_s3 + $0x490] sm:$0xff]  ;;  %v3535_v31 = vld [vmem:[%s6945_s3 + $0x4a8] sm:$0xff] }
 0x357   :  { %2107 = vmatmul.mubr.f32.gmra.mrb[80].mxu1 %v6119_v46 }
 0x358   :  { %2110 = vmatprep.mubr.f32.mxu1 %v6964_v25  ;;  %4023 = vmatpush1.bf16.msra.mxu1 %v4022_v7  ;;  %v3509_v7 = vld [vmem:[%s6945_s3 + $0x3d8] sm:$0xff] }
 0x359   :  { %4025 = vmatprep.subr.bf16.mxu1 %v4024_v56  ;;  %v4054_v56 = vpack.c.bf16 %v3504_v50, %v3502_v63  ;;  %v4056_v38 = vpack.c.bf16 %v3509_v7, %v3507_v54  ;;  %v3534_v50 = vld [vmem:[%s6945_s3 + $0x4a0] sm:$0xff]  ;;  %v3536_v54 = vld [vmem:[%s6945_s3 + $0x4b0] sm:$0xff]  ;;  %v3539_v7 = vld [vmem:[%s6945_s3 + $0x4c8] sm:$0xff] }
 0x35b   :  { %2111 = vmatmul.mubr.f32.gmra.mrb[82].mxu1 %v6125_v11 }
 0x35c   :  { %2114 = vmatprep.mubr.f32.mxu1 %v6964_v25  ;;  %4027 = vmatpush1.bf16.msra.mxu1 %v4026_v12  ;;  %v3513_v12 = vld [vmem:[%s6945_s3 + $0x3f8] sm:$0xff] }
 0x35d   :  { %4029 = vmatprep.subr.bf16.mxu1 %v4028_v16  ;;  %v4058_v16 = vpack.c.bf16 %v3508_v48, %v3506_v22  ;;  %v4060_v9 = vpack.c.bf16 %v3513_v12, %v3511_v49  ;;  %v3538_v48 = vld [vmem:[%s6945_s3 + $0x4c0] sm:$0xff]  ;;  %v3540_v49 = vld [vmem:[%s6945_s3 + $0x4d0] sm:$0xff]  ;;  %v3543_v12 = vld [vmem:[%s6945_s3 + $0x4e8] sm:$0xff] }
 0x35f   :  { %2115 = vmatmul.mubr.f32.gmra.mrb[84].mxu1 %v6131_v21 }
 0x360   :  { %2118 = vmatprep.mubr.f32.mxu1 %v6964_v25  ;;  %4031 = vmatpush1.bf16.msra.mxu1 %v4030_v41  ;;  %v3517_v41 = vld [vmem:[%s6945_s3 + $0x418] sm:$0xff] }
 0x361   :  { %4033 = vmatprep.subr.bf16.mxu1 %v4032_v23  ;;  %v4062_v23 = vpack.c.bf16 %v3512_v17, %v3510_v19  ;;  %v4064_v36 = vpack.c.bf16 %v3517_v41, %v3515_v24  ;;  %v3542_v17 = vld [vmem:[%s6945_s3 + $0x4e0] sm:$0xff]  ;;  %v3544_v24 = vld [vmem:[%s6945_s3 + $0x4f0] sm:$0xff] }
 0x362   :  { %v4094_v41 = vpack.c.bf16 %v3544_v24, %v3542_v17  ;;  %v2809_v17 = vld [vmem:[%s6947_s5 + $0x50] sm:$0xff]  ;;  %v2810_v24 = vld [vmem:[%s6947_s5 + $0x58] sm:$0xff] }
 0x363   :  { %2119 = vmatmul.mubr.f32.gmra.mrb[64].mxu1 %v5941_v4 }
 0x364   :  { %2124 = vmatprep.mubr.f32.mxu1 %v6964_v25 }
 0x367   :  { %2125 = vmatmul.mubr.f32.gmra.mrb[66].mxu1 %v5960_v1 }
 0x368   :  { %2130 = vmatprep.mubr.f32.mxu1 %v6964_v25 }
 0x36b   :  { %2131 = vmatmul.mubr.f32.gmra.mrb[68].mxu1 %v5982_v14 }
 0x36c   :  { %2136 = vmatprep.mubr.f32.mxu1 %v6964_v25 }
 0x36f   :  { %2137 = vmatmul.mubr.f32.gmra.mrb[70].mxu1 %v6004_v2 }
 0x370   :  { %2142 = vmatprep.mubr.f32.mxu1 %v6964_v25 }
 0x373   :  { %2143 = vmatmul.mubr.f32.gmra.mrb[72].mxu1 %v6026_v28 }
 0x374   :  { %2148 = vmatprep.mubr.f32.mxu1 %v6964_v25 }
 0x377   :  { %2149 = vmatmul.mubr.f32.gmra.mrb[86].mxu1 %v6048_v59 }
 0x378   :  { %2152 = vmatprep.mubr.f32.mxu1 %v6964_v25 }
 0x37b   :  { %2153 = vmatmul.mubr.f32.gmra.mrb[88].mxu1 %v6069_v43 }
 0x37c   :  { %2156 = vmatprep.mubr.f32.mxu1 %v6964_v25 }
 0x37f   :  { %2157 = vmatmul.mubr.f32.gmra.mrb[90].mxu1 %v6091_v8 }
 0x380   :  { %2258 = vmatprep.mubr.f32.mxu1 %v6964_v25 }
 0x383   :  { %2259 = vmatmul.mubr.f32.vlgmr.msra.gmra.mrb[48].mxu1 %v6095_v39 }
 0x384   :  { %4035 = vmatpush1.bf16.msra.mxu1 %v4034_v42  ;;  %2264 = vmatprep.mubr.f32.mxu1 %v6964_v25  ;;  %v3521_v42 = vld [vmem:[%s6945_s3 + $0x438] sm:$0xff] }
 0x385   :  { %4037 = vmatprep.subr.bf16.mxu1 %v4036_v37  ;;  %v4066_v37 = vpack.c.bf16 %v3516_v34, %v3514_v30  ;;  %v4068_v44 = vpack.c.bf16 %v3521_v42, %v3519_v57 }
 0x387   :  { %2265 = vmatmul.mubr.f32.gmra.mrb[50].mxu1 %v6101_v62 }
 0x388   :  { %2270 = vmatprep.mubr.f32.mxu1 %v6964_v25  ;;  %4039 = vmatpush1.bf16.msra.mxu1 %v4038_v33  ;;  %v3525_v33 = vld [vmem:[%s6945_s3 + $0x458] sm:$0xff] }
 0x389   :  { %4041 = vmatprep.subr.bf16.mxu1 %v4040_v53  ;;  %v4070_v53 = vpack.c.bf16 %v3520_v45, %v3518_v51  ;;  %v4072_v18 = vpack.c.bf16 %v3525_v33, %v3523_v10 }
 0x38b   :  { %2271 = vmatmul.mubr.f32.gmra.mrb[52].mxu1 %v6107_v26 }
 0x38c   :  { %2276 = vmatprep.mubr.f32.mxu1 %v6964_v25  ;;  %4043 = vmatpush1.bf16.msra.mxu1 %v4042_v35  ;;  %v3529_v35 = vld [vmem:[%s6945_s3 + $0x478] sm:$0xff] }
 0x38d   :  { %4045 = vmatprep.subr.bf16.mxu1 %v4044_v29  ;;  %v4074_v29 = vpack.c.bf16 %v3524_v0, %v3522_v27  ;;  %v4076_v15 = vpack.c.bf16 %v3529_v35, %v3527_v5 }
 0x38f   :  { %2277 = vmatmul.mubr.f32.gmra.mrb[54].mxu1 %v6113_v40 }
 0x390   :  { %2282 = vmatprep.mubr.f32.mxu1 %v6964_v25  ;;  %4047 = vmatpush1.bf16.msra.mxu1 %v4046_v20  ;;  %v3533_v20 = vld [vmem:[%s6945_s3 + $0x498] sm:$0xff] }
 0x391   :  { %4049 = vmatprep.subr.bf16.mxu1 %v4048_v13  ;;  %v4078_v13 = vpack.c.bf16 %v3528_v6, %v3526_v58  ;;  %v4080_v47 = vpack.c.bf16 %v3533_v20, %v3531_v52  ;;  %v2819_v58 = vld [vmem:[%s6947_s5 + $0xa0] sm:$0xff]  ;;  %v2820_v6 = vld [vmem:[%s6947_s5 + $0xa8] sm:$0xff] }
 0x392   :  { %v4104_v52 = vpack.c.bf16 %v2820_v6, %v2819_v58  ;;  %v2803_v20 = vld [vmem:[%s6947_s5 + $0x20] sm:$0xff] }
 0x393   :  { %2283 = vmatmul.mubr.f32.gmra.mrb[56].mxu1 %v6119_v46 }
 0x394   :  { %2288 = vmatprep.mubr.f32.mxu1 %v6964_v25  ;;  %4051 = vmatpush1.bf16.msra.mxu1 %v4050_v32  ;;  %v3537_v32 = vld [vmem:[%s6945_s3 + $0x4b8] sm:$0xff] }
 0x395   :  { %4053 = vmatprep.subr.bf16.mxu1 %v4052_v3  ;;  %v4082_v3 = vpack.c.bf16 %v3532_v61, %v3530_v55  ;;  %v4084_v63 = vpack.c.bf16 %v3537_v32, %v3535_v31  ;;  %v2821_v55 = vld [vmem:[%s6947_s5 + $0xb0] sm:$0xff]  ;;  %v2822_v61 = vld [vmem:[%s6947_s5 + $0xb8] sm:$0xff] }
 0x396   :  { %v4108_v31 = vpack.c.bf16 %v2822_v61, %v2821_v55  ;;  %v2805_v32 = vld [vmem:[%s6947_s5 + $0x30] sm:$0xff] }
 0x397   :  { %2289 = vmatmul.mubr.f32.gmra.mrb[92].mxu1 %v6125_v11 }
 0x398   :  { %2292 = vmatprep.mubr.f32.mxu1 %v6964_v25  ;;  %4055 = vmatpush1.bf16.msra.mxu1 %v4054_v56  ;;  %v3541_v56 = vld [vmem:[%s6945_s3 + $0x4d8] sm:$0xff] }
 0x399   :  { %4057 = vmatprep.subr.bf16.mxu1 %v4056_v38  ;;  %v4086_v38 = vpack.c.bf16 %v3536_v54, %v3534_v50  ;;  %v4088_v22 = vpack.c.bf16 %v3541_v56, %v3539_v7  ;;  %v2823_v50 = vld [vmem:[%s6947_s5 + $0xc0] sm:$0xff]  ;;  %v2824_v54 = vld [vmem:[%s6947_s5 + $0xc8] sm:$0xff] }
 0x39a   :  { %v4112_v7 = vpack.c.bf16 %v2824_v54, %v2823_v50  ;;  %v2807_v56 = vld [vmem:[%s6947_s5 + $0x40] sm:$0xff] }
 0x39b   :  { %2293 = vmatmul.mubr.f32.gmra.mrb[94].mxu1 %v6131_v21 }
 0x39c   :  { %2296 = vmatprep.mubr.f32.mxu1 %v6964_v25  ;;  %4059 = vmatpush1.bf16.msra.mxu1 %v4058_v16  ;;  %v3545_v16 = vld [vmem:[%s6945_s3 + $0x4f8] sm:$0xff] }
 0x39d   :  { %4061 = vmatprep.subr.bf16.mxu1 %v4060_v9  ;;  %v4090_v9 = vpack.c.bf16 %v3540_v49, %v3538_v48  ;;  %v4092_v19 = vpack.c.bf16 %v3545_v16, %v3543_v12  ;;  %v2825_v12 = vld [vmem:[%s6947_s5 + $0xd0] sm:$0xff]  ;;  %v2826_v16 = vld [vmem:[%s6947_s5 + $0xd8] sm:$0xff] }
 0x39f   :  { %2297 = vmatmul.mubr.f32.gmra.mrb[96].mxu1 %v5941_v4 }
 0x3a0   :  { %2300 = vmatprep.mubr.f32.mxu1 %v6964_v25  ;;  %4063 = vmatpush1.bf16.msra.mxu1 %v4062_v23 }
 0x3a1   :  { %4065 = vmatprep.subr.bf16.mxu1 %v4064_v36 }
 0x3a3   :  { %2301 = vmatmul.mubr.f32.gmra.mrb[64].mxu1 %v5960_v1 }
 0x3a4   :  { %2306 = vmatprep.mubr.f32.mxu1 %v6964_v25 }
 0x3a7   :  { %2307 = vmatmul.mubr.f32.gmra.mrb[66].mxu1 %v5982_v14 }
 0x3a8   :  { %2312 = vmatprep.mubr.f32.mxu1 %v6964_v25 }
 0x3ab   :  { %2313 = vmatmul.mubr.f32.gmra.mrb[68].mxu1 %v6004_v2 }
 0x3ac   :  { %2318 = vmatprep.mubr.f32.mxu1 %v6964_v25 }
 0x3af   :  { %2319 = vmatmul.mubr.f32.gmra.mrb[70].mxu1 %v6026_v28 }
 0x3b0   :  { %2324 = vmatprep.mubr.f32.mxu1 %v6964_v25 }
 0x3b3   :  { %2325 = vmatmul.mubr.f32.gmra.mrb[72].mxu1 %v6048_v59 }
 0x3b4   :  { %2330 = vmatprep.mubr.f32.mxu1 %v6964_v25 }
 0x3b7   :  { %2331 = vmatmul.mubr.f32.gmra.mrb[98].mxu1 %v6069_v43 }
 0x3b8   :  { %2334 = vmatprep.mubr.f32.mxu1 %v6964_v25 }
 0x3bb   :  { %2335 = vmatmul.mubr.f32.gmra.mrb[100].mxu1 %v6091_v8 }
 0x3bc   :  { %2338 = vmatprep.mubr.f32.mxu1 %v6964_v25 }
 0x3bf   :  { %2339 = vmatmul.mubr.f32.gmra.mrb[102].mxu1 %v6150_v60 }
 0x3c0   :  { %2460 = vmatprep.mubr.f32.mxu1 %v6964_v25 }
 0x3c3   :  { %2461 = vmatmul.mubr.f32.vlgmr.msra.gmra.mrb[48].mxu1 %v5960_v1 }
 0x3c4   :  { %4067 = vmatpush1.bf16.msra.mxu1 %v4066_v37  ;;  %2466 = vmatprep.mubr.f32.mxu1 %v6964_v25 }
 0x3c5   :  { %4069 = vmatprep.subr.bf16.mxu1 %v4068_v44 }
 0x3c7   :  { %2467 = vmatmul.mubr.f32.gmra.mrb[50].mxu1 %v5982_v14 }
 0x3c8   :  { %2472 = vmatprep.mubr.f32.mxu1 %v6964_v25  ;;  %4071 = vmatpush1.bf16.msra.mxu1 %v4070_v53 }
 0x3c9   :  { %4073 = vmatprep.subr.bf16.mxu1 %v4072_v18  ;;  %v2817_v18 = vld [vmem:[%s6947_s5 + $0x90] sm:$0xff] }
 0x3cb   :  { %2473 = vmatmul.mubr.f32.gmra.mrb[52].mxu1 %v6004_v2 }
 0x3cc   :  { %2478 = vmatprep.mubr.f32.mxu1 %v6964_v25  ;;  %4075 = vmatpush1.bf16.msra.mxu1 %v4074_v29 }
 0x3cd   :  { %4077 = vmatprep.subr.bf16.mxu1 %v4076_v15 }
 0x3cf   :  { %2479 = vmatmul.mubr.f32.gmra.mrb[54].mxu1 %v6026_v28 }
 0x3d0   :  { %2484 = vmatprep.mubr.f32.mxu1 %v6964_v25  ;;  %4079 = vmatpush1.bf16.msra.mxu1 %v4078_v13  ;;  %v2804_v13 = vld [vmem:[%s6947_s5 + $0x28] sm:$0xff] }
 0x3d1   :  { %4081 = vmatprep.subr.bf16.mxu1 %v4080_v47  ;;  %v4106_v47 = vpack.c.bf16 %v2804_v13, %v2803_v20 }
 0x3d3   :  { %2485 = vmatmul.mubr.f32.gmra.mrb[56].mxu1 %v6048_v59 }
 0x3d4   :  { %2490 = vmatprep.mubr.f32.mxu1 %v6964_v25  ;;  %4083 = vmatpush1.bf16.msra.mxu1 %v4082_v3  ;;  %v2806_v3 = vld [vmem:[%s6947_s5 + $0x38] sm:$0xff] }
 0x3d5   :  { %4085 = vmatprep.subr.bf16.mxu1 %v4084_v63  ;;  %v4110_v63 = vpack.c.bf16 %v2806_v3, %v2805_v32 }
 0x3d7   :  { %2491 = vmatmul.mubr.f32.gmra.mrb[104].mxu1 %v6069_v43 }
 0x3d8   :  { %2494 = vmatprep.mubr.f32.mxu1 %v6964_v25  ;;  %4087 = vmatpush1.bf16.msra.mxu1 %v4086_v38  ;;  %v2808_v38 = vld [vmem:[%s6947_s5 + $0x48] sm:$0xff] }
 0x3d9   :  { %4089 = vmatprep.subr.bf16.mxu1 %v4088_v22  ;;  %v4114_v22 = vpack.c.bf16 %v2808_v38, %v2807_v56 }
 0x3db   :  { %2495 = vmatmul.mubr.f32.gmra.mrb[106].mxu1 %v6091_v8 }
 0x3dc   :  { %2498 = vmatprep.mubr.f32.mxu1 %v6964_v25  ;;  %4091 = vmatpush1.bf16.msra.mxu1 %v4090_v9  ;;  %v4116_v9 = vpack.c.bf16 %v2826_v16, %v2825_v12 }
 0x3dd   :  { %4093 = vmatprep.subr.bf16.mxu1 %v4092_v19 }
 0x3df   :  { %2499 = vmatmul.mubr.f32.gmra.mrb[108].mxu1 %v6150_v60 }
 0x3e0   :  { %2502 = vmatprep.mubr.f32.mxu1 %v6964_v25  ;;  %4095 = vmatpush1.bf16.msra.mxu1 %v4094_v41 }
 0x3e3   :  { %2503 = vmatmul.mubr.f32.gmra.mrb[64].mxu1 %v6101_v62 }
 0x3e4   :  { %2508 = vmatprep.mubr.f32.mxu1 %v6964_v25 }
 0x3e7   :  { %2509 = vmatmul.mubr.f32.gmra.mrb[66].mxu1 %v6107_v26 }
 0x3e8   :  { %2514 = vmatprep.mubr.f32.mxu1 %v6964_v25 }
 0x3ea   :  { %v1959_v23 = vpop.f32.mrb[58].mxu1 }
 0x3eb   :  { %v1960_v36 = vpop.f32.mrb[59].mxu1  ;;  %2515 = vmatmul.mubr.f32.gmra.mrb[68].mxu1 %v6113_v40  ;;  %v4118_v23 = vpack.c.bf16 %v2810_v24, %v2809_v17 }
 0x3ec   :  { %2520 = vmatprep.mubr.f32.mxu1 %v6964_v25 }
 0x3ee   :  { %v1963_v30 = vpop.f32.mrb[60].mxu1 }
 0x3ef   :  { %v1964_v34 = vpop.f32.mrb[61].mxu1  ;;  %2521 = vmatmul.mubr.f32.gmra.mrb[70].mxu1 %v6119_v46 }
 0x3f0   :  { %2526 = vmatprep.mubr.f32.mxu1 %v6964_v25  ;;  %v2827_v34 = vld [vmem:[%s6947_s5 + $0xe0] sm:$0xff] }
 0x3f2   :  { %v1967_v57 = vpop.f32.mrb[62].mxu1 }
 0x3f3   :  { %v1968_v42 = vpop.f32.mrb[63].mxu1  ;;  %2527 = vmatmul.mubr.f32.gmra.mrb[72].mxu1 %v6125_v11  ;;  %v2828_v57 = vld [vmem:[%s6947_s5 + $0xe8] sm:$0xff] }
 0x3f4   :  { %2532 = vmatprep.mubr.f32.mxu1 %v6964_v25  ;;  %v4120_v42 = vpack.c.bf16 %v2828_v57, %v2827_v34 }
 0x3f7   :  { %2533 = vmatmul.mubr.f32.gmra.mrb[110].mxu1 %v6131_v21 }
 0x3f8   :  { %2536 = vmatprep.mubr.f32.mxu1 %v6964_v25 }
 0x3fb   :  { %2537 = vmatmul.mubr.f32.gmra.mrb[112].mxu1 %v5941_v4 }
 0x3fc   :  { %2540 = vmatprep.mubr.f32.mxu1 %v6964_v25 }
 0x3ff   :  { %2541 = vmatmul.mubr.f32.gmra.mrb[114].mxu1 %v5960_v1 }
 0x400   :  { %2662 = vmatprep.mubr.f32.mxu1 %v6964_v25 }
 0x403   :  { %2663 = vmatmul.mubr.f32.vlgmr.msra.gmra.mrb[48].mxu1 %v6101_v62 }
 0x404   :  { %2668 = vmatprep.mubr.f32.mxu1 %v6964_v25 }
 0x407   :  { %2669 = vmatmul.mubr.f32.gmra.mrb[50].mxu1 %v6107_v26 }
 0x408   :  { %2674 = vmatprep.mubr.f32.mxu1 %v6964_v25 }
 0x40a   :  { %v2001_v37 = vpop.f32.mrb[74].mxu1 }
 0x40b   :  { %v2002_v44 = vpop.f32.mrb[75].mxu1  ;;  %2675 = vmatmul.mubr.f32.gmra.mrb[52].mxu1 %v6113_v40  ;;  %v2811_v37 = vld [vmem:[%s6947_s5 + $0x60] sm:$0xff] }
 0x40c   :  { %2680 = vmatprep.mubr.f32.mxu1 %v6964_v25  ;;  %v2812_v44 = vld [vmem:[%s6947_s5 + $0x68] sm:$0xff] }
 0x40e   :  { %v2005_v51 = vpop.f32.mrb[76].mxu1 }
 0x40f   :  { %v2006_v45 = vpop.f32.mrb[77].mxu1  ;;  %2681 = vmatmul.mubr.f32.gmra.mrb[54].mxu1 %v6119_v46  ;;  %v4122_v51 = vpack.c.bf16 %v2812_v44, %v2811_v37  ;;  %v2831_v37 = vld [vmem:[%s6947_s5 + $0x100] sm:$0xff]  ;;  %v2832_v44 = vld [vmem:[%s6947_s5 + $0x108] sm:$0xff] }
 0x410   :  { %2686 = vmatprep.mubr.f32.mxu1 %v6964_v25  ;;  %v2829_v45 = vld [vmem:[%s6947_s5 + $0xf0] sm:$0xff] }
 0x412   :  { %v2009_v10 = vpop.f32.mrb[78].mxu1 }
 0x413   :  { %v2010_v62 = vpop.f32.mrb[79].mxu1  ;;  %2687 = vmatmul.mubr.f32.gmra.mrb[56].mxu1 %v6125_v11  ;;  %v2830_v10 = vld [vmem:[%s6947_s5 + $0xf8] sm:$0xff] }
 0x414   :  { %2692 = vmatprep.mubr.f32.mxu1 %v6964_v25  ;;  %v4124_v62 = vpack.c.bf16 %v2830_v10, %v2829_v45  ;;  %v2849_v10 = vld [vmem:[%s6947_s5 + $0x190] sm:$0xff] }
 0x417   :  { %2693 = vmatmul.mubr.f32.gmra.mrb[116].mxu1 %v6131_v21  ;;  %v2800_v21 = vld [vmem:[%s6947_s5 + $0x8] sm:$0xff] }
 0x418   :  { %2696 = vmatprep.mubr.f32.mxu1 %v6964_v25 }
 0x41b   :  { %2697 = vmatmul.mubr.f32.gmra.mrb[118].mxu1 %v5941_v4 }
 0x41c   :  { %2700 = vmatprep.mubr.f32.mxu1 %v6964_v25 }
 0x41f   :  { %2701 = vmatmul.mubr.f32.gmra.mrb[120].mxu1 %v5960_v1 }
 0x420   :  { %2704 = vmatprep.mubr.f32.mxu1 %v6964_v25 }
 0x423   :  { %2705 = vmatmul.mubr.f32.gmra.mrb[64].mxu1 %v5982_v14 }
 0x424   :  { %2710 = vmatprep.mubr.f32.mxu1 %v6964_v25 }
 0x427   :  { %2711 = vmatmul.mubr.f32.gmra.mrb[66].mxu1 %v6004_v2  ;;  %v2815_v2 = vld [vmem:[%s6947_s5 + $0x80] sm:$0xff] }
 0x428   :  { %2716 = vmatprep.mubr.f32.mxu1 %v6964_v25 }
 0x42a   :  { %v2108_v26 = vpop.f32.mrb[80].mxu1 }
 0x42b   :  { %v2109_v40 = vpop.f32.mrb[81].mxu1  ;;  %2717 = vmatmul.mubr.f32.gmra.mrb[68].mxu1 %v6026_v28  ;;  %v2816_v28 = vld [vmem:[%s6947_s5 + $0x88] sm:$0xff]  ;;  %v2813_v26 = vld [vmem:[%s6947_s5 + $0x70] sm:$0xff] }
 0x42c   :  { %2722 = vmatprep.mubr.f32.mxu1 %v6964_v25  ;;  %v4096_v11 = vpack.c.bf16 %v2816_v28, %v2815_v2  ;;  %v2814_v40 = vld [vmem:[%s6947_s5 + $0x78] sm:$0xff] }
 0x42e   :  { %v2112_v4 = vpop.f32.mrb[82].mxu1  ;;  %4097 = vmatprep.subr.bf16.mxu1 %v4096_v11 }
 0x42f   :  { %v2113_v46 = vpop.f32.mrb[83].mxu1  ;;  %2723 = vmatmul.mubr.f32.gmra.mrb[70].mxu1 %v6048_v59  ;;  %v2799_v59 = vld [vmem:[%s6947_s5] sm:$0xff]  ;;  %v4126_v4 = vpack.c.bf16 %v2814_v40, %v2813_v26 }
 0x430   :  { %2728 = vmatprep.mubr.f32.mxu1 %v6964_v25  ;;  %v2847_v46 = vld [vmem:[%s6947_s5 + $0x180] sm:$0xff] }
 0x432   :  { %v2116_v1 = vpop.f32.mrb[84].mxu1 }
 0x433   :  { %v2117_v14 = vpop.f32.mrb[85].mxu1  ;;  %2729 = vmatmul.mubr.f32.gmra.mrb[72].mxu1 %v6069_v43  ;;  %v4098_v43 = vpack.c.bf16 %v2800_v21, %v2799_v59  ;;  %v2848_v1 = vld [vmem:[%s6947_s5 + $0x188] sm:$0xff] }
 0x434   :  { %2734 = vmatprep.mubr.f32.mxu1 %v6964_v25  ;;  %v4128_v14 = vpack.c.bf16 %v2848_v1, %v2847_v46  ;;  %v4130_v46 = vpack.c.bf16 %v2832_v44, %v2831_v37 }
 0x435   :  { %4099 = vmatpush3.bf16.msra.mxu1 %v4098_v43 }
 0x437   :  { %2735 = vmatmul.mubr.f32.gmra.mrb[122].mxu1 %v6091_v8  ;;  %v2818_v8 = vld [vmem:[%s6947_s5 + $0x98] sm:$0xff] }
 0x438   :  { %2738 = vmatprep.mubr.f32.mxu1 %v6964_v25  ;;  %v4100_v27 = vpack.c.bf16 %v2818_v8, %v2817_v18 }
 0x43a   :  { %4101 = vmatprep.subr.bf16.mxu1 %v4100_v27 }
 0x43b   :  { %2739 = vmatmul.mubr.f32.gmra.mrb[124].mxu1 %v6150_v60  ;;  %v2801_v60 = vld [vmem:[%s6947_s5 + $0x10] sm:$0xff] }
 0x43c   :  { %2742 = vmatprep.mubr.f32.mxu1 %v6964_v25 }
 0x43f   :  { %2743 = vmatmul.mubr.f32.gmra.mrb[126].mxu1 %v6095_v39  ;;  %v2802_v39 = vld [vmem:[%s6947_s5 + $0x18] sm:$0xff] }
 0x440   :  { %v4102_v35 = vpack.c.bf16 %v2802_v39, %v2801_v60 }
 0x442   :  { %4103 = vmatpush3.bf16.msra.mxu1 %v4102_v35 }
 0x443   :  { %4105 = vmatprep.subr.bf16.mxu1 %v4104_v52 }
 0x446   :  { %4107 = vmatpush3.bf16.msra.mxu1 %v4106_v47 }
 0x447   :  { %4109 = vmatprep.subr.bf16.mxu1 %v4108_v31 }
 0x44a   :  { %v2150_v33 = vpop.f32.mrb[86].mxu1  ;;  %4111 = vmatpush3.bf16.msra.mxu1 %v4110_v63 }
 0x44b   :  { %v2151_v53 = vpop.f32.mrb[87].mxu1  ;;  %4113 = vmatprep.subr.bf16.mxu1 %v4112_v7 }
 0x44e   :  { %v2154_v0 = vpop.f32.mrb[88].mxu1  ;;  %4115 = vmatpush3.bf16.msra.mxu1 %v4114_v22 }
 0x44f   :  { %v2155_v5 = vpop.f32.mrb[89].mxu1  ;;  %4117 = vmatprep.subr.bf16.mxu1 %v4116_v9 }
 0x452   :  { %v2158_v29 = vpop.f32.mrb[90].mxu1  ;;  %4119 = vmatpush3.bf16.msra.mxu1 %v4118_v23  ;;  %v6654_v23 = vld [vmem:[%s6948_s4] ss:$0 sm:$0xff] }
 0x453   :  { %v2159_v15 = vpop.f32.mrb[91].mxu1  ;;  %4121 = vmatprep.subr.bf16.mxu1 %v4120_v42 }
 0x456   :  { %4123 = vmatpush3.bf16.msra.mxu1 %v4122_v51 }
 0x457   :  { %4125 = vmatprep.subr.bf16.mxu1 %v4124_v62  ;;  %v2850_v62 = vld [vmem:[%s6947_s5 + $0x198] sm:$0xff] }
 0x45a   :  { %4127 = vmatpush3.bf16.msra.mxu1 %v4126_v4 }
 0x45b   :  { %4129 = vmatprep.subr.bf16.mxu1 %v4128_v14 }
 0x46a   :  { %v2290_v48 = vpop.f32.mrb[92].mxu1 }
 0x46b   :  { %v2291_v49 = vpop.f32.mrb[93].mxu1 }
 0x46e   :  { %v2294_v19 = vpop.f32.mrb[94].mxu1 }
 0x46f   :  { %v2295_v41 = vpop.f32.mrb[95].mxu1 }
 0x472   :  { %v2298_v36 = vpop.f32.mrb[96].mxu1 }
 0x473   :  { %v2299_v30 = vpop.f32.mrb[97].mxu1 }
 0x48a   :  { %v2332_v2 = vpop.f32.mrb[98].mxu1 }
 0x48b   :  { %v2333_v28 = vpop.f32.mrb[99].mxu1  ;;  %v4132_v2 = vpack.c.bf16 %v2850_v62, %v2849_v10 }
 0x48c   :  { %v2833_v28 = vld [vmem:[%s6947_s5 + $0x110] sm:$0xff] }
 0x48e   :  { %v2336_v59 = vpop.f32.mrb[100].mxu1 }
 0x48f   :  { %v2337_v11 = vpop.f32.mrb[101].mxu1  ;;  %v2834_v59 = vld [vmem:[%s6947_s5 + $0x118] sm:$0xff] }
 0x492   :  { %v2340_v21 = vpop.f32.mrb[102].mxu1 }
 0x493   :  { %v2341_v43 = vpop.f32.mrb[103].mxu1  ;;  %v2851_v21 = vld [vmem:[%s6947_s5 + $0x1a0] sm:$0xff] }
 0x494   :  { %v2852_v43 = vld [vmem:[%s6947_s5 + $0x1a8] sm:$0xff] }
 0x4aa   :  { %v2492_v33 = vpop.f32.mrb[104].mxu1 }
 0x4ab   :  { %v2493_v53 = vpop.f32.mrb[105].mxu1 }
 0x4ae   :  { %v2496_v18 = vpop.f32.mrb[106].mxu1 }
 0x4af   :  { %v2497_v8 = vpop.f32.mrb[107].mxu1  ;;  %v4134_v18 = vpack.c.bf16 %v2834_v59, %v2833_v28  ;;  %v2867_v28 = vld [vmem:[%s6947_s5 + $0x220] sm:$0xff]  ;;  %v2868_v59 = vld [vmem:[%s6947_s5 + $0x228] sm:$0xff] }
 0x4b2   :  { %v2500_v27 = vpop.f32.mrb[108].mxu1 }
 0x4b3   :  { %v2501_v0 = vpop.f32.mrb[109].mxu1  ;;  %v4136_v27 = vpack.c.bf16 %v2852_v43, %v2851_v21  ;;  %v2869_v21 = vld [vmem:[%s6947_s5 + $0x230] sm:$0xff]  ;;  %v2870_v43 = vld [vmem:[%s6947_s5 + $0x238] sm:$0xff] }
 0x4b4   :  { %v2835_v0 = vld [vmem:[%s6947_s5 + $0x120] sm:$0xff] }
 0x4ca   :  { %v2534_v60 = vpop.f32.mrb[110].mxu1 }
 0x4cb   :  { %v2535_v39 = vpop.f32.mrb[111].mxu1  ;;  %v2836_v60 = vld [vmem:[%s6947_s5 + $0x128] sm:$0xff] }
 0x4ce   :  { %v2538_v5 = vpop.f32.mrb[112].mxu1 }
 0x4cf   :  { %v2539_v35 = vpop.f32.mrb[113].mxu1 }
 0x4d0   :  { %v2853_v35 = vld [vmem:[%s6947_s5 + $0x1b0] sm:$0xff] }
 0x4d2   :  { %v2542_v29 = vpop.f32.mrb[114].mxu1 }
 0x4d3   :  { %v2543_v15 = vpop.f32.mrb[115].mxu1  ;;  %v2854_v29 = vld [vmem:[%s6947_s5 + $0x1b8] sm:$0xff] }
 0x4d6   :  { %v2664_v58 = vpop.f32.mrb[48].mxu1 }
 0x4d7   :  { %v2666_v6 = vpop.f32.mrb[49].mxu1 }
 0x4d8   :  { %v2768_v52 = vmax.f32 %v2664_v58, %v2666_v6 }
 0x4da   :  { %v2670_v20 = vpop.f32.mrb[50].mxu1 }
 0x4db   :  { %v2672_v13 = vpop.f32.mrb[51].mxu1 }
 0x4dc   :  { %v2769_v47 = vmax.f32 %v2670_v20, %v2672_v13  ;;  %v4140_v13 = vpack.c.bf16 %v2854_v29, %v2853_v35  ;;  %v2877_v29 = vld [vmem:[%s6947_s5 + $0x270] sm:$0xff] }
 0x4de   :  { %v2676_v55 = vpop.f32.mrb[52].mxu1 }
 0x4df   :  { %v2678_v61 = vpop.f32.mrb[53].mxu1 }
 0x4e0   :  { %v2770_v31 = vmax.f32 %v2676_v55, %v2678_v61  ;;  %v2838_v55 = vld [vmem:[%s6947_s5 + $0x138] sm:$0xff] }
 0x4e2   :  { %v2682_v32 = vpop.f32.mrb[54].mxu1 }
 0x4e3   :  { %v2684_v3 = vpop.f32.mrb[55].mxu1 }
 0x4e4   :  { %v2771_v63 = vmax.f32 %v2682_v32, %v2684_v3  ;;  %v2856_v32 = vld [vmem:[%s6947_s5 + $0x1c8] sm:$0xff] }
 0x4e6   :  { %v2688_v50 = vpop.f32.mrb[56].mxu1 }
 0x4e7   :  { %v2690_v54 = vpop.f32.mrb[57].mxu1 }
 0x4e8   :  { %v2772_v7 = vmax.f32 %v2688_v50, %v2690_v54 }
 0x4ea   :  { %v2694_v56 = vpop.f32.mrb[116].mxu1 }
 0x4eb   :  { %v2695_v38 = vpop.f32.mrb[117].mxu1  ;;  %v2840_v56 = vld [vmem:[%s6947_s5 + $0x148] sm:$0xff] }
 0x4ec   :  { %v2857_v38 = vld [vmem:[%s6947_s5 + $0x1d0] sm:$0xff] }
 0x4ee   :  { %v2698_v22 = vpop.f32.mrb[118].mxu1 }
 0x4ef   :  { %v2699_v48 = vpop.f32.mrb[119].mxu1  ;;  %v2858_v22 = vld [vmem:[%s6947_s5 + $0x1d8] sm:$0xff] }
 0x4f2   :  { %v2702_v49 = vpop.f32.mrb[120].mxu1 }
 0x4f3   :  { %v2703_v12 = vpop.f32.mrb[121].mxu1 }
 0x4f6   :  { %v2706_v16 = vpop.f32.mrb[64].mxu1 }
 0x4f7   :  { %v2708_v9 = vpop.f32.mrb[65].mxu1 }
 0x4f8   :  { %v2773_v19 = vmax.f32 %v2706_v16, %v2708_v9  ;;  %v4148_v16 = vpack.c.bf16 %v2858_v22, %v2857_v38  ;;  %v2841_v9 = vld [vmem:[%s6947_s5 + $0x150] sm:$0xff] }
 0x4f9   :  { %v3107_v22 = vld [vmem:[%s6949_s7 + $0x50] sm:$0xff] }
 0x4fa   :  { %v2778_v17 = vmax.f32 %v2768_v52, %v2773_v19  ;;  %v2712_v24 = vpop.f32.mrb[66].mxu1  ;;  %v4138_v52 = vpack.c.bf16 %v2836_v60, %v2835_v0  ;;  %v2842_v19 = vld [vmem:[%s6947_s5 + $0x158] sm:$0xff] }
 0x4fb   :  { %v2714_v41 = vpop.f32.mrb[67].mxu1  ;;  %v2874_v0 = vld [vmem:[%s6947_s5 + $0x258] sm:$0xff] }
 0x4fc   :  { %v2774_v36 = vmax.f32 %v2712_v24, %v2714_v41  ;;  %v2789_v57 = vadd.f32 %v6654_v23, %v2778_v17  ;;  %v2859_v17 = vld [vmem:[%s6947_s5 + $0x1e0] sm:$0xff]  ;;  %v2860_v24 = vld [vmem:[%s6947_s5 + $0x1e8] sm:$0xff]  ;;  %v4150_v41 = vpack.c.bf16 %v2842_v19, %v2841_v9  ;;  %v3111_v19 = vld [vmem:[%s6949_s7 + $0x70] sm:$0xff] }
 0x4fe   :  { %v2779_v30 = vmax.f32 %v2769_v47, %v2774_v36  ;;  %v2718_v34 = vpop.f32.mrb[68].mxu1  ;;  %v2794_v1 = vmax.f32 %v2789_v57, 0.0  ;;  %v2837_v47 = vld [vmem:[%s6947_s5 + $0x130] sm:$0xff]  ;;  %v4152_v36 = vpack.c.bf16 %v2860_v24, %v2859_v17  ;;  %v3112_v17 = vld [vmem:[%s6949_s7 + $0x78] sm:$0xff] }
 0x4ff   :  { %v2720_v42 = vpop.f32.mrb[69].mxu1  ;;  %v2861_v57 = vld [vmem:[%s6947_s5 + $0x1f0] sm:$0xff]  ;;  %v4206_v24 = vpack.c.bf16 %v3112_v17, %v3111_v19 }
 0x500   :  { %v2775_v51 = vmax.f32 %v2718_v34, %v2720_v42  ;;  %v2790_v45 = vadd.f32 %v6654_v23, %v2779_v30  ;;  %v2843_v30 = vld [vmem:[%s6947_s5 + $0x160] sm:$0xff]  ;;  %v2844_v34 = vld [vmem:[%s6947_s5 + $0x168] sm:$0xff]  ;;  %v2862_v42 = vld [vmem:[%s6947_s5 + $0x1f8] sm:$0xff] }
 0x501   :  { %v4154_v37 = vpack.c.bf16 %v2844_v34, %v2843_v30  ;;  %v4156_v44 = vpack.c.bf16 %v2862_v42, %v2861_v57  ;;  %v3547_v34 = vld [vmem:[%s6950_s6] ss:$0 sm:$0xff] }
 0x502   :  { %v6670_v26 = vmax.f32 %v2770_v31, %v2775_v51  ;;  %v2724_v40 = vpop.f32.mrb[70].mxu1  ;;  %v2795_v4 = vmax.f32 %v2790_v45, 0.0  ;;  %v2855_v31 = vld [vmem:[%s6947_s5 + $0x1c0] sm:$0xff]  ;;  %v2845_v51 = vld [vmem:[%s6947_s5 + $0x170] sm:$0xff]  ;;  %v2846_v45 = vld [vmem:[%s6947_s5 + $0x178] sm:$0xff] }
 0x503   :  { %v2726_v14 = vpop.f32.mrb[71].mxu1  ;;  %v4144_v54 = vpack.c.bf16 %v2856_v32, %v2855_v31  ;;  %v4158_v10 = vpack.c.bf16 %v2846_v45, %v2845_v51  ;;  %v3101_v31 = vld [vmem:[%s6949_s7 + $0x20] sm:$0xff]  ;;  %v3102_v32 = vld [vmem:[%s6949_s7 + $0x28] sm:$0xff] }
 0x504   :  { %v2776_v11 = vmax.f32 %v2724_v40, %v2726_v14  ;;  %2950 = vmatprep.mubr.f32.mxu1 %v2795_v4  ;;  %v2791_v62 = vadd.f32 %v6654_v23, %v6670_v26  ;;  %v2863_v40 = vld [vmem:[%s6947_s5 + $0x200] sm:$0xff]  ;;  %v2864_v4 = vld [vmem:[%s6947_s5 + $0x208] sm:$0xff]  ;;  %v4596_v14 = vmov 0.0|0.0  }
 0x505   :  { %2951 = vmatmul.mubr.f32.vlgmr.msra.gmra.mrb[128].mxu1 %v2794_v1  ;;  %v3191_v45 = vld [vmem:[%s6951_s9] sm:$0xff] }
 0x506   :  { %v2781_v33 = vmax.f32 %v2771_v63, %v2776_v11  ;;  %4131 = vmatpush3.bf16.msra.mxu1 %v4130_v46  ;;  %v2730_v53 = vpop.f32.mrb[72].mxu1  ;;  %v4142_v63 = vpack.c.bf16 %v2838_v55, %v2837_v47  ;;  %v4161_v46 = vpack.c.bf16 %v2864_v4, %v2863_v40  ;;  %v2796_v1 = vmax.f32 %v2791_v62, 0.0  ;;  %v3100_v55 = vld [vmem:[%s6949_s7 + $0x18] sm:$0xff] }
 0x507   :  { %v2732_v8 = vpop.f32.mrb[73].mxu1  ;;  %4133 = vmatprep.subr.bf16.mxu1 %v4132_v2  ;;  %v2865_v2 = vld [vmem:[%s6947_s5 + $0x210] sm:$0xff]  ;;  %v4167_v11 = vpack.c.bf16 %v2868_v59, %v2867_v28  ;;  %v3195_v28 = vld [vmem:[%s6951_s9 + $0x20] sm:$0xff]  ;;  %v3196_v59 = vld [vmem:[%s6951_s9 + $0x28] sm:$0xff] }
 0x508   :  { %v2777_v39 = vmax.f32 %v2730_v53, %v2732_v8  ;;  %v2792_v5 = vadd.f32 %v6654_v23, %v2781_v33  ;;  %v4170_v33 = vpack.c.bf16 %v2870_v43, %v2869_v21  ;;  %v2871_v53 = vld [vmem:[%s6947_s5 + $0x240] sm:$0xff]  ;;  %v3197_v21 = vld [vmem:[%s6951_s9 + $0x30] sm:$0xff] }
 0x50a   :  { %v2782_v15 = vmax.f32 %v2772_v7, %v2777_v39  ;;  %4135 = vmatpush3.bf16.msra.mxu1 %v4134_v18  ;;  %v2736_v58 = vpop.f32.mrb[122].mxu1  ;;  %v2797_v6 = vmax.f32 %v2792_v5, 0.0  ;;  %v2839_v7 = vld [vmem:[%s6947_s5 + $0x140] sm:$0xff]  ;;  %v2872_v18 = vld [vmem:[%s6947_s5 + $0x248] sm:$0xff] }
 0x50b   :  { %v2737_v20 = vpop.f32.mrb[123].mxu1  ;;  %4137 = vmatprep.subr.bf16.mxu1 %v4136_v27  ;;  %v4146_v49 = vpack.c.bf16 %v2840_v56, %v2839_v7  ;;  %v4173_v8 = vpack.c.bf16 %v2872_v18, %v2871_v53  ;;  %v2873_v27 = vld [vmem:[%s6947_s5 + $0x250] sm:$0xff]  ;;  %v2875_v39 = vld [vmem:[%s6947_s5 + $0x260] sm:$0xff]  ;;  %v2876_v5 = vld [vmem:[%s6947_s5 + $0x268] sm:$0xff] }
 0x50c   :  { %v6704_v61 = vadd.f32 %v6654_v23, %v2782_v15  ;;  %3020 = vmatprep.mubr.f32.mxu1 %v2797_v6  ;;  %v2866_v23 = vld [vmem:[%s6947_s5 + $0x218] sm:$0xff]  ;;  %v4176_v60 = vpack.c.bf16 %v2874_v0, %v2873_v27  ;;  %v4179_v35 = vpack.c.bf16 %v2876_v5, %v2875_v39  ;;  %v3098_v20 = vld [vmem:[%s6949_s7 + $0x8] sm:$0xff]  ;;  %v3105_v7 = vld [vmem:[%s6949_s7 + $0x40] sm:$0xff] }
 0x50d   :  { %v4164_v26 = vpack.c.bf16 %v2866_v23, %v2865_v2  ;;  %v2878_v15 = vld [vmem:[%s6947_s5 + $0x278] sm:$0xff]  ;;  %v3106_v56 = vld [vmem:[%s6949_s7 + $0x48] sm:$0xff]  ;;  %v3193_v2 = vld [vmem:[%s6951_s9 + $0x10] sm:$0xff] }
 0x50e   :  { %4139 = vmatpush3.bf16.msra.mxu1 %v4138_v52  ;;  %v2740_v3 = vpop.f32.mrb[124].mxu1  ;;  %v4182_v58 = vpack.c.bf16 %v2878_v15, %v2877_v29  ;;  %v2798_v6 = vmax.f32 %v6704_v61, 0.0  ;;  %v3097_v52 = vld [vmem:[%s6949_s7] sm:$0xff]  ;;  %v4197_v38 = vpack.c.bf16 %v3106_v56, %v3105_v7  ;;  %v3194_v23 = vld [vmem:[%s6951_s9 + $0x18] sm:$0xff]  ;;  %v3200_v53 = vld [vmem:[%s6951_s9 + $0x48] sm:$0xff] }
 0x50f   :  { %v2741_v50 = vpop.f32.mrb[125].mxu1  ;;  %4141 = vmatprep.subr.bf16.mxu1 %v4140_v13  ;;  %v3099_v13 = vld [vmem:[%s6949_s7 + $0x10] sm:$0xff]  ;;  %v4185_v47 = vpack.c.bf16 %v3098_v20, %v3097_v52  ;;  %v4191_v3 = vpack.c.bf16 %v3102_v32, %v3101_v31  ;;  %v3202_v27 = vld [vmem:[%s6951_s9 + $0x58] sm:$0xff]  ;;  %v3204_v39 = vld [vmem:[%s6951_s9 + $0x68] sm:$0xff] }
 0x510   :  { %v4188_v61 = vpack.c.bf16 %v3100_v55, %v3099_v13  ;;  %v3104_v50 = vld [vmem:[%s6949_s7 + $0x38] sm:$0xff] }
 0x511   :  { %v3206_v29 = vld [vmem:[%s6951_s9 + $0x78] sm:$0xff] }
 0x512   :  { %4143 = vmatpush3.bf16.msra.mxu1 %v4142_v63  ;;  %v2744_v48 = vpop.f32.mrb[126].mxu1  ;;  %v3103_v63 = vld [vmem:[%s6949_s7 + $0x30] sm:$0xff] }
 0x513   :  { %v2745_v12 = vpop.f32.mrb[127].mxu1  ;;  %4145 = vmatprep.subr.bf16.mxu1 %v4144_v54  ;;  %v4194_v54 = vpack.c.bf16 %v3104_v50, %v3103_v63  ;;  %v3108_v48 = vld [vmem:[%s6949_s7 + $0x58] sm:$0xff] }
 0x514   :  { %v3109_v12 = vld [vmem:[%s6949_s7 + $0x60] sm:$0xff] }
 0x516   :  { %4147 = vmatpush3.bf16.msra.mxu1 %v4146_v49  ;;  %v4200_v49 = vpack.c.bf16 %v3108_v48, %v3107_v22 }
 0x517   :  { %4149 = vmatprep.subr.bf16.mxu1 %v4148_v16  ;;  %v3110_v16 = vld [vmem:[%s6949_s7 + $0x68] sm:$0xff] }
 0x518   :  { %v4203_v9 = vpack.c.bf16 %v3110_v16, %v3109_v12 }
 0x51a   :  { %4151 = vmatpush3.bf16.msra.mxu1 %v4150_v41 }
 0x51b   :  { %4153 = vmatprep.subr.bf16.mxu1 %v4152_v36 }
 0x51e   :  { %4155 = vmatpush3.bf16.msra.mxu1 %v4154_v37 }
 0x51f   :  { %4157 = vmatprep.subr.bf16.mxu1 %v4156_v44 }
 0x522   :  { %4159 = vmatpush3.bf16.msra.mxu1 %v4158_v10  ;;  %v3192_v10 = vld [vmem:[%s6951_s9 + $0x8] sm:$0xff] }
 0x523   :  { %4160 = vmatprep.subr.bf16.mxu1 %v4596_v14 }
 0x525   :  { %3021 = vmatmul.mubr.f32.vlgmr.msra.gmra.mrb[130].mxu1 %v2796_v1 }
 0x526   :  { %4162 = vmatpush3.bf16.msra.mxu1 %v4161_v46  ;;  %3703 = vmatprep.mubr.msk.f32.mxu1 %vm4597_vm0, %v6964_v25  ;;  %v4209_v46 = vpack.c.bf16 %v3192_v10, %v3191_v45 }
 0x527   :  { %4163 = vmatprep.subr.bf16.mxu1 %v4596_v14 }
 0x52a   :  { %4165 = vmatpush3.bf16.msra.mxu1 %v4164_v26  ;;  %v4212_v26 = vpack.c.bf16 %v3194_v23, %v3193_v2 }
 0x52b   :  { %4166 = vmatprep.subr.bf16.mxu1 %v4596_v14 }
 0x52e   :  { %4168 = vmatpush3.bf16.msra.mxu1 %v4167_v11  ;;  %v4215_v11 = vpack.c.bf16 %v3196_v59, %v3195_v28 }
 0x52f   :  { %4169 = vmatprep.subr.bf16.mxu1 %v4596_v14 }
 0x532   :  { %4171 = vmatpush3.bf16.msra.mxu1 %v4170_v33  ;;  %v3199_v33 = vld [vmem:[%s6951_s9 + $0x40] sm:$0xff] }
 0x533   :  { %4172 = vmatprep.subr.bf16.mxu1 %v4596_v14  ;;  %v4221_v18 = vpack.c.bf16 %v3200_v53, %v3199_v33 }
 0x536   :  { %4174 = vmatpush3.bf16.msra.mxu1 %v4173_v8  ;;  %v3201_v8 = vld [vmem:[%s6951_s9 + $0x50] sm:$0xff] }
 0x537   :  { %4175 = vmatprep.subr.bf16.mxu1 %v4596_v14  ;;  %v4224_v0 = vpack.c.bf16 %v3202_v27, %v3201_v8 }
 0x53a   :  { %4177 = vmatpush3.bf16.msra.mxu1 %v4176_v60  ;;  %v3203_v60 = vld [vmem:[%s6951_s9 + $0x60] sm:$0xff] }
 0x53b   :  { %4178 = vmatprep.subr.bf16.mxu1 %v4596_v14  ;;  %v4227_v5 = vpack.c.bf16 %v3204_v39, %v3203_v60 }
 0x53e   :  { %4180 = vmatpush3.bf16.msra.mxu1 %v4179_v35  ;;  %v3205_v35 = vld [vmem:[%s6951_s9 + $0x70] sm:$0xff] }
 0x53f   :  { %4181 = vmatprep.subr.bf16.mxu1 %v4596_v14  ;;  %v4230_v15 = vpack.c.bf16 %v3206_v29, %v3205_v35 }
 0x542   :  { %4183 = vmatpush3.bf16.msra.mxu1 %v4182_v58  ;;  %v3548_v58 = vld [vmem:[%s6952_s8] ss:$0 sm:$0xff] }
 0x543   :  { %4184 = vmatprep.subr.bf16.mxu1 %v4596_v14 }
 0x545   :  { %3704 = vmatmul.mubr.f32.vlgmr.msra.gmra.mrb[132].mxu1 %v2798_v6 }
 0x546   :  { %3738 = vmatprep.mubr.msk.f32.mxu1 %vm4597_vm0, %v6964_v25  ;;  %4186 = vmatpush3.bf16.msra.mxu1 %v4185_v47 }
 0x547   :  { %4187 = vmatprep.subr.bf16.mxu1 %v4596_v14 }
 0x54a   :  { %4189 = vmatpush3.bf16.msra.mxu1 %v4188_v61 }
 0x54b   :  { %4190 = vmatprep.subr.bf16.mxu1 %v4596_v14 }
 0x54e   :  { %4192 = vmatpush3.bf16.msra.mxu1 %v4191_v3 }
 0x54f   :  { %4193 = vmatprep.subr.bf16.mxu1 %v4596_v14 }
 0x552   :  { %4195 = vmatpush3.bf16.msra.mxu1 %v4194_v54 }
 0x553   :  { %4196 = vmatprep.subr.bf16.mxu1 %v4596_v14 }
 0x556   :  { %4198 = vmatpush3.bf16.msra.mxu1 %v4197_v38 }
 0x557   :  { %4199 = vmatprep.subr.bf16.mxu1 %v4596_v14 }
 0x55a   :  { %4201 = vmatpush3.bf16.msra.mxu1 %v4200_v49 }
 0x55b   :  { %4202 = vmatprep.subr.bf16.mxu1 %v4596_v14 }
 0x55e   :  { %4204 = vmatpush3.bf16.msra.mxu1 %v4203_v9 }
 0x55f   :  { %4205 = vmatprep.subr.bf16.mxu1 %v4596_v14 }
 0x562   :  { %4207 = vmatpush3.bf16.msra.mxu1 %v4206_v24 }
 0x563   :  { %4208 = vmatprep.subr.bf16.mxu1 %v4596_v14 }
 0x5d8   :  { %v3582_v41 = vpop.f32.mrb[128].mxu1 }
 0x5d9   :  { %v3583_v36 = vpop.f32.mrb[129].mxu1 }
 0x5da   :  { %v3584_v30 = vadd.f32 %v3583_v36, %v3582_v41 }
 0x5dc   :  { %v2953_v37 = vadd.f32 %v3584_v30, %v3547_v34 }
 0x5f8   :  { %v3617_v57 = vpop.f32.mrb[130].mxu1 }
 0x5f9   :  { %v3618_v42 = vpop.f32.mrb[131].mxu1 }
 0x5fa   :  { %v3619_v44 = vadd.f32 %v3618_v42, %v3617_v57 }
 0x5fc   :  { %v3023_v51 = vadd.f32 %v3619_v44, %v2953_v37 }
 0x618   :  { %v3092_v62 = vpop.f32.mrb[132].mxu1 }
 0x619   :  { %v3093_v40 = vadd.f32 %v3092_v62, %v3023_v51  ;;  %v3705_v4 = vpop.f32.mrb[133].mxu1 }
 0x61b   :  { %v3096_v1 = vmax.f32 %v3093_v40, 0.0 }
 0x61d   :  { %3739 = vmatmul.mubr.f32.vlgmr.msra.gmra.mrb[134].mxu1 %v3096_v1 }
 0x61e   :  { %4210 = vmatpush3.bf16.msra.mxu1 %v4209_v46  ;;  %3773 = vmatprep.mubr.msk.f32.mxu1 %vm4597_vm0, %v6964_v25  ;;  %v3198_v25 = vld [vmem:[%s6951_s9 + $0x38] sm:$0xff] }
 0x61f   :  { %4211 = vmatprep.subr.bf16.mxu1 %v4596_v14  ;;  %v4218_v43 = vpack.c.bf16 %v3198_v25, %v3197_v21 }
 0x622   :  { %4213 = vmatpush3.bf16.msra.mxu1 %v4212_v26 }
 0x623   :  { %4214 = vmatprep.subr.bf16.mxu1 %v4596_v14 }
 0x626   :  { %4216 = vmatpush3.bf16.msra.mxu1 %v4215_v11 }
 0x627   :  { %4217 = vmatprep.subr.bf16.mxu1 %v4596_v14 }
 0x62a   :  { %4219 = vmatpush3.bf16.msra.mxu1 %v4218_v43 }
 0x62b   :  { %4220 = vmatprep.subr.bf16.mxu1 %v4596_v14 }
 0x62e   :  { %4222 = vmatpush3.bf16.msra.mxu1 %v4221_v18 }
 0x62f   :  { %4223 = vmatprep.subr.bf16.mxu1 %v4596_v14 }
 0x632   :  { %4225 = vmatpush3.bf16.msra.mxu1 %v4224_v0 }
 0x633   :  { %4226 = vmatprep.subr.bf16.mxu1 %v4596_v14 }
 0x636   :  { %4228 = vmatpush3.bf16.msra.mxu1 %v4227_v5 }
 0x637   :  { %4229 = vmatprep.subr.bf16.mxu1 %v4596_v14  ;;  %v3549_v14 = vld [vmem:[%s6953_s10] ss:$0 sm:$0xff] }
 0x63a   :  { %4231 = vmatpush3.bf16.msra.mxu1 %v4230_v15 }
 0x6f0   :  { %v3186_v6 = vpop.f32.mrb[134].mxu1 }
 0x6f1   :  { %v3187_v52 = vadd.f32 %v3548_v58, %v3186_v6  ;;  %v3740_v20 = vpop.f32.mrb[135].mxu1 }
 0x6f3   :  { %v3190_v13 = vmax.f32 %v3187_v52, 0.0 }
 0x6f5   :  { %3774 = vmatmul.mubr.f32.vlgmr.msra.gmra.mrb[136].mxu1 %v3190_v13 }
 0x7c8   :  { %v3280_v47 = vpop.f32.mrb[136].mxu1 }
 0x7c9   :  { %v3281_v55 = vadd.f32 %v3549_v14, %v3280_v47  ;;  %v3775_v61 = vpop.f32.mrb[137].mxu1 }
 0x7cb   :  { %3284 = vst [vmem:[%s6954_s11] sm:$0xff] %v3281_v55 }

</bundles_post_ra>
